<compile_context>
chip_gen: v6e
topology: v6e:2x2x1
jax: 0.10.0
libtpu: 0.0.40
codegen_flags: <defaults>
</compile_context>

<pallas_src>
import functools
import math

import jax
import jax.numpy as jnp
from jax.experimental import pallas as pl
from jax.experimental.pallas import tpu as pltpu

FDIM = 64          # feature encoder output dim
HDIM = 32          # hidden dim
CDIM = 32          # context dim
CORR_LEVELS = 2
CORR_RADIUS = 1
ITERS = 2
COR_PLANES = CORR_LEVELS * (2 * CORR_RADIUS + 1) ** 2   # 18


def _round_up(x, m):
    return (x + m - 1) // m * m


# --------------------------------------------------------------------------
# Pallas kernels
# --------------------------------------------------------------------------
def _mm_bias_act_kernel(x_ref, w_ref, b_ref, o_ref, *, act):
    # bf16 operands, f32 accumulation on the MXU; f32 epilogue on the VPU/EUP.
    y = jnp.dot(x_ref[...], w_ref[...], preferred_element_type=jnp.float32)
    y = y + b_ref[...]
    if act == "relu":
        y = jnp.maximum(y, 0.0)
    elif act == "sigmoid":
        y = jax.nn.sigmoid(y)
    elif act == "tanh":
        y = jnp.tanh(y)
    o_ref[...] = y


def mm_bias_act(x, w, b, act="none"):
    """(M,K) @ (K,N) + b with fused activation, lane-dense tiles on the MXU."""
    M, K = x.shape
    Kw, N = w.shape
    assert K == Kw

    # Lane-dense contraction / output dims: pad K and N to multiples of 128.
    Kp = _round_up(K, 128)
    Np = _round_up(N, 128)

    # Row tile: don't pad small M up to 128; aim for >=2 grid steps so work
    # can shard across 2 TensorCores (v7x) / megacore.
    if M > 8:
        TM = min(128, _round_up(-(-M // 2), 8))
    else:
        TM = _round_up(max(M, 1), 8)
    Mp = _round_up(M, TM)

    xp = x if (Mp == M and Kp == K) else jnp.pad(x, ((0, Mp - M), (0, Kp - K)))
    wp = w if (Kp == K and Np == N) else jnp.pad(w, ((0, Kp - K), (0, Np - N)))
    bp = b if Np == N else jnp.pad(b, (0, Np - N))

    xp = xp.astype(jnp.bfloat16)
    wp = wp.astype(jnp.bfloat16)
    bp = bp.reshape(1, Np).astype(jnp.float32)

    # Double-buffered VMEM requirement (+ generous headroom, capped well below
    # physical VMEM on every generation).
    need = 2 * (TM * Kp * 2 + Kp * Np * 2 + Np * 4 + TM * Np * 4)
    vmem_limit = int(min(64 * 1024 * 1024, max(8 * 1024 * 1024, 3 * need)))

    out = pl.pallas_call(
        functools.partial(_mm_bias_act_kernel, act=act),
        out_shape=jax.ShapeDtypeStruct((Mp, Np), jnp.float32),
        grid=(Mp // TM,),
        in_specs=[
            pl.BlockSpec((TM, Kp), lambda i: (i, 0)),
            pl.BlockSpec((Kp, Np), lambda i: (0, 0)),
            pl.BlockSpec((1, Np), lambda i: (0, 0)),
        ],
        out_specs=pl.BlockSpec((TM, Np), lambda i: (i, 0)),
        compiler_params=pltpu.CompilerParams(
            dimension_semantics=("parallel",),
            vmem_limit_bytes=vmem_limit,
        ),
    )(xp, wp, bp)
    return out[:M, :N]


def _corr_kernel(f1_ref, f2_ref, o_ref, *, scale):
    # f1: (1, TQ, C) bf16 (contraction on the lane axis -> no implicit
    # transpose before the MXU push), f2: (1, C, HW) bf16.
    c = jnp.dot(f1_ref[0], f2_ref[0], preferred_element_type=jnp.float32)
    o_ref[0] = c * scale


def corr_volume(fmap1, fmap2):
    """RAFT CorrBlock volume: (B,C,HW) x (B,C,HW) -> (B,HW,HW) / sqrt(C)."""
    B, C, HW = fmap1.shape
    f1t = jnp.transpose(fmap1, (0, 2, 1)).astype(jnp.bfloat16)   # (B, HW, C)
    f2 = fmap2.astype(jnp.bfloat16)

    # Row-tile over the query dim so a full HW x HW block never has to live in
    # VMEM at realistic resolutions (keeps the kernel portable to v7x 64 MiB).
    TQ = min(128, _round_up(HW, 8))
    HWp = _round_up(HW, TQ)
    if HWp != HW:
        f1t = jnp.pad(f1t, ((0, 0), (0, HWp - HW), (0, 0)))

    out = pl.pallas_call(
        functools.partial(_corr_kernel, scale=1.0 / math.sqrt(C)),
        out_shape=jax.ShapeDtypeStruct((B, HWp, HW), jnp.float32),
        grid=(B, HWp // TQ),
        in_specs=[pl.BlockSpec((1, TQ, C), lambda b, q: (b, q, 0)),
                  pl.BlockSpec((1, C, HW), lambda b, q: (b, 0, 0))],
        out_specs=pl.BlockSpec((1, TQ, HW), lambda b, q: (b, q, 0)),
        compiler_params=pltpu.CompilerParams(
            dimension_semantics=("parallel", "parallel")),
    )(f1t, f2)
    return out[:, :HW]


def _gru_combine_kernel(z_ref, q_ref, h_ref, o_ref):
    z = z_ref[...]
    o_ref[...] = (1.0 - z) * h_ref[...] + z * q_ref[...]


def gru_combine(z, q, h):
    """(1-z)*h + z*q on a lane-dense (rows, 128) layout."""
    shape = z.shape
    total = z.size
    LANE = 128
    pad = (-total) % LANE

    def flat(a):
        a = a.reshape(-1)
        if pad:
            a = jnp.pad(a, (0, pad))
        return a.reshape(-1, LANE)

    zf, qf, hf = flat(z), flat(q), flat(h)
    rows = zf.shape[0]
    spec = pl.BlockSpec((rows, LANE), lambda i: (0, 0))
    out = pl.pallas_call(
        _gru_combine_kernel,
        out_shape=jax.ShapeDtypeStruct((rows, LANE), jnp.float32),
        grid=(1,),
        in_specs=[spec, spec, spec],
        out_specs=spec,
    )(zf, qf, hf)
    return out.reshape(-1)[:total].reshape(shape)


def _upsample_kernel(m_ref, f_ref, o_ref):
    m = m_ref[0]                                    # (9, 64*HW) mask logits
    m = m - jnp.max(m, axis=0, keepdims=True)
    e = jnp.exp(m)
    inv = pl.reciprocal(jnp.sum(e, axis=0, keepdims=True), approx=True)
    sm = e * inv                                    # softmax over the 9 taps
    f = f_ref[0]                                    # (2, 9, 64*HW) unfolded 8*flow
    o_ref[0] = jnp.sum(sm[None] * f, axis=1)        # (2, 64*HW)


def upsample_flow(flow, mask):
    """Convex-combination upsampling: (N,2,h,w) -> (N,2,8h,8w)."""
    N, _, h, w = flow.shape
    HW = h * w
    L = 64 * HW
    mask_r = mask.reshape(N, 9, 64 * HW)            # == view(N,1,9,8,8,H,W)
    fl8 = 8.0 * flow
    flp = jnp.pad(fl8, ((0, 0), (0, 0), (1, 1), (1, 1)))
    nb = [flp[:, :, i:i + h, j:j + w] for i in range(3) for j in range(3)]
    flow_nb = jnp.stack(nb, axis=2).reshape(N, 2, 9, 1, HW)   # F.unfold order
    flow_b = jnp.broadcast_to(flow_nb, (N, 2, 9, 64, HW)).reshape(N, 2, 9, L)
    out = pl.pallas_call(
        _upsample_kernel,
        out_shape=jax.ShapeDtypeStruct((N, 2, L), jnp.float32),
        grid=(N,),
        in_specs=[pl.BlockSpec((1, 9, L), lambda n: (n, 0, 0)),
                  pl.BlockSpec((1, 2, 9, L), lambda n: (n, 0, 0, 0))],
        out_specs=pl.BlockSpec((1, 2, L), lambda n: (n, 0, 0)),
        compiler_params=pltpu.CompilerParams(dimension_semantics=("parallel",)),
    )(mask_r, flow_b)
    out = out.reshape(N, 2, 8, 8, h, w)
    out = jnp.transpose(out, (0, 1, 4, 2, 5, 3))    # == permute(0,1,4,2,5,3)
    return out.reshape(N, 2, 8 * h, 8 * w)


# --------------------------------------------------------------------------
# Conv-as-matmul (im2col glue in JAX, matmul in Pallas)
# --------------------------------------------------------------------------
# TODO(synk): at real RAFT resolutions the stack-of-slices im2col should be
# replaced by a halo-tiled in-kernel patch extraction (or lax.conv fallback)
# to avoid kh*kw-x activation HBM traffic; at these toy shapes it is cheap.
def _im2col(x, kh, kw, stride, ph, pw):
    N, C, H, W = x.shape
    xp = jnp.pad(x, ((0, 0), (0, 0), (ph, ph), (pw, pw)))
    Ho = (H + 2 * ph - kh) // stride + 1
    Wo = (W + 2 * pw - kw) // stride + 1
    cols = [xp[:, :, i:i + stride * Ho:stride, j:j + stride * Wo:stride]
            for i in range(kh) for j in range(kw)]
    patches = jnp.stack(cols, axis=2)               # (N, C, kh*kw, Ho, Wo)
    return patches.reshape(N, C * kh * kw, Ho, Wo), Ho, Wo


def conv2d(x, p, stride=1, padding=(0, 0), act="none"):
    w, b = p["w"], p["b"]
    cout, cin, kh, kw = w.shape
    if isinstance(padding, int):
        padding = (padding, padding)
    N = x.shape[0]
    if kh == 1 and kw == 1 and stride == 1 and padding == (0, 0):
        # 1x1 conv: pure channel matmul, no patch extraction needed.
        _, C, H, W = x.shape
        X = x.transpose(0, 2, 3, 1).reshape(N * H * W, C)
        Ho, Wo = H, W
    else:
        patches, Ho, Wo = _im2col(x, kh, kw, stride, padding[0], padding[1])
        X = patches.transpose(0, 2, 3, 1).reshape(N * Ho * Wo, cin * kh * kw)
    Wm = w.reshape(cout, cin * kh * kw).T
    y = mm_bias_act(X, Wm, b, act=act)
    return y.reshape(N, Ho, Wo, cout).transpose(0, 3, 1, 2)


# --------------------------------------------------------------------------
# Plain-JAX glue: norms, coords, correlation lookup
# --------------------------------------------------------------------------
def instance_norm(x, eps=1e-5):
    m = x.mean(axis=(2, 3), keepdims=True)
    v = x.var(axis=(2, 3), keepdims=True)
    return (x - m) / jnp.sqrt(v + eps)


def batch_norm(x, eps=1e-5):
    m = x.mean(axis=(0, 2, 3), keepdims=True)
    v = x.var(axis=(0, 2, 3), keepdims=True)
    return (x - m) / jnp.sqrt(v + eps)


def coords_grid(n, h, w):
    ys, xs = jnp.meshgrid(jnp.arange(h), jnp.arange(w), indexing="ij")
    coords = jnp.stack([xs, ys], axis=0).astype(jnp.float32)   # ch0 = x, ch1 = y
    return jnp.broadcast_to(coords[None], (n, 2, h, w))


def avg_pool2(x):
    M, C, H, W = x.shape
    return x.reshape(M, C, H // 2, 2, W // 2, 2).mean(axis=(3, 5))


def _bilinear_sample_zeros(img, x, y):
    # img: (M, Hl, Wl);  x, y: (M, P) pixel coords (align_corners, zero padding)
    M, Hl, Wl = img.shape
    flat = img.reshape(M, Hl * Wl)
    x0 = jnp.floor(x); y0 = jnp.floor(y)
    x1 = x0 + 1.0;     y1 = y0 + 1.0
    wx1 = x - x0; wx0 = 1.0 - wx1
    wy1 = y - y0; wy0 = 1.0 - wy1

    def gather(xi, yi):
        valid = (xi >= 0) & (xi <= Wl - 1) & (yi >= 0) & (yi <= Hl - 1)
        xi_c = jnp.clip(xi, 0, Wl - 1).astype(jnp.int32)
        yi_c = jnp.clip(yi, 0, Hl - 1).astype(jnp.int32)
        vals = jnp.take_along_axis(flat, yi_c * Wl + xi_c, axis=1)
        return vals * valid.astype(img.dtype)

    return (gather(x0, y0) * wx0 * wy0 + gather(x1, y0) * wx1 * wy0 +
            gather(x0, y1) * wx0 * wy1 + gather(x1, y1) * wx1 * wy1)


# TODO(synk): CorrBlock's F.grid_sample lookup is a data-dependent gather with
# no clean Pallas/TPU lowering at these shapes; it stays in plain JAX.
def corr_lookup(pyramid, coords, radius):
    B, _, h, w = coords.shape
    M = B * h * w
    cp = coords.transpose(0, 2, 3, 1).reshape(M, 2)            # (x, y)
    offs = jnp.arange(-radius, radius + 1, dtype=jnp.float32)
    oy, ox = jnp.meshgrid(offs, offs, indexing="ij")           # (2r+1)^2 taps
    ox = ox.reshape(1, -1)
    oy = oy.reshape(1, -1)
    feats = []
    for lvl, corr_l in enumerate(pyramid):
        scale = 1.0 / (2 ** lvl)
        xs = cp[:, 0:1] * scale + ox
        ys = cp[:, 1:2] * scale + oy
        feats.append(_bilinear_sample_zeros(corr_l[:, 0], xs, ys))
    out = jnp.concatenate(feats, axis=-1)                      # (M, levels*(2r+1)^2)
    return out.reshape(B, h, w, -1).transpose(0, 3, 1, 2)


# --------------------------------------------------------------------------
# Parameters (deterministic, in-script)
# --------------------------------------------------------------------------
def _conv_param(key, cout, cin, kh, kw):
    fan_in = cin * kh * kw
    w = jax.random.normal(key, (cout, cin, kh, kw), jnp.float32) * math.sqrt(2.0 / fan_in)
    return {"w": w, "b": jnp.zeros((cout,), jnp.float32)}


def _encoder_params(key, out_dim):
    ks = jax.random.split(key, 4)
    return {
        "conv1": _conv_param(ks[0], 32, 3, 7, 7),      # /2
        "conv2": _conv_param(ks[1], 48, 32, 3, 3),     # /4
        "conv3": _conv_param(ks[2], 64, 48, 3, 3),     # /8
        "conv_out": _conv_param(ks[3], out_dim, 64, 1, 1),
    }


def init_params(key):
    ks = jax.random.split(key, 15)
    return {
        "fnet": _encoder_params(ks[0], FDIM),
        "cnet": _encoder_params(ks[1], HDIM + CDIM),
        # BasicMotionEncoder (reduced widths)
        "convc1": _conv_param(ks[2], 64, COR_PLANES, 1, 1),
        "convc2": _conv_param(ks[3], 48, 64, 3, 3),
        "convf1": _conv_param(ks[4], 32, 2, 7, 7),
        "convf2": _conv_param(ks[5], 16, 32, 3, 3),
        "conv":   _conv_param(ks[6], 30, 64, 3, 3),
        # SepConvGRU: input = motion(32) + context(32) = 64, hidden = 32.
        # z and r gates share the same input/activation, so their weights are
        # fused along the output-channel axis (first HDIM chans = z, next = r).
        "convzr1": _conv_param(ks[7], 2 * HDIM, HDIM + 64, 1, 5),
        "convq1":  _conv_param(ks[8], HDIM, HDIM + 64, 1, 5),
        "convzr2": _conv_param(ks[9], 2 * HDIM, HDIM + 64, 5, 1),
        "convq2":  _conv_param(ks[10], HDIM, HDIM + 64, 5, 1),
        # FlowHead conv1 + mask-head conv1 fused (both 3x3 ReLU on `net`):
        # first 64 chans -> flow head, next 64 -> mask head.
        "fh1m1": _conv_param(ks[11], 128, HDIM, 3, 3),
        "fh2":   _conv_param(ks[12], 2, 64, 3, 3),
        "m2":    _conv_param(ks[13], 64 * 9, 64, 1, 1),
    }


# --------------------------------------------------------------------------
# Sub-modules
# --------------------------------------------------------------------------
# TODO(synk): BasicEncoder's residual conv stack is reduced to a 4-conv /8
# encoder (same downsampling factor / norm style, no residual blocks).
def encoder(p, x, norm):
    nf = instance_norm if norm == "instance" else batch_norm
    x = jax.nn.relu(nf(conv2d(x, p["conv1"], stride=2, padding=3)))
    x = jax.nn.relu(nf(conv2d(x, p["conv2"], stride=2, padding=1)))
    x = jax.nn.relu(nf(conv2d(x, p["conv3"], stride=2, padding=1)))
    return conv2d(x, p["conv_out"])


def _gru_dir(p, h, x, kzr, kq, pad):
    hx = jnp.concatenate([h, x], axis=1)
    zr = conv2d(hx, p[kzr], padding=pad, act="sigmoid")     # fused z|r gates
    z, r = zr[:, :HDIM], zr[:, HDIM:]
    q = conv2d(jnp.concatenate([r * h, x], axis=1), p[kq], padding=pad, act="tanh")
    return gru_combine(z, q, h)


def update_block(p, net, inp, corr, flow):
    # BasicMotionEncoder
    cor = conv2d(corr, p["convc1"], act="relu")
    cor = conv2d(cor, p["convc2"], padding=1, act="relu")
    flo = conv2d(flow, p["convf1"], padding=3, act="relu")
    flo = conv2d(flo, p["convf2"], padding=1, act="relu")
    out = conv2d(jnp.concatenate([cor, flo], axis=1), p["conv"], padding=1, act="relu")
    motion = jnp.concatenate([out, flow], axis=1)
    x = jnp.concatenate([inp, motion], axis=1)
    # SepConvGRU (horizontal 1x5 then vertical 5x1)
    net = _gru_dir(p, net, x, "convzr1", "convq1", (0, 2))
    net = _gru_dir(p, net, x, "convzr2", "convq2", (2, 0))
    # FlowHead conv1 + mask-head conv1 fused into one lane-dense (N=128) matmul
    fm = conv2d(net, p["fh1m1"], padding=1, act="relu")
    fh, m = fm[:, :64], fm[:, 64:]
    delta_flow = conv2d(fh, p["fh2"], padding=1)
    # Upsampling mask head (scaled by 0.25 as in BasicUpdateBlock)
    up_mask = 0.25 * conv2d(m, p["m2"])
    return net, up_mask, delta_flow


# --------------------------------------------------------------------------
# RAFT forward
# --------------------------------------------------------------------------
def raft_forward(params, image1, image2, iters=ITERS):
    image1 = 2.0 * (image1 / 255.0) - 1.0
    image2 = 2.0 * (image2 / 255.0) - 1.0

    fmap1 = encoder(params["fnet"], image1, norm="instance")
    fmap2 = encoder(params["fnet"], image2, norm="instance")
    cnet = encoder(params["cnet"], image1, norm="batch")
    net = jnp.tanh(cnet[:, :HDIM])
    inp = jax.nn.relu(cnet[:, HDIM:])

    b, c, h, w = fmap1.shape
    corr = corr_volume(fmap1.reshape(b, c, h * w), fmap2.reshape(b, c, h * w))
    pyramid = [corr.reshape(b * h * w, 1, h, w)]
    for _ in range(CORR_LEVELS - 1):
        pyramid.append(avg_pool2(pyramid[-1]))

    coords0 = coords_grid(b, h, w)
    coords1 = coords_grid(b, h, w)

    flow_predictions = []
    for _ in range(iters):
        corr_feat = corr_lookup(pyramid, coords1, CORR_RADIUS)
        flow = coords1 - coords0
        net, up_mask, delta_flow = update_block(params, net, inp, corr_feat, flow)
        coords1 = coords1 + delta_flow
        flow_up = upsample_flow(coords1 - coords0, up_mask)
        flow_predictions.append(flow_up)
    return flow_predictions


if __name__ == "__main__":
    key = jax.random.PRNGKey(0)
    kp, k1, k2 = jax.random.split(key, 3)
    params = init_params(kp)
    image1 = jax.random.uniform(k1, (2, 3, 32, 32), jnp.float32, 0.0, 255.0)
    image2 = jax.random.uniform(k2, (2, 3, 32, 32), jnp.float32, 0.0, 255.0)

    fwd = jax.jit(raft_forward)
    preds = fwd(params, image1, image2)
    out = jax.block_until_ready(jnp.stack(preds))
    assert out.shape == (ITERS, 2, 2, 32, 32)
    assert jnp.all(jnp.isfinite(out))
    print("KERNEL_OK")
</pallas_src>

<mosaic_0001>
module attributes {stable_mosaic.version = 11 : i64} {
  func.func @_mm_bias_act_kernel(%arg0: i32, %arg1: memref<128x256xbf16, #tpu.memory_space<vmem>>, %arg2: memref<256x128xbf16, #tpu.memory_space<vmem>>, %arg3: memref<1x128xf32, #tpu.memory_space<vmem>>, %arg4: memref<128x128xf32, #tpu.memory_space<vmem>>) attributes {dimension_semantics = [#tpu.dimension_semantics<parallel>], iteration_bounds = array<i64: 4>, scalar_prefetch = 0 : i64, scratch_operands = 0 : i64, tpu.core_type = #tpu.core_type<tc>, window_params = [{transform_indices = @transform_0, window_bounds = array<i64: 128, 256>}, {pipeline_mode = #tpu.pipeline_mode<synchronous>, transform_indices = @transform_1, window_bounds = array<i64: 256, 128>}, {pipeline_mode = #tpu.pipeline_mode<synchronous>, transform_indices = @transform_2, window_bounds = array<i64: 1, 128>}, {transform_indices = @transform_3, window_bounds = array<i64: 128, 128>}]} {
    %c0 = arith.constant 0 : index
    %c0_0 = arith.constant 0 : index
    %0 = vector.load %arg1[%c0, %c0_0] : memref<128x256xbf16, #tpu.memory_space<vmem>>, vector<128x256xbf16>
    %c0_1 = arith.constant 0 : index
    %c0_2 = arith.constant 0 : index
    %1 = vector.load %arg2[%c0_1, %c0_2] : memref<256x128xbf16, #tpu.memory_space<vmem>>, vector<256x128xbf16>
    %cst = arith.constant dense<0.000000e+00> : vector<128x128xf32>
    %2 = tpu.matmul %0, %1, %cst {dimension_numbers = #tpu.dot_dimension_numbers<[1], [0], [0], [1], [0, 0, 1, 1], [], []>} : vector<128x256xbf16>, vector<256x128xbf16>, vector<128x128xf32> -> vector<128x128xf32>
    %c0_3 = arith.constant 0 : index
    %c0_4 = arith.constant 0 : index
    %3 = vector.load %arg3[%c0_3, %c0_4] : memref<1x128xf32, #tpu.memory_space<vmem>>, vector<1x128xf32>
    %4 = vector.broadcast %3 : vector<1x128xf32> to vector<128x128xf32>
    %5 = arith.addf %2, %4 : vector<128x128xf32>
    %c0_5 = arith.constant 0 : index
    %c0_6 = arith.constant 0 : index
    %6 = vector.load %arg4[%c0_5, %c0_6] : memref<128x128xf32, #tpu.memory_space<vmem>>, vector<128x128xf32>
    tpu.vector_store %arg4[%c0_5, %c0_6], %5 {strides = array<i32>} : memref<128x128xf32, #tpu.memory_space<vmem>>, vector<128x128xf32>,
    return
  }
  func.func @transform_0(%arg0: i32) -> (i32, i32) {
    %c0_i32 = arith.constant 0 : i32
    %c0_i32_0 = arith.constant 0 : i32
    return %arg0, %c0_i32 : i32, i32
  }
  func.func @transform_1(%arg0: i32) -> (i32, i32) {
    %c0_i32 = arith.constant 0 : i32
    %c0_i32_0 = arith.constant 0 : i32
    %c0_i32_1 = arith.constant 0 : i32
    return %c0_i32, %c0_i32_0 : i32, i32
  }
  func.func @transform_2(%arg0: i32) -> (i32, i32) {
    %c0_i32 = arith.constant 0 : i32
    %c0_i32_0 = arith.constant 0 : i32
    %c0_i32_1 = arith.constant 0 : i32
    return %c0_i32, %c0_i32_0 : i32, i32
  }
  func.func @transform_3(%arg0: i32) -> (i32, i32) {
    %c0_i32 = arith.constant 0 : i32
    %c0_i32_0 = arith.constant 0 : i32
    return %arg0, %c0_i32 : i32, i32
  }
}

module attributes {stable_mosaic.version = 11 : i64} {
  func.func @_mm_bias_act_kernel(%arg0: i32, %arg1: memref<64x384xbf16, #tpu.memory_space<vmem>>, %arg2: memref<384x128xbf16, #tpu.memory_space<vmem>>, %arg3: memref<1x128xf32, #tpu.memory_space<vmem>>, %arg4: memref<64x128xf32, #tpu.memory_space<vmem>>) attributes {dimension_semantics = [#tpu.dimension_semantics<parallel>], iteration_bounds = array<i64: 2>, scalar_prefetch = 0 : i64, scratch_operands = 0 : i64, tpu.core_type = #tpu.core_type<tc>, window_params = [{transform_indices = @transform_0, window_bounds = array<i64: 64, 384>}, {pipeline_mode = #tpu.pipeline_mode<synchronous>, transform_indices = @transform_1, window_bounds = array<i64: 384, 128>}, {pipeline_mode = #tpu.pipeline_mode<synchronous>, transform_indices = @transform_2, window_bounds = array<i64: 1, 128>}, {transform_indices = @transform_3, window_bounds = array<i64: 64, 128>}]} {
    %c0 = arith.constant 0 : index
    %c0_0 = arith.constant 0 : index
    %0 = vector.load %arg1[%c0, %c0_0] : memref<64x384xbf16, #tpu.memory_space<vmem>>, vector<64x384xbf16>
    %c0_1 = arith.constant 0 : index
    %c0_2 = arith.constant 0 : index
    %1 = vector.load %arg2[%c0_1, %c0_2] : memref<384x128xbf16, #tpu.memory_space<vmem>>, vector<384x128xbf16>
    %cst = arith.constant dense<0.000000e+00> : vector<64x128xf32>
    %2 = tpu.matmul %0, %1, %cst {dimension_numbers = #tpu.dot_dimension_numbers<[1], [0], [0], [1], [0, 0, 1, 1], [], []>} : vector<64x384xbf16>, vector<384x128xbf16>, vector<64x128xf32> -> vector<64x128xf32>
    %c0_3 = arith.constant 0 : index
    %c0_4 = arith.constant 0 : index
    %3 = vector.load %arg3[%c0_3, %c0_4] : memref<1x128xf32, #tpu.memory_space<vmem>>, vector<1x128xf32>
    %4 = vector.broadcast %3 : vector<1x128xf32> to vector<64x128xf32>
    %5 = arith.addf %2, %4 : vector<64x128xf32>
    %c0_5 = arith.constant 0 : index
    %c0_6 = arith.constant 0 : index
    %6 = vector.load %arg4[%c0_5, %c0_6] : memref<64x128xf32, #tpu.memory_space<vmem>>, vector<64x128xf32>
    tpu.vector_store %arg4[%c0_5, %c0_6], %5 {strides = array<i32>} : memref<64x128xf32, #tpu.memory_space<vmem>>, vector<64x128xf32>,
    return
  }
  func.func @transform_0(%arg0: i32) -> (i32, i32) {
    %c0_i32 = arith.constant 0 : i32
    %c0_i32_0 = arith.constant 0 : i32
    return %arg0, %c0_i32 : i32, i32
  }
  func.func @transform_1(%arg0: i32) -> (i32, i32) {
    %c0_i32 = arith.constant 0 : i32
    %c0_i32_0 = arith.constant 0 : i32
    %c0_i32_1 = arith.constant 0 : i32
    return %c0_i32, %c0_i32_0 : i32, i32
  }
  func.func @transform_2(%arg0: i32) -> (i32, i32) {
    %c0_i32 = arith.constant 0 : i32
    %c0_i32_0 = arith.constant 0 : i32
    %c0_i32_1 = arith.constant 0 : i32
    return %c0_i32, %c0_i32_0 : i32, i32
  }
  func.func @transform_3(%arg0: i32) -> (i32, i32) {
    %c0_i32 = arith.constant 0 : i32
    %c0_i32_0 = arith.constant 0 : i32
    return %arg0, %c0_i32 : i32, i32
  }
}

module attributes {stable_mosaic.version = 11 : i64} {
  func.func @_mm_bias_act_kernel(%arg0: i32, %arg1: memref<16x512xbf16, #tpu.memory_space<vmem>>, %arg2: memref<512x128xbf16, #tpu.memory_space<vmem>>, %arg3: memref<1x128xf32, #tpu.memory_space<vmem>>, %arg4: memref<16x128xf32, #tpu.memory_space<vmem>>) attributes {dimension_semantics = [#tpu.dimension_semantics<parallel>], iteration_bounds = array<i64: 2>, scalar_prefetch = 0 : i64, scratch_operands = 0 : i64, tpu.core_type = #tpu.core_type<tc>, window_params = [{transform_indices = @transform_0, window_bounds = array<i64: 16, 512>}, {pipeline_mode = #tpu.pipeline_mode<synchronous>, transform_indices = @transform_1, window_bounds = array<i64: 512, 128>}, {pipeline_mode = #tpu.pipeline_mode<synchronous>, transform_indices = @transform_2, window_bounds = array<i64: 1, 128>}, {transform_indices = @transform_3, window_bounds = array<i64: 16, 128>}]} {
    %c0 = arith.constant 0 : index
    %c0_0 = arith.constant 0 : index
    %0 = vector.load %arg1[%c0, %c0_0] : memref<16x512xbf16, #tpu.memory_space<vmem>>, vector<16x512xbf16>
    %c0_1 = arith.constant 0 : index
    %c0_2 = arith.constant 0 : index
    %1 = vector.load %arg2[%c0_1, %c0_2] : memref<512x128xbf16, #tpu.memory_space<vmem>>, vector<512x128xbf16>
    %cst = arith.constant dense<0.000000e+00> : vector<16x128xf32>
    %2 = tpu.matmul %0, %1, %cst {dimension_numbers = #tpu.dot_dimension_numbers<[1], [0], [0], [1], [0, 0, 1, 1], [], []>} : vector<16x512xbf16>, vector<512x128xbf16>, vector<16x128xf32> -> vector<16x128xf32>
    %c0_3 = arith.constant 0 : index
    %c0_4 = arith.constant 0 : index
    %3 = vector.load %arg3[%c0_3, %c0_4] : memref<1x128xf32, #tpu.memory_space<vmem>>, vector<1x128xf32>
    %4 = vector.broadcast %3 : vector<1x128xf32> to vector<16x128xf32>
    %5 = arith.addf %2, %4 : vector<16x128xf32>
    %c0_5 = arith.constant 0 : index
    %c0_6 = arith.constant 0 : index
    %6 = vector.load %arg4[%c0_5, %c0_6] : memref<16x128xf32, #tpu.memory_space<vmem>>, vector<16x128xf32>
    tpu.vector_store %arg4[%c0_5, %c0_6], %5 {strides = array<i32>} : memref<16x128xf32, #tpu.memory_space<vmem>>, vector<16x128xf32>,
    return
  }
  func.func @transform_0(%arg0: i32) -> (i32, i32) {
    %c0_i32 = arith.constant 0 : i32
    %c0_i32_0 = arith.constant 0 : i32
    return %arg0, %c0_i32 : i32, i32
  }
  func.func @transform_1(%arg0: i32) -> (i32, i32) {
    %c0_i32 = arith.constant 0 : i32
    %c0_i32_0 = arith.constant 0 : i32
    %c0_i32_1 = arith.constant 0 : i32
    return %c0_i32, %c0_i32_0 : i32, i32
  }
  func.func @transform_2(%arg0: i32) -> (i32, i32) {
    %c0_i32 = arith.constant 0 : i32
    %c0_i32_0 = arith.constant 0 : i32
    %c0_i32_1 = arith.constant 0 : i32
    return %c0_i32, %c0_i32_0 : i32, i32
  }
  func.func @transform_3(%arg0: i32) -> (i32, i32) {
    %c0_i32 = arith.constant 0 : i32
    %c0_i32_0 = arith.constant 0 : i32
    return %arg0, %c0_i32 : i32, i32
  }
}

module attributes {stable_mosaic.version = 11 : i64} {
  func.func @_mm_bias_act_kernel(%arg0: i32, %arg1: memref<16x128xbf16, #tpu.memory_space<vmem>>, %arg2: memref<128x128xbf16, #tpu.memory_space<vmem>>, %arg3: memref<1x128xf32, #tpu.memory_space<vmem>>, %arg4: memref<16x128xf32, #tpu.memory_space<vmem>>) attributes {dimension_semantics = [#tpu.dimension_semantics<parallel>], iteration_bounds = array<i64: 2>, scalar_prefetch = 0 : i64, scratch_operands = 0 : i64, tpu.core_type = #tpu.core_type<tc>, window_params = [{transform_indices = @transform_0, window_bounds = array<i64: 16, 128>}, {pipeline_mode = #tpu.pipeline_mode<synchronous>, transform_indices = @transform_1, window_bounds = array<i64: 128, 128>}, {pipeline_mode = #tpu.pipeline_mode<synchronous>, transform_indices = @transform_2, window_bounds = array<i64: 1, 128>}, {transform_indices = @transform_3, window_bounds = array<i64: 16, 128>}]} {
    %c0 = arith.constant 0 : index
    %c0_0 = arith.constant 0 : index
    %0 = vector.load %arg1[%c0, %c0_0] : memref<16x128xbf16, #tpu.memory_space<vmem>>, vector<16x128xbf16>
    %c0_1 = arith.constant 0 : index
    %c0_2 = arith.constant 0 : index
    %1 = vector.load %arg2[%c0_1, %c0_2] : memref<128x128xbf16, #tpu.memory_space<vmem>>, vector<128x128xbf16>
    %cst = arith.constant dense<0.000000e+00> : vector<16x128xf32>
    %2 = tpu.matmul %0, %1, %cst {dimension_numbers = #tpu.dot_dimension_numbers<[1], [0], [0], [1], [0, 0, 1, 1], [], []>} : vector<16x128xbf16>, vector<128x128xbf16>, vector<16x128xf32> -> vector<16x128xf32>
    %c0_3 = arith.constant 0 : index
    %c0_4 = arith.constant 0 : index
    %3 = vector.load %arg3[%c0_3, %c0_4] : memref<1x128xf32, #tpu.memory_space<vmem>>, vector<1x128xf32>
    %4 = vector.broadcast %3 : vector<1x128xf32> to vector<16x128xf32>
    %5 = arith.addf %2, %4 : vector<16x128xf32>
    %c0_5 = arith.constant 0 : index
    %c0_6 = arith.constant 0 : index
    %6 = vector.load %arg4[%c0_5, %c0_6] : memref<16x128xf32, #tpu.memory_space<vmem>>, vector<16x128xf32>
    tpu.vector_store %arg4[%c0_5, %c0_6], %5 {strides = array<i32>} : memref<16x128xf32, #tpu.memory_space<vmem>>, vector<16x128xf32>,
    return
  }
  func.func @transform_0(%arg0: i32) -> (i32, i32) {
    %c0_i32 = arith.constant 0 : i32
    %c0_i32_0 = arith.constant 0 : i32
    return %arg0, %c0_i32 : i32, i32
  }
  func.func @transform_1(%arg0: i32) -> (i32, i32) {
    %c0_i32 = arith.constant 0 : i32
    %c0_i32_0 = arith.constant 0 : i32
    %c0_i32_1 = arith.constant 0 : i32
    return %c0_i32, %c0_i32_0 : i32, i32
  }
  func.func @transform_2(%arg0: i32) -> (i32, i32) {
    %c0_i32 = arith.constant 0 : i32
    %c0_i32_0 = arith.constant 0 : i32
    %c0_i32_1 = arith.constant 0 : i32
    return %c0_i32, %c0_i32_0 : i32, i32
  }
  func.func @transform_3(%arg0: i32) -> (i32, i32) {
    %c0_i32 = arith.constant 0 : i32
    %c0_i32_0 = arith.constant 0 : i32
    return %arg0, %c0_i32 : i32, i32
  }
}

module attributes {stable_mosaic.version = 11 : i64} {
  func.func @_corr_kernel(%arg0: i32, %arg1: i32, %arg2: memref<1x16x64xbf16, #tpu.memory_space<vmem>>, %arg3: memref<1x64x16xbf16, #tpu.memory_space<vmem>>, %arg4: memref<1x16x16xf32, #tpu.memory_space<vmem>>) attributes {dimension_semantics = [#tpu.dimension_semantics<parallel>, #tpu.dimension_semantics<parallel>], iteration_bounds = array<i64: 2, 1>, scalar_prefetch = 0 : i64, scratch_operands = 0 : i64, tpu.core_type = #tpu.core_type<tc>, window_params = [{transform_indices = @transform_0, window_bounds = array<i64: 1, 16, 64>}, {transform_indices = @transform_1, window_bounds = array<i64: 1, 64, 16>}, {transform_indices = @transform_2, window_bounds = array<i64: 1, 16, 16>}]} {
    %c0 = arith.constant 0 : index
    %c0_0 = arith.constant 0 : index
    %c0_1 = arith.constant 0 : index
    %0 = vector.load %arg2[%c0, %c0_0, %c0_1] : memref<1x16x64xbf16, #tpu.memory_space<vmem>>, vector<1x16x64xbf16>
    %1 = vector.shape_cast %0 : vector<1x16x64xbf16> to vector<16x64xbf16>
    %c0_2 = arith.constant 0 : index
    %c0_3 = arith.constant 0 : index
    %c0_4 = arith.constant 0 : index
    %2 = vector.load %arg3[%c0_2, %c0_3, %c0_4] : memref<1x64x16xbf16, #tpu.memory_space<vmem>>, vector<1x64x16xbf16>
    %3 = vector.shape_cast %2 : vector<1x64x16xbf16> to vector<64x16xbf16>
    %cst = arith.constant dense<0.000000e+00> : vector<16x16xf32>
    %4 = tpu.matmul %1, %3, %cst {dimension_numbers = #tpu.dot_dimension_numbers<[1], [0], [0], [1], [0, 0, 1, 1], [], []>} : vector<16x64xbf16>, vector<64x16xbf16>, vector<16x16xf32> -> vector<16x16xf32>
    %cst_5 = arith.constant 1.250000e-01 : f32
    %5 = vector.broadcast %cst_5 : f32 to vector<16x16xf32>
    %6 = arith.mulf %4, %5 : vector<16x16xf32>
    %c0_6 = arith.constant 0 : index
    %c0_7 = arith.constant 0 : index
    %c0_8 = arith.constant 0 : index
    %7 = vector.load %arg4[%c0_6, %c0_7, %c0_8] : memref<1x16x16xf32, #tpu.memory_space<vmem>>, vector<1x16x16xf32>
    %8 = vector.shape_cast %7 : vector<1x16x16xf32> to vector<16x16xf32>
    %9 = vector.shape_cast %6 : vector<16x16xf32> to vector<1x16x16xf32>
    tpu.vector_store %arg4[%c0_6, %c0_7, %c0_8], %9 {strides = array<i32>} : memref<1x16x16xf32, #tpu.memory_space<vmem>>, vector<1x16x16xf32>,
    return
  }
  func.func @transform_0(%arg0: i32, %arg1: i32) -> (i32, i32, i32) {
    %c0_i32 = arith.constant 0 : i32
    %c0_i32_0 = arith.constant 0 : i32
    return %arg0, %arg1, %c0_i32 : i32, i32, i32
  }
  func.func @transform_1(%arg0: i32, %arg1: i32) -> (i32, i32, i32) {
    %c0_i32 = arith.constant 0 : i32
    %c0_i32_0 = arith.constant 0 : i32
    %c0_i32_1 = arith.constant 0 : i32
    return %arg0, %c0_i32, %c0_i32_0 : i32, i32, i32
  }
  func.func @transform_2(%arg0: i32, %arg1: i32) -> (i32, i32, i32) {
    %c0_i32 = arith.constant 0 : i32
    %c0_i32_0 = arith.constant 0 : i32
    return %arg0, %arg1, %c0_i32 : i32, i32, i32
  }
}

module attributes {stable_mosaic.version = 11 : i64} {
  func.func @_mm_bias_act_kernel(%arg0: i32, %arg1: memref<16x128xbf16, #tpu.memory_space<vmem>>, %arg2: memref<128x128xbf16, #tpu.memory_space<vmem>>, %arg3: memref<1x128xf32, #tpu.memory_space<vmem>>, %arg4: memref<16x128xf32, #tpu.memory_space<vmem>>) attributes {dimension_semantics = [#tpu.dimension_semantics<parallel>], iteration_bounds = array<i64: 2>, scalar_prefetch = 0 : i64, scratch_operands = 0 : i64, tpu.core_type = #tpu.core_type<tc>, window_params = [{transform_indices = @transform_0, window_bounds = array<i64: 16, 128>}, {pipeline_mode = #tpu.pipeline_mode<synchronous>, transform_indices = @transform_1, window_bounds = array<i64: 128, 128>}, {pipeline_mode = #tpu.pipeline_mode<synchronous>, transform_indices = @transform_2, window_bounds = array<i64: 1, 128>}, {transform_indices = @transform_3, window_bounds = array<i64: 16, 128>}]} {
    %c0 = arith.constant 0 : index
    %c0_0 = arith.constant 0 : index
    %0 = vector.load %arg1[%c0, %c0_0] : memref<16x128xbf16, #tpu.memory_space<vmem>>, vector<16x128xbf16>
    %c0_1 = arith.constant 0 : index
    %c0_2 = arith.constant 0 : index
    %1 = vector.load %arg2[%c0_1, %c0_2] : memref<128x128xbf16, #tpu.memory_space<vmem>>, vector<128x128xbf16>
    %cst = arith.constant dense<0.000000e+00> : vector<16x128xf32>
    %2 = tpu.matmul %0, %1, %cst {dimension_numbers = #tpu.dot_dimension_numbers<[1], [0], [0], [1], [0, 0, 1, 1], [], []>} : vector<16x128xbf16>, vector<128x128xbf16>, vector<16x128xf32> -> vector<16x128xf32>
    %c0_3 = arith.constant 0 : index
    %c0_4 = arith.constant 0 : index
    %3 = vector.load %arg3[%c0_3, %c0_4] : memref<1x128xf32, #tpu.memory_space<vmem>>, vector<1x128xf32>
    %4 = vector.broadcast %3 : vector<1x128xf32> to vector<16x128xf32>
    %5 = arith.addf %2, %4 : vector<16x128xf32>
    %cst_5 = arith.constant 0.000000e+00 : f32
    %6 = vector.broadcast %cst_5 : f32 to vector<16x128xf32>
    %7 = arith.maximumf %5, %6 : vector<16x128xf32>
    %c0_6 = arith.constant 0 : index
    %c0_7 = arith.constant 0 : index
    %8 = vector.load %arg4[%c0_6, %c0_7] : memref<16x128xf32, #tpu.memory_space<vmem>>, vector<16x128xf32>
    tpu.vector_store %arg4[%c0_6, %c0_7], %7 {strides = array<i32>} : memref<16x128xf32, #tpu.memory_space<vmem>>, vector<16x128xf32>,
    return
  }
  func.func @transform_0(%arg0: i32) -> (i32, i32) {
    %c0_i32 = arith.constant 0 : i32
    %c0_i32_0 = arith.constant 0 : i32
    return %arg0, %c0_i32 : i32, i32
  }
  func.func @transform_1(%arg0: i32) -> (i32, i32) {
    %c0_i32 = arith.constant 0 : i32
    %c0_i32_0 = arith.constant 0 : i32
    %c0_i32_1 = arith.constant 0 : i32
    return %c0_i32, %c0_i32_0 : i32, i32
  }
  func.func @transform_2(%arg0: i32) -> (i32, i32) {
    %c0_i32 = arith.constant 0 : i32
    %c0_i32_0 = arith.constant 0 : i32
    %c0_i32_1 = arith.constant 0 : i32
    return %c0_i32, %c0_i32_0 : i32, i32
  }
  func.func @transform_3(%arg0: i32) -> (i32, i32) {
    %c0_i32 = arith.constant 0 : i32
    %c0_i32_0 = arith.constant 0 : i32
    return %arg0, %c0_i32 : i32, i32
  }
}

module attributes {stable_mosaic.version = 11 : i64} {
  func.func @_mm_bias_act_kernel(%arg0: i32, %arg1: memref<16x640xbf16, #tpu.memory_space<vmem>>, %arg2: memref<640x128xbf16, #tpu.memory_space<vmem>>, %arg3: memref<1x128xf32, #tpu.memory_space<vmem>>, %arg4: memref<16x128xf32, #tpu.memory_space<vmem>>) attributes {dimension_semantics = [#tpu.dimension_semantics<parallel>], iteration_bounds = array<i64: 2>, scalar_prefetch = 0 : i64, scratch_operands = 0 : i64, tpu.core_type = #tpu.core_type<tc>, window_params = [{transform_indices = @transform_0, window_bounds = array<i64: 16, 640>}, {pipeline_mode = #tpu.pipeline_mode<synchronous>, transform_indices = @transform_1, window_bounds = array<i64: 640, 128>}, {pipeline_mode = #tpu.pipeline_mode<synchronous>, transform_indices = @transform_2, window_bounds = array<i64: 1, 128>}, {transform_indices = @transform_3, window_bounds = array<i64: 16, 128>}]} {
    %c0 = arith.constant 0 : index
    %c0_0 = arith.constant 0 : index
    %0 = vector.load %arg1[%c0, %c0_0] : memref<16x640xbf16, #tpu.memory_space<vmem>>, vector<16x640xbf16>
    %c0_1 = arith.constant 0 : index
    %c0_2 = arith.constant 0 : index
    %1 = vector.load %arg2[%c0_1, %c0_2] : memref<640x128xbf16, #tpu.memory_space<vmem>>, vector<640x128xbf16>
    %cst = arith.constant dense<0.000000e+00> : vector<16x128xf32>
    %2 = tpu.matmul %0, %1, %cst {dimension_numbers = #tpu.dot_dimension_numbers<[1], [0], [0], [1], [0, 0, 1, 1], [], []>} : vector<16x640xbf16>, vector<640x128xbf16>, vector<16x128xf32> -> vector<16x128xf32>
    %c0_3 = arith.constant 0 : index
    %c0_4 = arith.constant 0 : index
    %3 = vector.load %arg3[%c0_3, %c0_4] : memref<1x128xf32, #tpu.memory_space<vmem>>, vector<1x128xf32>
    %4 = vector.broadcast %3 : vector<1x128xf32> to vector<16x128xf32>
    %5 = arith.addf %2, %4 : vector<16x128xf32>
    %cst_5 = arith.constant 0.000000e+00 : f32
    %6 = vector.broadcast %cst_5 : f32 to vector<16x128xf32>
    %7 = arith.maximumf %5, %6 : vector<16x128xf32>
    %c0_6 = arith.constant 0 : index
    %c0_7 = arith.constant 0 : index
    %8 = vector.load %arg4[%c0_6, %c0_7] : memref<16x128xf32, #tpu.memory_space<vmem>>, vector<16x128xf32>
    tpu.vector_store %arg4[%c0_6, %c0_7], %7 {strides = array<i32>} : memref<16x128xf32, #tpu.memory_space<vmem>>, vector<16x128xf32>,
    return
  }
  func.func @transform_0(%arg0: i32) -> (i32, i32) {
    %c0_i32 = arith.constant 0 : i32
    %c0_i32_0 = arith.constant 0 : i32
    return %arg0, %c0_i32 : i32, i32
  }
  func.func @transform_1(%arg0: i32) -> (i32, i32) {
    %c0_i32 = arith.constant 0 : i32
    %c0_i32_0 = arith.constant 0 : i32
    %c0_i32_1 = arith.constant 0 : i32
    return %c0_i32, %c0_i32_0 : i32, i32
  }
  func.func @transform_2(%arg0: i32) -> (i32, i32) {
    %c0_i32 = arith.constant 0 : i32
    %c0_i32_0 = arith.constant 0 : i32
    %c0_i32_1 = arith.constant 0 : i32
    return %c0_i32, %c0_i32_0 : i32, i32
  }
  func.func @transform_3(%arg0: i32) -> (i32, i32) {
    %c0_i32 = arith.constant 0 : i32
    %c0_i32_0 = arith.constant 0 : i32
    return %arg0, %c0_i32 : i32, i32
  }
}

module attributes {stable_mosaic.version = 11 : i64} {
  func.func @_mm_bias_act_kernel(%arg0: i32, %arg1: memref<16x384xbf16, #tpu.memory_space<vmem>>, %arg2: memref<384x128xbf16, #tpu.memory_space<vmem>>, %arg3: memref<1x128xf32, #tpu.memory_space<vmem>>, %arg4: memref<16x128xf32, #tpu.memory_space<vmem>>) attributes {dimension_semantics = [#tpu.dimension_semantics<parallel>], iteration_bounds = array<i64: 2>, scalar_prefetch = 0 : i64, scratch_operands = 0 : i64, tpu.core_type = #tpu.core_type<tc>, window_params = [{transform_indices = @transform_0, window_bounds = array<i64: 16, 384>}, {pipeline_mode = #tpu.pipeline_mode<synchronous>, transform_indices = @transform_1, window_bounds = array<i64: 384, 128>}, {pipeline_mode = #tpu.pipeline_mode<synchronous>, transform_indices = @transform_2, window_bounds = array<i64: 1, 128>}, {transform_indices = @transform_3, window_bounds = array<i64: 16, 128>}]} {
    %c0 = arith.constant 0 : index
    %c0_0 = arith.constant 0 : index
    %0 = vector.load %arg1[%c0, %c0_0] : memref<16x384xbf16, #tpu.memory_space<vmem>>, vector<16x384xbf16>
    %c0_1 = arith.constant 0 : index
    %c0_2 = arith.constant 0 : index
    %1 = vector.load %arg2[%c0_1, %c0_2] : memref<384x128xbf16, #tpu.memory_space<vmem>>, vector<384x128xbf16>
    %cst = arith.constant dense<0.000000e+00> : vector<16x128xf32>
    %2 = tpu.matmul %0, %1, %cst {dimension_numbers = #tpu.dot_dimension_numbers<[1], [0], [0], [1], [0, 0, 1, 1], [], []>} : vector<16x384xbf16>, vector<384x128xbf16>, vector<16x128xf32> -> vector<16x128xf32>
    %c0_3 = arith.constant 0 : index
    %c0_4 = arith.constant 0 : index
    %3 = vector.load %arg3[%c0_3, %c0_4] : memref<1x128xf32, #tpu.memory_space<vmem>>, vector<1x128xf32>
    %4 = vector.broadcast %3 : vector<1x128xf32> to vector<16x128xf32>
    %5 = arith.addf %2, %4 : vector<16x128xf32>
    %cst_5 = arith.constant 0.000000e+00 : f32
    %6 = vector.broadcast %cst_5 : f32 to vector<16x128xf32>
    %7 = arith.maximumf %5, %6 : vector<16x128xf32>
    %c0_6 = arith.constant 0 : index
    %c0_7 = arith.constant 0 : index
    %8 = vector.load %arg4[%c0_6, %c0_7] : memref<16x128xf32, #tpu.memory_space<vmem>>, vector<16x128xf32>
    tpu.vector_store %arg4[%c0_6, %c0_7], %7 {strides = array<i32>} : memref<16x128xf32, #tpu.memory_space<vmem>>, vector<16x128xf32>,
    return
  }
  func.func @transform_0(%arg0: i32) -> (i32, i32) {
    %c0_i32 = arith.constant 0 : i32
    %c0_i32_0 = arith.constant 0 : i32
    return %arg0, %c0_i32 : i32, i32
  }
  func.func @transform_1(%arg0: i32) -> (i32, i32) {
    %c0_i32 = arith.constant 0 : i32
    %c0_i32_0 = arith.constant 0 : i32
    %c0_i32_1 = arith.constant 0 : i32
    return %c0_i32, %c0_i32_0 : i32, i32
  }
  func.func @transform_2(%arg0: i32) -> (i32, i32) {
    %c0_i32 = arith.constant 0 : i32
    %c0_i32_0 = arith.constant 0 : i32
    %c0_i32_1 = arith.constant 0 : i32
    return %c0_i32, %c0_i32_0 : i32, i32
  }
  func.func @transform_3(%arg0: i32) -> (i32, i32) {
    %c0_i32 = arith.constant 0 : i32
    %c0_i32_0 = arith.constant 0 : i32
    return %arg0, %c0_i32 : i32, i32
  }
}

module attributes {stable_mosaic.version = 11 : i64} {
  func.func @_mm_bias_act_kernel(%arg0: i32, %arg1: memref<16x512xbf16, #tpu.memory_space<vmem>>, %arg2: memref<512x128xbf16, #tpu.memory_space<vmem>>, %arg3: memref<1x128xf32, #tpu.memory_space<vmem>>, %arg4: memref<16x128xf32, #tpu.memory_space<vmem>>) attributes {dimension_semantics = [#tpu.dimension_semantics<parallel>], iteration_bounds = array<i64: 2>, scalar_prefetch = 0 : i64, scratch_operands = 0 : i64, tpu.core_type = #tpu.core_type<tc>, window_params = [{transform_indices = @transform_0, window_bounds = array<i64: 16, 512>}, {pipeline_mode = #tpu.pipeline_mode<synchronous>, transform_indices = @transform_1, window_bounds = array<i64: 512, 128>}, {pipeline_mode = #tpu.pipeline_mode<synchronous>, transform_indices = @transform_2, window_bounds = array<i64: 1, 128>}, {transform_indices = @transform_3, window_bounds = array<i64: 16, 128>}]} {
    %c0 = arith.constant 0 : index
    %c0_0 = arith.constant 0 : index
    %0 = vector.load %arg1[%c0, %c0_0] : memref<16x512xbf16, #tpu.memory_space<vmem>>, vector<16x512xbf16>
    %c0_1 = arith.constant 0 : index
    %c0_2 = arith.constant 0 : index
    %1 = vector.load %arg2[%c0_1, %c0_2] : memref<512x128xbf16, #tpu.memory_space<vmem>>, vector<512x128xbf16>
    %cst = arith.constant dense<0.000000e+00> : vector<16x128xf32>
    %2 = tpu.matmul %0, %1, %cst {dimension_numbers = #tpu.dot_dimension_numbers<[1], [0], [0], [1], [0, 0, 1, 1], [], []>} : vector<16x512xbf16>, vector<512x128xbf16>, vector<16x128xf32> -> vector<16x128xf32>
    %c0_3 = arith.constant 0 : index
    %c0_4 = arith.constant 0 : index
    %3 = vector.load %arg3[%c0_3, %c0_4] : memref<1x128xf32, #tpu.memory_space<vmem>>, vector<1x128xf32>
    %4 = vector.broadcast %3 : vector<1x128xf32> to vector<16x128xf32>
    %5 = arith.addf %2, %4 : vector<16x128xf32>
    %6 = arith.negf %5 : vector<16x128xf32>
    %7 = math.exp %6 : vector<16x128xf32>
    %cst_5 = arith.constant 1.000000e+00 : f32
    %8 = vector.broadcast %cst_5 : f32 to vector<16x128xf32>
    %9 = arith.addf %8, %7 : vector<16x128xf32>
    %10 = arith.divf %8, %9 : vector<16x128xf32>
    %c0_6 = arith.constant 0 : index
    %c0_7 = arith.constant 0 : index
    %11 = vector.load %arg4[%c0_6, %c0_7] : memref<16x128xf32, #tpu.memory_space<vmem>>, vector<16x128xf32>
    tpu.vector_store %arg4[%c0_6, %c0_7], %10 {strides = array<i32>} : memref<16x128xf32, #tpu.memory_space<vmem>>, vector<16x128xf32>,
    return
  }
  func.func @transform_0(%arg0: i32) -> (i32, i32) {
    %c0_i32 = arith.constant 0 : i32
    %c0_i32_0 = arith.constant 0 : i32
    return %arg0, %c0_i32 : i32, i32
  }
  func.func @transform_1(%arg0: i32) -> (i32, i32) {
    %c0_i32 = arith.constant 0 : i32
    %c0_i32_0 = arith.constant 0 : i32
    %c0_i32_1 = arith.constant 0 : i32
    return %c0_i32, %c0_i32_0 : i32, i32
  }
  func.func @transform_2(%arg0: i32) -> (i32, i32) {
    %c0_i32 = arith.constant 0 : i32
    %c0_i32_0 = arith.constant 0 : i32
    %c0_i32_1 = arith.constant 0 : i32
    return %c0_i32, %c0_i32_0 : i32, i32
  }
  func.func @transform_3(%arg0: i32) -> (i32, i32) {
    %c0_i32 = arith.constant 0 : i32
    %c0_i32_0 = arith.constant 0 : i32
    return %arg0, %c0_i32 : i32, i32
  }
}

module attributes {stable_mosaic.version = 11 : i64} {
  func.func @_mm_bias_act_kernel(%arg0: i32, %arg1: memref<16x512xbf16, #tpu.memory_space<vmem>>, %arg2: memref<512x128xbf16, #tpu.memory_space<vmem>>, %arg3: memref<1x128xf32, #tpu.memory_space<vmem>>, %arg4: memref<16x128xf32, #tpu.memory_space<vmem>>) attributes {dimension_semantics = [#tpu.dimension_semantics<parallel>], iteration_bounds = array<i64: 2>, scalar_prefetch = 0 : i64, scratch_operands = 0 : i64, tpu.core_type = #tpu.core_type<tc>, window_params = [{transform_indices = @transform_0, window_bounds = array<i64: 16, 512>}, {pipeline_mode = #tpu.pipeline_mode<synchronous>, transform_indices = @transform_1, window_bounds = array<i64: 512, 128>}, {pipeline_mode = #tpu.pipeline_mode<synchronous>, transform_indices = @transform_2, window_bounds = array<i64: 1, 128>}, {transform_indices = @transform_3, window_bounds = array<i64: 16, 128>}]} {
    %c0 = arith.constant 0 : index
    %c0_0 = arith.constant 0 : index
    %0 = vector.load %arg1[%c0, %c0_0] : memref<16x512xbf16, #tpu.memory_space<vmem>>, vector<16x512xbf16>
    %c0_1 = arith.constant 0 : index
    %c0_2 = arith.constant 0 : index
    %1 = vector.load %arg2[%c0_1, %c0_2] : memref<512x128xbf16, #tpu.memory_space<vmem>>, vector<512x128xbf16>
    %cst = arith.constant dense<0.000000e+00> : vector<16x128xf32>
    %2 = tpu.matmul %0, %1, %cst {dimension_numbers = #tpu.dot_dimension_numbers<[1], [0], [0], [1], [0, 0, 1, 1], [], []>} : vector<16x512xbf16>, vector<512x128xbf16>, vector<16x128xf32> -> vector<16x128xf32>
    %c0_3 = arith.constant 0 : index
    %c0_4 = arith.constant 0 : index
    %3 = vector.load %arg3[%c0_3, %c0_4] : memref<1x128xf32, #tpu.memory_space<vmem>>, vector<1x128xf32>
    %4 = vector.broadcast %3 : vector<1x128xf32> to vector<16x128xf32>
    %5 = arith.addf %2, %4 : vector<16x128xf32>
    %6 = math.tanh %5 : vector<16x128xf32>
    %c0_5 = arith.constant 0 : index
    %c0_6 = arith.constant 0 : index
    %7 = vector.load %arg4[%c0_5, %c0_6] : memref<16x128xf32, #tpu.memory_space<vmem>>, vector<16x128xf32>
    tpu.vector_store %arg4[%c0_5, %c0_6], %6 {strides = array<i32>} : memref<16x128xf32, #tpu.memory_space<vmem>>, vector<16x128xf32>,
    return
  }
  func.func @transform_0(%arg0: i32) -> (i32, i32) {
    %c0_i32 = arith.constant 0 : i32
    %c0_i32_0 = arith.constant 0 : i32
    return %arg0, %c0_i32 : i32, i32
  }
  func.func @transform_1(%arg0: i32) -> (i32, i32) {
    %c0_i32 = arith.constant 0 : i32
    %c0_i32_0 = arith.constant 0 : i32
    %c0_i32_1 = arith.constant 0 : i32
    return %c0_i32, %c0_i32_0 : i32, i32
  }
  func.func @transform_2(%arg0: i32) -> (i32, i32) {
    %c0_i32 = arith.constant 0 : i32
    %c0_i32_0 = arith.constant 0 : i32
    %c0_i32_1 = arith.constant 0 : i32
    return %c0_i32, %c0_i32_0 : i32, i32
  }
  func.func @transform_3(%arg0: i32) -> (i32, i32) {
    %c0_i32 = arith.constant 0 : i32
    %c0_i32_0 = arith.constant 0 : i32
    return %arg0, %c0_i32 : i32, i32
  }
}

module attributes {stable_mosaic.version = 11 : i64} {
  func.func @_gru_combine_kernel(%arg0: i32, %arg1: memref<8x128xf32, #tpu.memory_space<vmem>>, %arg2: memref<8x128xf32, #tpu.memory_space<vmem>>, %arg3: memref<8x128xf32, #tpu.memory_space<vmem>>, %arg4: memref<8x128xf32, #tpu.memory_space<vmem>>) attributes {dimension_semantics = [#tpu.dimension_semantics<arbitrary>], iteration_bounds = array<i64: 1>, scalar_prefetch = 0 : i64, scratch_operands = 0 : i64, tpu.core_type = #tpu.core_type<tc>, window_params = [{pipeline_mode = #tpu.pipeline_mode<synchronous>, transform_indices = @transform_0, window_bounds = array<i64: 8, 128>}, {pipeline_mode = #tpu.pipeline_mode<synchronous>, transform_indices = @transform_1, window_bounds = array<i64: 8, 128>}, {pipeline_mode = #tpu.pipeline_mode<synchronous>, transform_indices = @transform_2, window_bounds = array<i64: 8, 128>}, {pipeline_mode = #tpu.pipeline_mode<synchronous>, transform_indices = @transform_3, window_bounds = array<i64: 8, 128>}]} {
    %c0 = arith.constant 0 : index
    %c0_0 = arith.constant 0 : index
    %0 = vector.load %arg1[%c0, %c0_0] : memref<8x128xf32, #tpu.memory_space<vmem>>, vector<8x128xf32>
    %cst = arith.constant 1.000000e+00 : f32
    %1 = vector.broadcast %cst : f32 to vector<8x128xf32>
    %2 = arith.subf %1, %0 : vector<8x128xf32>
    %c0_1 = arith.constant 0 : index
    %c0_2 = arith.constant 0 : index
    %3 = vector.load %arg3[%c0_1, %c0_2] : memref<8x128xf32, #tpu.memory_space<vmem>>, vector<8x128xf32>
    %4 = arith.mulf %2, %3 : vector<8x128xf32>
    %c0_3 = arith.constant 0 : index
    %c0_4 = arith.constant 0 : index
    %5 = vector.load %arg2[%c0_3, %c0_4] : memref<8x128xf32, #tpu.memory_space<vmem>>, vector<8x128xf32>
    %6 = arith.mulf %0, %5 : vector<8x128xf32>
    %7 = arith.addf %4, %6 : vector<8x128xf32>
    %c0_5 = arith.constant 0 : index
    %c0_6 = arith.constant 0 : index
    %8 = vector.load %arg4[%c0_5, %c0_6] : memref<8x128xf32, #tpu.memory_space<vmem>>, vector<8x128xf32>
    tpu.vector_store %arg4[%c0_5, %c0_6], %7 {strides = array<i32>} : memref<8x128xf32, #tpu.memory_space<vmem>>, vector<8x128xf32>,
    return
  }
  func.func @transform_0(%arg0: i32) -> (i32, i32) {
    %c0_i32 = arith.constant 0 : i32
    %c0_i32_0 = arith.constant 0 : i32
    %c0_i32_1 = arith.constant 0 : i32
    return %c0_i32, %c0_i32_0 : i32, i32
  }
  func.func @transform_1(%arg0: i32) -> (i32, i32) {
    %c0_i32 = arith.constant 0 : i32
    %c0_i32_0 = arith.constant 0 : i32
    %c0_i32_1 = arith.constant 0 : i32
    return %c0_i32, %c0_i32_0 : i32, i32
  }
  func.func @transform_2(%arg0: i32) -> (i32, i32) {
    %c0_i32 = arith.constant 0 : i32
    %c0_i32_0 = arith.constant 0 : i32
    %c0_i32_1 = arith.constant 0 : i32
    return %c0_i32, %c0_i32_0 : i32, i32
  }
  func.func @transform_3(%arg0: i32) -> (i32, i32) {
    %c0_i32 = arith.constant 0 : i32
    %c0_i32_0 = arith.constant 0 : i32
    %c0_i32_1 = arith.constant 0 : i32
    return %c0_i32, %c0_i32_0 : i32, i32
  }
}

module attributes {stable_mosaic.version = 11 : i64} {
  func.func @_mm_bias_act_kernel(%arg0: i32, %arg1: memref<16x640xbf16, #tpu.memory_space<vmem>>, %arg2: memref<640x128xbf16, #tpu.memory_space<vmem>>, %arg3: memref<1x128xf32, #tpu.memory_space<vmem>>, %arg4: memref<16x128xf32, #tpu.memory_space<vmem>>) attributes {dimension_semantics = [#tpu.dimension_semantics<parallel>], iteration_bounds = array<i64: 2>, scalar_prefetch = 0 : i64, scratch_operands = 0 : i64, tpu.core_type = #tpu.core_type<tc>, window_params = [{transform_indices = @transform_0, window_bounds = array<i64: 16, 640>}, {pipeline_mode = #tpu.pipeline_mode<synchronous>, transform_indices = @transform_1, window_bounds = array<i64: 640, 128>}, {pipeline_mode = #tpu.pipeline_mode<synchronous>, transform_indices = @transform_2, window_bounds = array<i64: 1, 128>}, {transform_indices = @transform_3, window_bounds = array<i64: 16, 128>}]} {
    %c0 = arith.constant 0 : index
    %c0_0 = arith.constant 0 : index
    %0 = vector.load %arg1[%c0, %c0_0] : memref<16x640xbf16, #tpu.memory_space<vmem>>, vector<16x640xbf16>
    %c0_1 = arith.constant 0 : index
    %c0_2 = arith.constant 0 : index
    %1 = vector.load %arg2[%c0_1, %c0_2] : memref<640x128xbf16, #tpu.memory_space<vmem>>, vector<640x128xbf16>
    %cst = arith.constant dense<0.000000e+00> : vector<16x128xf32>
    %2 = tpu.matmul %0, %1, %cst {dimension_numbers = #tpu.dot_dimension_numbers<[1], [0], [0], [1], [0, 0, 1, 1], [], []>} : vector<16x640xbf16>, vector<640x128xbf16>, vector<16x128xf32> -> vector<16x128xf32>
    %c0_3 = arith.constant 0 : index
    %c0_4 = arith.constant 0 : index
    %3 = vector.load %arg3[%c0_3, %c0_4] : memref<1x128xf32, #tpu.memory_space<vmem>>, vector<1x128xf32>
    %4 = vector.broadcast %3 : vector<1x128xf32> to vector<16x128xf32>
    %5 = arith.addf %2, %4 : vector<16x128xf32>
    %c0_5 = arith.constant 0 : index
    %c0_6 = arith.constant 0 : index
    %6 = vector.load %arg4[%c0_5, %c0_6] : memref<16x128xf32, #tpu.memory_space<vmem>>, vector<16x128xf32>
    tpu.vector_store %arg4[%c0_5, %c0_6], %5 {strides = array<i32>} : memref<16x128xf32, #tpu.memory_space<vmem>>, vector<16x128xf32>,
    return
  }
  func.func @transform_0(%arg0: i32) -> (i32, i32) {
    %c0_i32 = arith.constant 0 : i32
    %c0_i32_0 = arith.constant 0 : i32
    return %arg0, %c0_i32 : i32, i32
  }
  func.func @transform_1(%arg0: i32) -> (i32, i32) {
    %c0_i32 = arith.constant 0 : i32
    %c0_i32_0 = arith.constant 0 : i32
    %c0_i32_1 = arith.constant 0 : i32
    return %c0_i32, %c0_i32_0 : i32, i32
  }
  func.func @transform_2(%arg0: i32) -> (i32, i32) {
    %c0_i32 = arith.constant 0 : i32
    %c0_i32_0 = arith.constant 0 : i32
    %c0_i32_1 = arith.constant 0 : i32
    return %c0_i32, %c0_i32_0 : i32, i32
  }
  func.func @transform_3(%arg0: i32) -> (i32, i32) {
    %c0_i32 = arith.constant 0 : i32
    %c0_i32_0 = arith.constant 0 : i32
    return %arg0, %c0_i32 : i32, i32
  }
}

module attributes {stable_mosaic.version = 11 : i64} {
  func.func @_mm_bias_act_kernel(%arg0: i32, %arg1: memref<16x128xbf16, #tpu.memory_space<vmem>>, %arg2: memref<128x640xbf16, #tpu.memory_space<vmem>>, %arg3: memref<1x640xf32, #tpu.memory_space<vmem>>, %arg4: memref<16x640xf32, #tpu.memory_space<vmem>>) attributes {dimension_semantics = [#tpu.dimension_semantics<parallel>], iteration_bounds = array<i64: 2>, scalar_prefetch = 0 : i64, scratch_operands = 0 : i64, tpu.core_type = #tpu.core_type<tc>, window_params = [{transform_indices = @transform_0, window_bounds = array<i64: 16, 128>}, {pipeline_mode = #tpu.pipeline_mode<synchronous>, transform_indices = @transform_1, window_bounds = array<i64: 128, 640>}, {pipeline_mode = #tpu.pipeline_mode<synchronous>, transform_indices = @transform_2, window_bounds = array<i64: 1, 640>}, {transform_indices = @transform_3, window_bounds = array<i64: 16, 640>}]} {
    %c0 = arith.constant 0 : index
    %c0_0 = arith.constant 0 : index
    %0 = vector.load %arg1[%c0, %c0_0] : memref<16x128xbf16, #tpu.memory_space<vmem>>, vector<16x128xbf16>
    %c0_1 = arith.constant 0 : index
    %c0_2 = arith.constant 0 : index
    %1 = vector.load %arg2[%c0_1, %c0_2] : memref<128x640xbf16, #tpu.memory_space<vmem>>, vector<128x640xbf16>
    %cst = arith.constant dense<0.000000e+00> : vector<16x640xf32>
    %2 = tpu.matmul %0, %1, %cst {dimension_numbers = #tpu.dot_dimension_numbers<[1], [0], [0], [1], [0, 0, 1, 1], [], []>} : vector<16x128xbf16>, vector<128x640xbf16>, vector<16x640xf32> -> vector<16x640xf32>
    %c0_3 = arith.constant 0 : index
    %c0_4 = arith.constant 0 : index
    %3 = vector.load %arg3[%c0_3, %c0_4] : memref<1x640xf32, #tpu.memory_space<vmem>>, vector<1x640xf32>
    %4 = vector.broadcast %3 : vector<1x640xf32> to vector<16x640xf32>
    %5 = arith.addf %2, %4 : vector<16x640xf32>
    %c0_5 = arith.constant 0 : index
    %c0_6 = arith.constant 0 : index
    %6 = vector.load %arg4[%c0_5, %c0_6] : memref<16x640xf32, #tpu.memory_space<vmem>>, vector<16x640xf32>
    tpu.vector_store %arg4[%c0_5, %c0_6], %5 {strides = array<i32>} : memref<16x640xf32, #tpu.memory_space<vmem>>, vector<16x640xf32>,
    return
  }
  func.func @transform_0(%arg0: i32) -> (i32, i32) {
    %c0_i32 = arith.constant 0 : i32
    %c0_i32_0 = arith.constant 0 : i32
    return %arg0, %c0_i32 : i32, i32
  }
  func.func @transform_1(%arg0: i32) -> (i32, i32) {
    %c0_i32 = arith.constant 0 : i32
    %c0_i32_0 = arith.constant 0 : i32
    %c0_i32_1 = arith.constant 0 : i32
    return %c0_i32, %c0_i32_0 : i32, i32
  }
  func.func @transform_2(%arg0: i32) -> (i32, i32) {
    %c0_i32 = arith.constant 0 : i32
    %c0_i32_0 = arith.constant 0 : i32
    %c0_i32_1 = arith.constant 0 : i32
    return %c0_i32, %c0_i32_0 : i32, i32
  }
  func.func @transform_3(%arg0: i32) -> (i32, i32) {
    %c0_i32 = arith.constant 0 : i32
    %c0_i32_0 = arith.constant 0 : i32
    return %arg0, %c0_i32 : i32, i32
  }
}

module attributes {stable_mosaic.version = 11 : i64} {
  func.func @_upsample_kernel(%arg0: i32, %arg1: memref<1x9x1024xf32, #tpu.memory_space<vmem>>, %arg2: memref<1x2x9x1024xf32, #tpu.memory_space<vmem>>, %arg3: memref<1x2x1024xf32, #tpu.memory_space<vmem>>) attributes {dimension_semantics = [#tpu.dimension_semantics<parallel>], iteration_bounds = array<i64: 2>, scalar_prefetch = 0 : i64, scratch_operands = 0 : i64, tpu.core_type = #tpu.core_type<tc>, window_params = [{transform_indices = @transform_0, window_bounds = array<i64: 1, 9, 1024>}, {transform_indices = @transform_1, window_bounds = array<i64: 1, 2, 9, 1024>}, {transform_indices = @transform_2, window_bounds = array<i64: 1, 2, 1024>}]} {
    %c0 = arith.constant 0 : index
    %c0_0 = arith.constant 0 : index
    %c0_1 = arith.constant 0 : index
    %0 = vector.load %arg1[%c0, %c0_0, %c0_1] : memref<1x9x1024xf32, #tpu.memory_space<vmem>>, vector<1x9x1024xf32>
    %1 = vector.shape_cast %0 : vector<1x9x1024xf32> to vector<9x1024xf32>
    %cst = arith.constant dense<0xFF800000> : vector<1024xf32>
    %2 = vector.multi_reduction <maximumf>, %1, %cst [0] : vector<9x1024xf32> to vector<1024xf32>
    %3 = vector.shape_cast %2 : vector<1024xf32> to vector<1x1024xf32>
    %4 = vector.broadcast %3 : vector<1x1024xf32> to vector<9x1024xf32>
    %5 = arith.subf %1, %4 : vector<9x1024xf32>
    %6 = math.exp %5 : vector<9x1024xf32>
    %cst_2 = arith.constant dense<0.000000e+00> : vector<1024xf32>
    %7 = vector.multi_reduction <add>, %6, %cst_2 [0] : vector<9x1024xf32> to vector<1024xf32>
    %8 = vector.shape_cast %7 : vector<1024xf32> to vector<1x1024xf32>
    %9 = tpu.reciprocal %8 {approx = true} : vector<1x1024xf32> -> vector<1x1024xf32>
    %10 = vector.broadcast %9 : vector<1x1024xf32> to vector<9x1024xf32>
    %11 = arith.mulf %6, %10 : vector<9x1024xf32>
    %c0_3 = arith.constant 0 : index
    %c0_4 = arith.constant 0 : index
    %c0_5 = arith.constant 0 : index
    %c0_6 = arith.constant 0 : index
    %12 = vector.load %arg2[%c0_3, %c0_4, %c0_5, %c0_6] : memref<1x2x9x1024xf32, #tpu.memory_space<vmem>>, vector<1x2x9x1024xf32>
    %13 = vector.shape_cast %12 : vector<1x2x9x1024xf32> to vector<2x9x1024xf32>
    %14 = vector.shape_cast %11 : vector<9x1024xf32> to vector<1x9x1024xf32>
    %15 = vector.broadcast %14 : vector<1x9x1024xf32> to vector<2x9x1024xf32>
    %16 = arith.mulf %15, %13 : vector<2x9x1024xf32>
    %cst_7 = arith.constant dense<0.000000e+00> : vector<2x1024xf32>
    %17 = vector.multi_reduction <add>, %16, %cst_7 [1] : vector<2x9x1024xf32> to vector<2x1024xf32>
    %c0_8 = arith.constant 0 : index
    %c0_9 = arith.constant 0 : index
    %c0_10 = arith.constant 0 : index
    %18 = vector.load %arg3[%c0_8, %c0_9, %c0_10] : memref<1x2x1024xf32, #tpu.memory_space<vmem>>, vector<1x2x1024xf32>
    %19 = vector.shape_cast %18 : vector<1x2x1024xf32> to vector<2x1024xf32>
    %20 = vector.shape_cast %17 : vector<2x1024xf32> to vector<1x2x1024xf32>
    tpu.vector_store %arg3[%c0_8, %c0_9, %c0_10], %20 {strides = array<i32>} : memref<1x2x1024xf32, #tpu.memory_space<vmem>>, vector<1x2x1024xf32>,
    return
  }
  func.func @transform_0(%arg0: i32) -> (i32, i32, i32) {
    %c0_i32 = arith.constant 0 : i32
    %c0_i32_0 = arith.constant 0 : i32
    %c0_i32_1 = arith.constant 0 : i32
    return %arg0, %c0_i32, %c0_i32_0 : i32, i32, i32
  }
  func.func @transform_1(%arg0: i32) -> (i32, i32, i32, i32) {
    %c0_i32 = arith.constant 0 : i32
    %c0_i32_0 = arith.constant 0 : i32
    %c0_i32_1 = arith.constant 0 : i32
    %c0_i32_2 = arith.constant 0 : i32
    return %arg0, %c0_i32, %c0_i32_0, %c0_i32_1 : i32, i32, i32, i32
  }
  func.func @transform_2(%arg0: i32) -> (i32, i32, i32) {
    %c0_i32 = arith.constant 0 : i32
    %c0_i32_0 = arith.constant 0 : i32
    %c0_i32_1 = arith.constant 0 : i32
    return %arg0, %c0_i32, %c0_i32_0 : i32, i32, i32
  }
}

</mosaic_0001>

<bundles_post_ra>
// kernel: raft_forward.47
= control target key start
LH: loop header
LB: loop body
LE: loop exit
PB: predicated region body
PF: predicated region fallthrough
CT: control target
= control target key end

     0   :  { %s780_s12 = smov 0   ;;  %s909_s0 = inlined_call_operand.vmem [shape: bf16[512,256], index: 0, kind: input, shape index: {}]   ;;  %s910_s1 = inlined_call_operand.vmem [shape: bf16[256,128], index: 1, kind: input, shape index: {}]   ;;  %s911_s2 = inlined_call_operand.vmem [shape: f32[1,128], index: 2, kind: input, shape index: {}]   ;;  %s912_s3 = inlined_call_operand.vmem [shape: f32[512,128], index: 3, kind: output, shape index: {}]  }
   0x1 LB: > { %s578_s13 = sadd.s32 4294967295, %s758_s12   ;;  %p582_p0 = scmp.ge.s32.totalorder %s758_s12, 1  ;;  %s758_s12 = sphi %s780_s12, %s13_s12  }
   0x2   : > { %p139_p1 = scmp.lt.s32.totalorder %s758_s12, 5 }
   0x4   : > { %p140_p2 = pnand %p582_p0, %p139_p1 }
   0x5   : > { %s583_s16 = sshll.u32 (!%p140_p2), %s578_s13, 4 }
   0x6   : > { %143 = sbr.rel (%p140_p2) target bundleno = 272 (0x110), region = 32  ;;  %p165_p3 = scmp.lt.s32.totalorder (!%p140_p2), %s583_s16, 63 }
   0xb   : > { %v712_v0 = vld [vmem:[%s910_s1 + $0x78] sm:$0xff]   ;;  %v714_v2 = vld [vmem:[%s910_s1 + $0x70] sm:$0xff]   ;;  %v716_v4 = vld [vmem:[%s910_s1 + $0x68] sm:$0xff]   ;;  %s914_s16 = smov (!%p165_p3, %s583_s16), 63 }
   0xc   : > { %v713_v1 = vld [vmem:[%s910_s1 + $0x38] sm:$0xff]   ;;  %624 = vmatprep.subr.bf16.mxu0 %v712_v0  ;;  %688 = vmatprep.subr.bf16.mxu1 %v712_v0  ;;  %v715_v3 = vld [vmem:[%s910_s1 + $0x30] sm:$0xff]   ;;  %v717_v5 = vld [vmem:[%s910_s1 + $0x28] sm:$0xff]   ;;  %s623_s4 = sshll.u32 %s914_s16, 3 }
   0xd   : > { %625 = vmatpush3.bf16.msra.mxu0 %v713_v1  ;;  %696 = vmatpush3.bf16.msra.mxu1 %v713_v1  ;;  %v718_v6 = vld [vmem:[%s910_s1 + $0x60] sm:$0xff]   ;;  %v720_v8 = vld [vmem:[%s910_s1 + $0x58] sm:$0xff]   ;;  %s823_s9 = scalar_lea.vmem %s909_s0, %s623_s4  ;;  %v722_v10 = vld [vmem:[%s910_s1 + $0x50] sm:$0xff]   ;;  %s872_s30 = scalar_lea.vmem %s912_s3, %s623_s4 }
   0xe   : > { %626 = vmatprep.subr.bf16.mxu0 %v714_v2  ;;  %689 = vmatprep.subr.bf16.mxu1 %v714_v2  ;;  %v719_v7 = vld [vmem:[%s910_s1 + $0x20] sm:$0xff]   ;;  %v721_v9 = vld [vmem:[%s910_s1 + $0x18] sm:$0xff]   ;;  %v723_v13 = vld [vmem:[%s910_s1 + $0x10] sm:$0xff]  }
   0xf   : > { %v730_v11 = vld [vmem:[%s823_s9 + $0x4] ss:$8 sps:$4 sm:$0xff]   ;;  %v728_v18 = vld [vmem:[%s823_s9] ss:$8 sps:$4 sm:$0xff]   ;;  %v734_v20 = vld [vmem:[%s823_s9 + $0x14] ss:$8 sps:$4 sm:$0xff]  }
  0x10   : > { %v733_v12 = vld [vmem:[%s823_s9 + $0x44] ss:$8 sps:$4 sm:$0xff]   ;;  %441 = vmatprep.mubr.bf16.mxu0 %v730_v11  ;;  %v731_v19 = vld [vmem:[%s823_s9 + $0x40] ss:$8 sps:$4 sm:$0xff]   ;;  %v736_v21 = vld [vmem:[%s823_s9 + $0x54] ss:$8 sps:$4 sm:$0xff]  }
  0x11   : > { %627 = vmatpush3.bf16.msra.mxu0 %v715_v3  ;;  %697 = vmatpush3.bf16.msra.mxu1 %v715_v3  ;;  %v724_v14 = vld [vmem:[%s910_s1 + $0x48] sm:$0xff]   ;;  %v726_v16 = vld [vmem:[%s910_s1 + $0x40] sm:$0xff]   ;;  %v738_v22 = vld [vmem:[%s823_s9 + $0x10] ss:$8 sps:$4 sm:$0xff]  }
  0x12   : > { %628 = vmatprep.subr.bf16.mxu0 %v716_v4  ;;  %690 = vmatprep.subr.bf16.mxu1 %v716_v4  ;;  %v725_v15 = vld [vmem:[%s910_s1 + $0x8] sm:$0xff]   ;;  %v727_v17 = vld [vmem:[%s910_s1] sm:$0xff]   ;;  %v739_v23 = vld [vmem:[%s823_s9 + $0x50] ss:$8 sps:$4 sm:$0xff]  }
  0x13   : > { %473 = vmatprep.mubr.bf16.mxu1 %v733_v12  ;;  %v740_v24 = vld [vmem:[%s823_s9 + $0x24] ss:$8 sps:$4 sm:$0xff]   ;;  %v744_v26 = vld [vmem:[%s823_s9 + $0x20] ss:$8 sps:$4 sm:$0xff]   ;;  %v746_v28 = vld [vmem:[%s823_s9 + $0x34] ss:$8 sps:$4 sm:$0xff]  }
  0x14   : > { %v742_v25 = vld [vmem:[%s823_s9 + $0x64] ss:$8 sps:$4 sm:$0xff]   ;;  %v745_v27 = vld [vmem:[%s823_s9 + $0x60] ss:$8 sps:$4 sm:$0xff]   ;;  %v748_v29 = vld [vmem:[%s823_s9 + $0x74] ss:$8 sps:$4 sm:$0xff]  }
  0x15   : > { %629 = vmatpush3.bf16.msra.mxu0 %v717_v5  ;;  %698 = vmatpush3.bf16.msra.mxu1 %v717_v5  ;;  %v750_v30 = vld [vmem:[%s823_s9 + $0x30] ss:$8 sps:$4 sm:$0xff]   ;;  %v865_v34 = vld [vmem:[%s911_s2] ss:$0 sm:$0xff] }
  0x16   : > { %630 = vmatprep.subr.bf16.mxu0 %v718_v6  ;;  %691 = vmatprep.subr.bf16.mxu1 %v718_v6  ;;  %v751_v31 = vld [vmem:[%s823_s9 + $0x70] ss:$8 sps:$4 sm:$0xff]  }
  0x19   : > { %631 = vmatpush3.bf16.msra.mxu0 %v719_v7  ;;  %699 = vmatpush3.bf16.msra.mxu1 %v719_v7 }
  0x1a   : > { %632 = vmatprep.subr.bf16.mxu0 %v720_v8  ;;  %692 = vmatprep.subr.bf16.mxu1 %v720_v8 }
  0x1d   : > { %633 = vmatpush3.bf16.msra.mxu0 %v721_v9  ;;  %700 = vmatpush3.bf16.msra.mxu1 %v721_v9 }
  0x1e   : > { %634 = vmatprep.subr.bf16.mxu0 %v722_v10  ;;  %693 = vmatprep.subr.bf16.mxu1 %v722_v10 }
  0x21   : > { %635 = vmatpush3.bf16.msra.mxu0 %v723_v13  ;;  %701 = vmatpush3.bf16.msra.mxu1 %v723_v13 }
  0x22   : > { %636 = vmatprep.subr.bf16.mxu0 %v724_v14  ;;  %694 = vmatprep.subr.bf16.mxu1 %v724_v14 }
  0x25   : > { %637 = vmatpush3.bf16.msra.mxu0 %v725_v15  ;;  %702 = vmatpush3.bf16.msra.mxu1 %v725_v15 }
  0x26   : > { %638 = vmatprep.subr.bf16.mxu0 %v726_v16  ;;  %695 = vmatprep.subr.bf16.mxu1 %v726_v16 }
  0x29   : > { %639 = vmatpush3.bf16.msra.mxu0 %v727_v17  ;;  %703 = vmatpush3.bf16.msra.mxu1 %v727_v17 }
  0x2c   : > { %442 = vmatmul.mubr.bf16.vlgmr.msra.gmra.mxu0 %v728_v18  ;;  %474 = vmatmul.mubr.bf16.vlgmr.msra.gmra.mxu1 %v731_v19 }
  0x2d   : > { %449 = vmatprep.mubr.bf16.mxu0 %v734_v20  ;;  %481 = vmatprep.mubr.bf16.mxu1 %v736_v21 }
  0x34   : > { %450 = vmatmul.mubr.bf16.gmra.mxu0 %v738_v22  ;;  %482 = vmatmul.mubr.bf16.gmra.mxu1 %v739_v23 }
  0x35   : > { %457 = vmatprep.mubr.bf16.mxu0 %v740_v24  ;;  %489 = vmatprep.mubr.bf16.mxu1 %v742_v25 }
  0x3c   : > { %458 = vmatmul.mubr.bf16.gmra.mxu0 %v744_v26  ;;  %490 = vmatmul.mubr.bf16.gmra.mxu1 %v745_v27 }
  0x3d   : > { %465 = vmatprep.mubr.bf16.mxu0 %v746_v28  ;;  %497 = vmatprep.mubr.bf16.mxu1 %v748_v29 }
  0x44   : > { %466 = vmatmul.mubr.bf16.gmra.mxu0 %v750_v30  ;;  %498 = vmatmul.mubr.bf16.gmra.mxu1 %v751_v31 }
  0xec   : > { %v640_v32 = vpop.f32.mrf.mxu0  ;;  %v664_v33 = vpop.f32.mrf.mxu1 }
  0xee   : > { %v641_v35 = vpop.f32.mrf.mxu0  ;;  %v665_v36 = vpop.f32.mrf.mxu1 }
  0xef   : > { %v642_v37 = vadd.f32 %v641_v35, %v640_v32  ;;  %v666_v38 = vadd.f32 %v665_v36, %v664_v33 }
  0xf0   : > { %v643_v39 = vpop.f32.mrf.mxu0  ;;  %v667_v40 = vpop.f32.mrf.mxu1 }
  0xf1   : > { %v444_v41 = vadd.f32 %v642_v37, %v865_v34  ;;  %v476_v42 = vadd.f32 %v666_v38, %v865_v34 }
  0xf2   : > { %v644_v43 = vpop.f32.mrf.mxu0  ;;  %v668_v44 = vpop.f32.mrf.mxu1 }
  0xf3   : > { %506 = vst [vmem:[%s872_s30] sm:$0xff] %v444_v41  ;;  %514 = vst [vmem:[%s872_s30 + $0x40] sm:$0xff] %v476_v42  ;;  %v645_v45 = vadd.f32 %v644_v43, %v643_v39  ;;  %v669_v46 = vadd.f32 %v668_v44, %v667_v40 }
  0xf4   : > { %v646_v47 = vpop.f32.mrf.mxu0  ;;  %v670_v48 = vpop.f32.mrf.mxu1 }
  0xf5   : > { %v447_v49 = vadd.f32 %v645_v45, %v865_v34  ;;  %v479_v50 = vadd.f32 %v669_v46, %v865_v34 }
  0xf6   : > { %v647_v51 = vpop.f32.mrf.mxu0  ;;  %v671_v52 = vpop.f32.mrf.mxu1 }
  0xf7   : > { %507 = vst [vmem:[%s872_s30 + $0x8] sm:$0xff] %v447_v49  ;;  %515 = vst [vmem:[%s872_s30 + $0x48] sm:$0xff] %v479_v50  ;;  %v648_v53 = vadd.f32 %v647_v51, %v646_v47  ;;  %v672_v54 = vadd.f32 %v671_v52, %v670_v48 }
  0xf8   : > { %v649_v55 = vpop.f32.mrf.mxu0  ;;  %v673_v56 = vpop.f32.mrf.mxu1 }
  0xf9   : > { %v452_v57 = vadd.f32 %v648_v53, %v865_v34  ;;  %v484_v58 = vadd.f32 %v672_v54, %v865_v34 }
  0xfa   : > { %v650_v59 = vpop.f32.mrf.mxu0  ;;  %v674_v60 = vpop.f32.mrf.mxu1 }
  0xfb   : > { %508 = vst [vmem:[%s872_s30 + $0x10] sm:$0xff] %v452_v57  ;;  %516 = vst [vmem:[%s872_s30 + $0x50] sm:$0xff] %v484_v58  ;;  %v651_v61 = vadd.f32 %v650_v59, %v649_v55  ;;  %v675_v62 = vadd.f32 %v674_v60, %v673_v56 }
  0xfc   : > { %v652_v63 = vpop.f32.mrf.mxu0  ;;  %v676_v0 = vpop.f32.mrf.mxu1 }
  0xfd   : > { %v455_v1 = vadd.f32 %v651_v61, %v865_v34  ;;  %v487_v2 = vadd.f32 %v675_v62, %v865_v34 }
  0xfe   : > { %v653_v3 = vpop.f32.mrf.mxu0  ;;  %v677_v4 = vpop.f32.mrf.mxu1 }
  0xff   : > { %509 = vst [vmem:[%s872_s30 + $0x18] sm:$0xff] %v455_v1  ;;  %517 = vst [vmem:[%s872_s30 + $0x58] sm:$0xff] %v487_v2  ;;  %v654_v5 = vadd.f32 %v653_v3, %v652_v63  ;;  %v678_v6 = vadd.f32 %v677_v4, %v676_v0 }
 0x100   : > { %v655_v7 = vpop.f32.mrf.mxu0  ;;  %v679_v8 = vpop.f32.mrf.mxu1 }
 0x101   : > { %v460_v9 = vadd.f32 %v654_v5, %v865_v34  ;;  %v492_v10 = vadd.f32 %v678_v6, %v865_v34 }
 0x102   : > { %v656_v11 = vpop.f32.mrf.mxu0  ;;  %v680_v12 = vpop.f32.mrf.mxu1 }
 0x103   : > { %510 = vst [vmem:[%s872_s30 + $0x20] sm:$0xff] %v460_v9  ;;  %518 = vst [vmem:[%s872_s30 + $0x60] sm:$0xff] %v492_v10  ;;  %v657_v13 = vadd.f32 %v656_v11, %v655_v7  ;;  %v681_v14 = vadd.f32 %v680_v12, %v679_v8 }
 0x104   : > { %v658_v15 = vpop.f32.mrf.mxu0  ;;  %v682_v16 = vpop.f32.mrf.mxu1 }
 0x105   : > { %v463_v17 = vadd.f32 %v657_v13, %v865_v34  ;;  %v495_v18 = vadd.f32 %v681_v14, %v865_v34 }
 0x106   : > { %v659_v19 = vpop.f32.mrf.mxu0  ;;  %v683_v20 = vpop.f32.mrf.mxu1 }
 0x107   : > { %511 = vst [vmem:[%s872_s30 + $0x28] sm:$0xff] %v463_v17  ;;  %519 = vst [vmem:[%s872_s30 + $0x68] sm:$0xff] %v495_v18  ;;  %v660_v21 = vadd.f32 %v659_v19, %v658_v15  ;;  %v684_v22 = vadd.f32 %v683_v20, %v682_v16 }
 0x108   : > { %v661_v23 = vpop.f32.mrf.mxu0  ;;  %v685_v24 = vpop.f32.mrf.mxu1 }
 0x109   : > { %v468_v25 = vadd.f32 %v660_v21, %v865_v34  ;;  %v500_v26 = vadd.f32 %v684_v22, %v865_v34 }
 0x10a   : > { %v662_v27 = vpop.f32.mrf.mxu0  ;;  %v686_v28 = vpop.f32.mrf.mxu1 }
 0x10b   : > { %512 = vst [vmem:[%s872_s30 + $0x30] sm:$0xff] %v468_v25  ;;  %520 = vst [vmem:[%s872_s30 + $0x70] sm:$0xff] %v500_v26  ;;  %v663_v29 = vadd.f32 %v662_v27, %v661_v23  ;;  %v687_v30 = vadd.f32 %v686_v28, %v685_v24 }
 0x10d   : > { %v471_v31 = vadd.f32 %v663_v29, %v865_v34  ;;  %v503_v32 = vadd.f32 %v687_v30, %v865_v34 }
 0x10f   : > { %513 = vst [vmem:[%s872_s30 + $0x38] sm:$0xff] %v471_v31  ;;  %521 = vst [vmem:[%s872_s30 + $0x78] sm:$0xff] %v503_v32 }
 0x110 PF: > { %s13_s12 = sadd.s32 1, %s758_s12  }
 0x111   : > { %p10_p4 = scmp.ge.s32.totalorder %s13_s12, 6  }
 0x113   :  { %12 = sbr.rel (!%p10_p4) target bundleno = 1 (0x1), region = 62 }

// kernel: raft_forward.48
= control target key start
LH: loop header
LB: loop body
LE: loop exit
PB: predicated region body
PF: predicated region fallthrough
CT: control target
= control target key end

     0   :  { %s852_s12 = smov 0   ;;  %s972_s0 = inlined_call_operand.vmem [shape: bf16[128,384], index: 0, kind: input, shape index: {}]   ;;  %s973_s1 = inlined_call_operand.vmem [shape: bf16[384,128], index: 1, kind: input, shape index: {}]   ;;  %s974_s2 = inlined_call_operand.vmem [shape: f32[1,128], index: 2, kind: input, shape index: {}]   ;;  %s975_s3 = inlined_call_operand.vmem [shape: f32[128,128], index: 3, kind: output, shape index: {}]  }
   0x1 LB: > { %s651_s13 = sadd.s32 4294967295, %s830_s12   ;;  %p655_p0 = scmp.ge.s32.totalorder %s830_s12, 1  ;;  %s830_s12 = sphi %s852_s12, %s13_s12  }
   0x2   : > { %p139_p1 = scmp.lt.s32.totalorder %s830_s12, 3 }
   0x4   : > { %p140_p2 = pnand %p655_p0, %p139_p1 }
   0x5   : > { %s656_s28 = sshll.u32 (!%p140_p2), %s651_s13, 3 }
   0x6   : > { %143 = sbr.rel (%p140_p2) target bundleno = 274 (0x112), region = 32  ;;  %p165_p3 = scmp.lt.s32.totalorder (!%p140_p2), %s656_s28, 15 }
   0xb   : > { %v784_v0 = vld [vmem:[%s973_s1 + $0x78] sm:$0xff]   ;;  %v786_v2 = vld [vmem:[%s973_s1 + $0x70] sm:$0xff]   ;;  %v789_v5 = vld [vmem:[%s973_s1 + $0x68] sm:$0xff]   ;;  %s977_s28 = smov (!%p165_p3, %s656_s28), 15 }
   0xc   : > { %v785_v1 = vld [vmem:[%s973_s1 + $0x38] sm:$0xff]   ;;  %699 = vmatprep.subr.bf16.mxu0 %v784_v0  ;;  %v788_v4 = vld [vmem:[%s973_s1 + $0x30] sm:$0xff]   ;;  %v791_v7 = vld [vmem:[%s973_s1 + $0x28] sm:$0xff]   ;;  %s775_s21 = smul.u32 12, %s977_s28  ;;  %s659_s18 = sshll.u32 %s977_s28, 3 }
   0xd   : > { %700 = vmatpush3.bf16.msra.mxu0 %v785_v1  ;;  %v787_v3 = vld [vmem:[%s973_s1 + $0xb8] sm:$0xff]   ;;  %v790_v6 = vld [vmem:[%s973_s1 + $0xb0] sm:$0xff]   ;;  %v792_v8 = vld [vmem:[%s973_s1 + $0x60] sm:$0xff]  }
   0xe   : > { %701 = vmatprep.subr.bf16.mxu0 %v786_v2  ;;  %751 = vmatprep.subr.bf16.mxu1 %v787_v3  ;;  %v793_v9 = vld [vmem:[%s973_s1 + $0xa8] sm:$0xff]   ;;  %v794_v10 = vld [vmem:[%s973_s1 + $0x20] sm:$0xff]   ;;  %v795_v11 = vld [vmem:[%s973_s1 + $0x58] sm:$0xff]   ;;  %s926_s6 = scalar_lea.vmem %s972_s0, %s775_s21  ;;  %s959_s21 = scalar_lea.vmem %s975_s3, %s659_s18 }
   0xf   : > { %752 = vmatpush3.bf16.msra.mxu1 %v787_v3  ;;  %v796_v12 = vld [vmem:[%s973_s1 + $0xa0] sm:$0xff]   ;;  %v797_v13 = vld [vmem:[%s973_s1 + $0x18] sm:$0xff]   ;;  %v798_v15 = vld [vmem:[%s973_s1 + $0x50] sm:$0xff]  }
  0x10   : > { %753 = vmatprep.subr.bf16.mxu1 %v790_v6  ;;  %v799_v14 = vld [vmem:[%s973_s1 + $0x98] sm:$0xff]   ;;  %v800_v16 = vld [vmem:[%s973_s1 + $0x10] sm:$0xff]   ;;  %v801_v18 = vld [vmem:[%s973_s1 + $0x48] sm:$0xff]  }
  0x11   : > { %702 = vmatpush3.bf16.msra.mxu0 %v788_v4  ;;  %v802_v17 = vld [vmem:[%s973_s1 + $0x90] sm:$0xff]   ;;  %v803_v19 = vld [vmem:[%s973_s1 + $0x8] sm:$0xff]   ;;  %v804_v20 = vld [vmem:[%s973_s1 + $0x40] sm:$0xff]  }
  0x12   : > { %703 = vmatprep.subr.bf16.mxu0 %v789_v5  ;;  %v805_v21 = vld [vmem:[%s973_s1 + $0x88] sm:$0xff]   ;;  %v809_v22 = vld [vmem:[%s926_s6 + $0x4] ss:$12 sps:$4 sm:$0xff]   ;;  %v816_v31 = vld [vmem:[%s926_s6 + $0x34] ss:$12 sps:$4 sm:$0xff]  }
  0x13   : > { %754 = vmatpush3.bf16.msra.mxu1 %v790_v6  ;;  %v806_v23 = vld [vmem:[%s973_s1] sm:$0xff]   ;;  %489 = vmatprep.mubr.bf16.mxu0 %v809_v22  ;;  %v811_v24 = vld [vmem:[%s926_s6 + $0x8] ss:$12 sps:$4 sm:$0xff]   ;;  %v820_v32 = vld [vmem:[%s926_s6 + $0x50] ss:$12 sps:$4 sm:$0xff]  }
  0x14   : > { %755 = vmatprep.subr.bf16.mxu1 %v793_v9  ;;  %v810_v25 = vld [vmem:[%s973_s1 + $0x80] sm:$0xff]   ;;  %767 = vmatprep.mubr.bf16.mxu1 %v811_v24  ;;  %v813_v27 = vld [vmem:[%s926_s6 + $0x1c] ss:$12 sps:$4 sm:$0xff]   ;;  %v821_v34 = vld [vmem:[%s926_s6 + $0x4c] ss:$12 sps:$4 sm:$0xff]  }
  0x15   : > { %704 = vmatpush3.bf16.msra.mxu0 %v791_v7  ;;  %v807_v26 = vld [vmem:[%s926_s6] ss:$12 sps:$4 sm:$0xff]   ;;  %v819_v29 = vld [vmem:[%s926_s6 + $0x38] ss:$12 sps:$4 sm:$0xff]   ;;  %v818_v33 = vld [vmem:[%s926_s6 + $0x30] ss:$12 sps:$4 sm:$0xff]  }
  0x16   : > { %705 = vmatprep.subr.bf16.mxu0 %v792_v8  ;;  %v812_v28 = vld [vmem:[%s926_s6 + $0x20] ss:$12 sps:$4 sm:$0xff]   ;;  %v815_v30 = vld [vmem:[%s926_s6 + $0x18] ss:$12 sps:$4 sm:$0xff]   ;;  %v823_v35 = vld [vmem:[%s926_s6 + $0x48] ss:$12 sps:$4 sm:$0xff]  }
  0x17   : > { %756 = vmatpush3.bf16.msra.mxu1 %v793_v9  ;;  %v660_v38 = vld [vmem:[%s974_s2] ss:$0 sm:$0xff] }
  0x18   : > { %757 = vmatprep.subr.bf16.mxu1 %v796_v12 }
  0x19   : > { %706 = vmatpush3.bf16.msra.mxu0 %v794_v10 }
  0x1a   : > { %707 = vmatprep.subr.bf16.mxu0 %v795_v11 }
  0x1b   : > { %758 = vmatpush3.bf16.msra.mxu1 %v796_v12 }
  0x1c   : > { %759 = vmatprep.subr.bf16.mxu1 %v799_v14 }
  0x1d   : > { %708 = vmatpush3.bf16.msra.mxu0 %v797_v13 }
  0x1e   : > { %709 = vmatprep.subr.bf16.mxu0 %v798_v15 }
  0x1f   : > { %760 = vmatpush3.bf16.msra.mxu1 %v799_v14 }
  0x20   : > { %761 = vmatprep.subr.bf16.mxu1 %v802_v17 }
  0x21   : > { %710 = vmatpush3.bf16.msra.mxu0 %v800_v16 }
  0x22   : > { %711 = vmatprep.subr.bf16.mxu0 %v801_v18 }
  0x23   : > { %762 = vmatpush3.bf16.msra.mxu1 %v802_v17 }
  0x24   : > { %763 = vmatprep.subr.bf16.mxu1 %v805_v21 }
  0x25   : > { %712 = vmatpush3.bf16.msra.mxu0 %v803_v19 }
  0x26   : > { %713 = vmatprep.subr.bf16.mxu0 %v804_v20 }
  0x27   : > { %764 = vmatpush3.bf16.msra.mxu1 %v805_v21 }
  0x28   : > { %765 = vmatprep.subr.bf16.mxu1 %v810_v25 }
  0x29   : > { %714 = vmatpush3.bf16.msra.mxu0 %v806_v23 }
  0x2b   : > { %766 = vmatpush3.bf16.msra.mxu1 %v810_v25 }
  0x2c   : > { %490 = vmatmul.mubr.bf16.vlgmr.msra.gmra.mxu0 %v807_v26 }
  0x2d   : > { %497 = vmatprep.mubr.bf16.mxu0 %v813_v27 }
  0x2e   : > { %768 = vmatmul.mubr.bf16.vlgmr.msra.gmra.mxu1 %v812_v28 }
  0x2f   : > { %771 = vmatprep.mubr.bf16.mxu1 %v819_v29 }
  0x34   : > { %498 = vmatmul.mubr.bf16.gmra.mxu0 %v815_v30 }
  0x35   : > { %505 = vmatprep.mubr.bf16.mxu0 %v816_v31 }
  0x36   : > { %772 = vmatmul.mubr.bf16.gmra.mxu1 %v820_v32 }
  0x3c   : > { %506 = vmatmul.mubr.bf16.gmra.mxu0 %v818_v33 }
  0x3d   : > { %513 = vmatprep.mubr.bf16.mxu0 %v821_v34 }
  0x44   : > { %514 = vmatmul.mubr.bf16.gmra.mxu0 %v823_v35 }
  0xec   : > { %v715_v36 = vpop.f32.mrf.mxu0 }
  0xee   : > { %v716_v37 = vpop.f32.mrf.mxu0  ;;  %v769_v40 = vpop.f32.mrf.mxu1 }
  0xef   : > { %v717_v39 = vadd.f32 %v716_v37, %v715_v36 }
  0xf0   : > { %v718_v41 = vpop.f32.mrf.mxu0  ;;  %v556_v43 = vpop.f32.mrf.mxu1 }
  0xf1   : > { %v492_v42 = vadd.f32 %v717_v39, %v660_v38 }
  0xf2   : > { %v719_v44 = vpop.f32.mrf.mxu0  ;;  %v770_v47 = vpop.f32.mrf.mxu1 }
  0xf3   : > { %v720_v45 = vadd.f32 %v719_v44, %v718_v41  ;;  %v557_v46 = vadd.f32 %v556_v43, %v492_v42 }
  0xf4   : > { %v721_v48 = vpop.f32.mrf.mxu0  ;;  %v559_v50 = vpop.f32.mrf.mxu1 }
  0xf5   : > { %587 = vst [vmem:[%s959_s21] sm:$0xff] %v557_v46  ;;  %v495_v49 = vadd.f32 %v720_v45, %v660_v38 }
  0xf6   : > { %v722_v51 = vpop.f32.mrf.mxu0  ;;  %v773_v55 = vpop.f32.mrf.mxu1 }
  0xf7   : > { %v723_v52 = vadd.f32 %v722_v51, %v721_v48  ;;  %v560_v53 = vadd.f32 %v559_v50, %v495_v49 }
  0xf8   : > { %v724_v54 = vpop.f32.mrf.mxu0  ;;  %v572_v61 = vpop.f32.mrf.mxu1 }
  0xf9   : > { %v500_v56 = vadd.f32 %v723_v52, %v660_v38  ;;  %588 = vst [vmem:[%s959_s21 + $0x8] sm:$0xff] %v560_v53 }
  0xfa   : > { %v725_v57 = vpop.f32.mrf.mxu0  ;;  %v774_v3 = vpop.f32.mrf.mxu1 }
  0xfb   : > { %v565_v58 = vadd.f32 %v769_v40, %v500_v56  ;;  %v726_v59 = vadd.f32 %v725_v57, %v724_v54 }
  0xfc   : > { %v727_v60 = vpop.f32.mrf.mxu0  ;;  %v575_v9 = vpop.f32.mrf.mxu1 }
  0xfd   : > { %589 = vst [vmem:[%s959_s21 + $0x10] sm:$0xff] %v565_v58  ;;  %v503_v62 = vadd.f32 %v726_v59, %v660_v38 }
  0xfe   : > { %v728_v63 = vpop.f32.mrf.mxu0 }
  0xff   : > { %v568_v0 = vadd.f32 %v770_v47, %v503_v62  ;;  %v729_v1 = vadd.f32 %v728_v63, %v727_v60 }
 0x100   : > { %v730_v2 = vpop.f32.mrf.mxu0 }
 0x101   : > { %590 = vst [vmem:[%s959_s21 + $0x18] sm:$0xff] %v568_v0  ;;  %v508_v4 = vadd.f32 %v729_v1, %v660_v38 }
 0x102   : > { %v731_v5 = vpop.f32.mrf.mxu0 }
 0x103   : > { %v732_v6 = vadd.f32 %v731_v5, %v730_v2  ;;  %v573_v7 = vadd.f32 %v572_v61, %v508_v4 }
 0x104   : > { %v733_v8 = vpop.f32.mrf.mxu0 }
 0x105   : > { %591 = vst [vmem:[%s959_s21 + $0x20] sm:$0xff] %v573_v7  ;;  %v511_v10 = vadd.f32 %v732_v6, %v660_v38 }
 0x106   : > { %v734_v11 = vpop.f32.mrf.mxu0 }
 0x107   : > { %v735_v12 = vadd.f32 %v734_v11, %v733_v8  ;;  %v576_v13 = vadd.f32 %v575_v9, %v511_v10 }
 0x108   : > { %v736_v14 = vpop.f32.mrf.mxu0 }
 0x109   : > { %v516_v15 = vadd.f32 %v735_v12, %v660_v38  ;;  %592 = vst [vmem:[%s959_s21 + $0x28] sm:$0xff] %v576_v13 }
 0x10a   : > { %v737_v16 = vpop.f32.mrf.mxu0 }
 0x10b   : > { %v581_v17 = vadd.f32 %v773_v55, %v516_v15  ;;  %v738_v18 = vadd.f32 %v737_v16, %v736_v14 }
 0x10d   : > { %593 = vst [vmem:[%s959_s21 + $0x30] sm:$0xff] %v581_v17  ;;  %v519_v19 = vadd.f32 %v738_v18, %v660_v38 }
 0x10f   : > { %v584_v20 = vadd.f32 %v774_v3, %v519_v19 }
 0x111   : > { %594 = vst [vmem:[%s959_s21 + $0x38] sm:$0xff] %v584_v20 }
 0x112 PF: > { %s13_s12 = sadd.s32 1, %s830_s12  }
 0x113   : > { %p10_p4 = scmp.ge.s32.totalorder %s13_s12, 4  }
 0x115   :  { %12 = sbr.rel (!%p10_p4) target bundleno = 1 (0x1), region = 62 }

// kernel: raft_forward.49
= control target key start
LH: loop header
LB: loop body
LE: loop exit
PB: predicated region body
PF: predicated region fallthrough
CT: control target
= control target key end

     0   :  { %s773_s12 = smov 0   ;;  %s895_s0 = inlined_call_operand.vmem [shape: bf16[32,512], index: 0, kind: input, shape index: {}]   ;;  %s896_s1 = inlined_call_operand.vmem [shape: bf16[512,128], index: 1, kind: input, shape index: {}]   ;;  %s897_s2 = inlined_call_operand.vmem [shape: f32[1,128], index: 2, kind: input, shape index: {}]   ;;  %s898_s3 = inlined_call_operand.vmem [shape: f32[32,128], index: 3, kind: output, shape index: {}]  }
   0x1 LB: > { %s605_s13 = sadd.s32 4294967295, %s751_s12   ;;  %p609_p0 = scmp.ge.s32.totalorder %s751_s12, 1  ;;  %s751_s12 = sphi %s773_s12, %s13_s12  }
   0x2   : > { %p139_p1 = scmp.lt.s32.totalorder %s751_s12, 3 }
   0x4   : > { %p140_p2 = pnand %p609_p0, %p139_p1 }
   0x5   : > { %s610_s21 = sshll.u32 (!%p140_p2), %s605_s13, 1 }
   0x6   : > { %143 = sbr.rel (%p140_p2) target bundleno = 251 (0xfb), region = 32  ;;  %p165_p3 = scmp.lt.s32.totalorder (!%p140_p2), %s610_s21, 3 }
   0xb   : > { %v707_v0 = vld [vmem:[%s896_s1 + $0x78] sm:$0xff]   ;;  %v711_v4 = vld [vmem:[%s896_s1 + $0x70] sm:$0xff]   ;;  %v715_v8 = vld [vmem:[%s896_s1 + $0x68] sm:$0xff]   ;;  %s900_s21 = smov (!%p165_p3, %s610_s21), 3 }
   0xc   : > { %v708_v1 = vld [vmem:[%s896_s1 + $0xf8] sm:$0xff]   ;;  %655 = vmatprep.subr.bf16.mxu0 %v707_v0  ;;  %v712_v5 = vld [vmem:[%s896_s1 + $0xf0] sm:$0xff]   ;;  %v716_v9 = vld [vmem:[%s896_s1 + $0xe8] sm:$0xff]   ;;  %s654_s18 = sshll.u32 %s900_s21, 4  ;;  %s614_s7 = sshll.u32 %s900_s21, 3 }
   0xd   : > { %v709_v2 = vld [vmem:[%s896_s1 + $0x38] sm:$0xff]   ;;  %677 = vmatprep.subr.bf16.mxu1 %v708_v1  ;;  %v713_v6 = vld [vmem:[%s896_s1 + $0x30] sm:$0xff]   ;;  %v717_v10 = vld [vmem:[%s896_s1 + $0x28] sm:$0xff]   ;;  %s169_s28 = scalar_lea.vmem %s895_s0, %s654_s18  ;;  %s175_s10 = scalar_lea.vmem %s898_s3, %s614_s7 }
   0xe   : > { %v710_v3 = vld [vmem:[%s896_s1 + $0xb8] sm:$0xff]   ;;  %656 = vmatpush3.bf16.msra.mxu0 %v709_v2  ;;  %v714_v7 = vld [vmem:[%s896_s1 + $0xb0] sm:$0xff]   ;;  %v718_v11 = vld [vmem:[%s896_s1 + $0xa8] sm:$0xff]  }
   0xf   : > { %678 = vmatpush3.bf16.msra.mxu1 %v710_v3  ;;  %657 = vmatprep.subr.bf16.mxu0 %v711_v4  ;;  %v719_v12 = vld [vmem:[%s896_s1 + $0x60] sm:$0xff]   ;;  %v723_v16 = vld [vmem:[%s896_s1 + $0x58] sm:$0xff]   ;;  %v727_v20 = vld [vmem:[%s896_s1 + $0x50] sm:$0xff]  }
  0x10   : > { %679 = vmatprep.subr.bf16.mxu1 %v712_v5  ;;  %v720_v13 = vld [vmem:[%s896_s1 + $0xe0] sm:$0xff]   ;;  %v724_v17 = vld [vmem:[%s896_s1 + $0xd8] sm:$0xff]   ;;  %v728_v21 = vld [vmem:[%s896_s1 + $0xd0] sm:$0xff]  }
  0x11   : > { %v721_v14 = vld [vmem:[%s896_s1 + $0x20] sm:$0xff]   ;;  %v725_v18 = vld [vmem:[%s896_s1 + $0x18] sm:$0xff]   ;;  %v729_v22 = vld [vmem:[%s896_s1 + $0x10] sm:$0xff]  }
  0x12   : > { %658 = vmatpush3.bf16.msra.mxu0 %v713_v6  ;;  %v722_v15 = vld [vmem:[%s896_s1 + $0xa0] sm:$0xff]   ;;  %v726_v19 = vld [vmem:[%s896_s1 + $0x98] sm:$0xff]   ;;  %v730_v23 = vld [vmem:[%s896_s1 + $0x90] sm:$0xff]  }
  0x13   : > { %680 = vmatpush3.bf16.msra.mxu1 %v714_v7  ;;  %659 = vmatprep.subr.bf16.mxu0 %v715_v8  ;;  %v731_v24 = vld [vmem:[%s896_s1 + $0x48] sm:$0xff]   ;;  %v735_v28 = vld [vmem:[%s896_s1 + $0x40] sm:$0xff]  }
  0x14   : > { %681 = vmatprep.subr.bf16.mxu1 %v716_v9  ;;  %v732_v25 = vld [vmem:[%s896_s1 + $0xc8] sm:$0xff]   ;;  %v736_v29 = vld [vmem:[%s896_s1 + $0xc0] sm:$0xff]  }
  0x15   : > { %v733_v26 = vld [vmem:[%s896_s1 + $0x8] sm:$0xff]   ;;  %v737_v30 = vld [vmem:[%s896_s1] sm:$0xff]  }
  0x16   : > { %660 = vmatpush3.bf16.msra.mxu0 %v717_v10  ;;  %v734_v27 = vld [vmem:[%s896_s1 + $0x88] sm:$0xff]   ;;  %v738_v31 = vld [vmem:[%s896_s1 + $0x80] sm:$0xff]  }
  0x17   : > { %682 = vmatpush3.bf16.msra.mxu1 %v718_v11  ;;  %661 = vmatprep.subr.bf16.mxu0 %v719_v12  ;;  %v739_v32 = vld [vmem:[%s169_s28] ss:$16 sps:$4 sm:$0xff]   ;;  %v741_v33 = vld [vmem:[%s169_s28 + $0x4] ss:$16 sps:$4 sm:$0xff]   ;;  %v742_v34 = vld [vmem:[%s169_s28 + $0x8] ss:$16 sps:$4 sm:$0xff]  }
  0x18   : > { %683 = vmatprep.subr.bf16.mxu1 %v720_v13  ;;  %v744_v35 = vld [vmem:[%s169_s28 + $0xc] ss:$16 sps:$4 sm:$0xff]   ;;  %497 = vmatprep.mubr.bf16.mxu0 %v741_v33  ;;  %v615_v38 = vld [vmem:[%s897_s2] ss:$0 sm:$0xff] }
  0x19   : > { %538 = vmatprep.mubr.bf16.mxu1 %v744_v35 }
  0x1a   : > { %662 = vmatpush3.bf16.msra.mxu0 %v721_v14 }
  0x1b   : > { %684 = vmatpush3.bf16.msra.mxu1 %v722_v15  ;;  %663 = vmatprep.subr.bf16.mxu0 %v723_v16 }
  0x1c   : > { %685 = vmatprep.subr.bf16.mxu1 %v724_v17 }
  0x1e   : > { %664 = vmatpush3.bf16.msra.mxu0 %v725_v18 }
  0x1f   : > { %686 = vmatpush3.bf16.msra.mxu1 %v726_v19  ;;  %665 = vmatprep.subr.bf16.mxu0 %v727_v20 }
  0x20   : > { %687 = vmatprep.subr.bf16.mxu1 %v728_v21 }
  0x22   : > { %666 = vmatpush3.bf16.msra.mxu0 %v729_v22 }
  0x23   : > { %688 = vmatpush3.bf16.msra.mxu1 %v730_v23  ;;  %667 = vmatprep.subr.bf16.mxu0 %v731_v24 }
  0x24   : > { %689 = vmatprep.subr.bf16.mxu1 %v732_v25 }
  0x26   : > { %668 = vmatpush3.bf16.msra.mxu0 %v733_v26 }
  0x27   : > { %690 = vmatpush3.bf16.msra.mxu1 %v734_v27  ;;  %669 = vmatprep.subr.bf16.mxu0 %v735_v28 }
  0x28   : > { %691 = vmatprep.subr.bf16.mxu1 %v736_v29 }
  0x2a   : > { %670 = vmatpush3.bf16.msra.mxu0 %v737_v30 }
  0x2b   : > { %692 = vmatpush3.bf16.msra.mxu1 %v738_v31 }
  0x2d   : > { %498 = vmatmul.mubr.bf16.vlgmr.msra.gmra.mxu0 %v739_v32 }
  0x2e   : > { %539 = vmatmul.mubr.bf16.vlgmr.msra.gmra.mxu1 %v742_v34 }
  0xed   : > { %v671_v36 = vpop.f32.mrf.mxu0 }
  0xee   : > { %v693_v37 = vpop.f32.mrf.mxu1 }
  0xef   : > { %v672_v39 = vpop.f32.mrf.mxu0 }
  0xf0   : > { %v673_v40 = vadd.f32 %v672_v39, %v671_v36  ;;  %v694_v41 = vpop.f32.mrf.mxu1 }
  0xf1   : > { %v674_v42 = vpop.f32.mrf.mxu0  ;;  %v695_v44 = vadd.f32 %v694_v41, %v693_v37 }
  0xf2   : > { %v500_v43 = vadd.f32 %v673_v40, %v615_v38  ;;  %v696_v45 = vpop.f32.mrf.mxu1 }
  0xf3   : > { %v675_v46 = vpop.f32.mrf.mxu0 }
  0xf4   : > { %v541_v47 = vadd.f32 %v695_v44, %v500_v43  ;;  %v676_v48 = vadd.f32 %v675_v46, %v674_v42  ;;  %v697_v49 = vpop.f32.mrf.mxu1 }
  0xf5   : > { %v698_v51 = vadd.f32 %v697_v49, %v696_v45 }
  0xf6   : > { %547 = vst [vmem:[%s175_s10] sm:$0xff] %v541_v47  ;;  %v503_v50 = vadd.f32 %v676_v48, %v615_v38 }
  0xf8   : > { %v544_v52 = vadd.f32 %v698_v51, %v503_v50 }
  0xfa   : > { %548 = vst [vmem:[%s175_s10 + $0x8] sm:$0xff] %v544_v52 }
  0xfb PF: > { %s13_s12 = sadd.s32 1, %s751_s12  }
  0xfc   : > { %p10_p4 = scmp.ge.s32.totalorder %s13_s12, 4  }
  0xfe   :  { %12 = sbr.rel (!%p10_p4) target bundleno = 1 (0x1), region = 62 }

// kernel: raft_forward.50
= control target key start
LH: loop header
LB: loop body
LE: loop exit
PB: predicated region body
PF: predicated region fallthrough
CT: control target
= control target key end

     0   :  { %s452_s12 = smov 0   ;;  %s496_s0 = inlined_call_operand.vmem [shape: bf16[32,128], index: 0, kind: input, shape index: {}]   ;;  %s497_s1 = inlined_call_operand.vmem [shape: bf16[128,128], index: 1, kind: input, shape index: {}]   ;;  %s498_s2 = inlined_call_operand.vmem [shape: f32[1,128], index: 2, kind: input, shape index: {}]   ;;  %s499_s3 = inlined_call_operand.vmem [shape: f32[32,128], index: 3, kind: output, shape index: {}]  }
   0x1 LB: > { %s353_s13 = sadd.s32 4294967295, %s428_s12   ;;  %p357_p0 = scmp.ge.s32.totalorder %s428_s12, 1  ;;  %s428_s12 = sphi %s452_s12, %s13_s12  }
   0x2   : > { %p138_p1 = scmp.lt.s32.totalorder %s428_s12, 3 }
   0x4   : > { %p139_p2 = pnand %p357_p0, %p138_p1 }
   0x5   : > { %s358_s18 = sshll.u32 (!%p139_p2), %s353_s13, 1 }
   0x6   : > { %142 = sbr.rel (%p139_p2) target bundleno = 244 (0xf4), region = 32  ;;  %p163_p3 = scmp.lt.s32.totalorder (!%p139_p2), %s358_s18, 3 }
   0xb   : > { %v413_v0 = vld [vmem:[%s497_s1 + $0x38] sm:$0xff]   ;;  %v430_v1 = vmov 0.0   ;;  %v414_v2 = vld [vmem:[%s497_s1 + $0x30] sm:$0xff]   ;;  %vm431_vm0 = vmmov 0   ;;  %s501_s18 = smov (!%p163_p3, %s358_s18), 3  ;;  %v415_v3 = vld [vmem:[%s497_s1 + $0x28] sm:$0xff]  }
   0xc   : > { %383 = vmatprep.subr.bf16.mxu0 %v430_v1  ;;  %399 = vmatprep.mubr.msk.bf16.mxu0 %vm431_vm0, %v430_v1  ;;  %s359_s21 = sshll.u32 %s501_s18, 2  ;;  %v416_v4 = vld [vmem:[%s497_s1 + $0x20] sm:$0xff]   ;;  %v417_v5 = vld [vmem:[%s497_s1 + $0x18] sm:$0xff]   ;;  %v418_v6 = vld [vmem:[%s497_s1 + $0x10] sm:$0xff]   ;;  %s361_s8 = sshll.u32 %s501_s18, 3 }
   0xd   : > { %384 = vmatpush3.bf16.msra.mxu0 %v413_v0  ;;  %s166_s24 = scalar_lea.vmem %s496_s0, %s359_s21  ;;  %v419_v7 = vld [vmem:[%s497_s1 + $0x8] sm:$0xff]   ;;  %v420_v8 = vld [vmem:[%s497_s1] sm:$0xff]   ;;  %s172_s14 = scalar_lea.vmem %s499_s3, %s361_s8 }
   0xe   : > { %385 = vmatprep.subr.bf16.mxu0 %v430_v1  ;;  %v421_v9 = vld [vmem:[%s166_s24] sm:$0xff]  }
   0xf   : > { %v362_v10 = vld [vmem:[%s498_s2] ss:$0 sm:$0xff] }
  0x11   : > { %386 = vmatpush3.bf16.msra.mxu0 %v414_v2 }
  0x12   : > { %387 = vmatprep.subr.bf16.mxu0 %v430_v1 }
  0x15   : > { %388 = vmatpush3.bf16.msra.mxu0 %v415_v3 }
  0x16   : > { %389 = vmatprep.subr.bf16.mxu0 %v430_v1 }
  0x19   : > { %390 = vmatpush3.bf16.msra.mxu0 %v416_v4 }
  0x1a   : > { %391 = vmatprep.subr.bf16.mxu0 %v430_v1 }
  0x1d   : > { %392 = vmatpush3.bf16.msra.mxu0 %v417_v5 }
  0x1e   : > { %393 = vmatprep.subr.bf16.mxu0 %v430_v1 }
  0x21   : > { %394 = vmatpush3.bf16.msra.mxu0 %v418_v6 }
  0x22   : > { %395 = vmatprep.subr.bf16.mxu0 %v430_v1 }
  0x25   : > { %396 = vmatpush3.bf16.msra.mxu0 %v419_v7 }
  0x26   : > { %397 = vmatprep.subr.bf16.mxu0 %v430_v1 }
  0x29   : > { %398 = vmatpush3.bf16.msra.mxu0 %v420_v8 }
  0x2c   : > { %400 = vmatmul.mubr.bf16.vlgmr.msra.gmra.mxu0 %v421_v9 }
  0xec   : > { %v288_v11 = vpop.f32.mrf.mxu0 }
  0xed   : > { %v289_v12 = vadd.f32 %v362_v10, %v288_v11 }
  0xee   : > { %v401_v13 = vpop.f32.mrf.mxu0 }
  0xef   : > { %295 = vst [vmem:[%s172_s14] sm:$0xff] %v289_v12 }
  0xf0   : > { %v291_v14 = vpop.f32.mrf.mxu0 }
  0xf1   : > { %v292_v15 = vadd.f32 %v362_v10, %v291_v14 }
  0xf2   : > { %v402_v16 = vpop.f32.mrf.mxu0 }
  0xf3   : > { %296 = vst [vmem:[%s172_s14 + $0x8] sm:$0xff] %v292_v15 }
  0xf4 PF: > { %s13_s12 = sadd.s32 1, %s428_s12  }
  0xf5   : > { %p10_p4 = scmp.ge.s32.totalorder %s13_s12, 4  }
  0xf7   :  { %12 = sbr.rel (!%p10_p4) target bundleno = 1 (0x1), region = 62 }

// kernel: raft_forward.55
= control target key start
LH: loop header
LB: loop body
LE: loop exit
PB: predicated region body
PF: predicated region fallthrough
CT: control target
= control target key end

     0   :  { %s503_s9 = smov 0   ;;  %s505_s10 = smov 0   ;;  %s539_s0 = inlined_call_operand.vmem [shape: bf16[2,16,64], index: 0, kind: input, shape index: {}]   ;;  %s540_s1 = inlined_call_operand.vmem [shape: bf16[2,64,16], index: 1, kind: input, shape index: {}]   ;;  %s541_s2 = inlined_call_operand.vmem [shape: f32[2,16,16], index: 2, kind: output, shape index: {}]  }
   0x1   :  { %s507_s11 = smov 0  }
   0x2 LB: > { %s24_s12 = sadd.s32 1, %s480_s10  ;;  %p396_p0 = scmp.ge.s32.totalorder %s484_s11, 1  ;;  %s484_s11 = sphi %s507_s11, %s12_s11   ;;  %s480_s10 = sphi %s505_s10, %s543_s10   ;;  %s476_s9 = sphi %s503_s9, %s542_s9  }
   0x3   : > { %p26_p1 = scmp.ge.s32.totalorder %s24_s12, 2  ;;  %p143_p2 = scmp.lt.s32.totalorder %s484_s11, 3 }
   0x5   : > { %s545_s12 = smov (%p26_p1, %s24_s12), 0  ;;  %p144_p3 = pnand %p396_p0, %p143_p2 }
   0x6   : > { %p179_p4 = scmp.lt.s32.totalorder (!%p144_p3), %s476_s9, 1 }
   0x7   : > { %147 = sbr.rel (%p144_p3) target bundleno = 231 (0xe7), region = 28 }
   0xc   : > { %v486_v0 = vmov 0.0   ;;  %vm487_vm0 = vmmov 0   ;;  %s547_s9 = smov (!%p179_p4, %s476_s9), 1  ;;  %vm243_vm1 = vcmask 523264   ;;  %vm290_vm2 = vcmask 130048  }
   0xd   : > { %419 = vmatprep.subr.bf16.mxu0 %v486_v0  ;;  %427 = vmatprep.mubr.msk.bf16.mxu0 %vm487_vm0, %v486_v0  ;;  %s412_s13 = sshll.u32 %s547_s9, 5  ;;  %s411_s17 = sshll.u32 %s547_s9, 3 }
   0xe   : > { %s192_s16 = scalar_lea.vmem %s540_s1, %s412_s13  ;;  %s186_s20 = scalar_lea.vmem %s539_s0, %s411_s17 }
   0xf   : > { %v457_v1 = vld [vmem:[%s192_s16 + $0x18] sm:$0xff]   ;;  %v458_v2 = vld [vmem:[%s192_s16 + $0x10] sm:$0xff]   ;;  %v459_v3 = vld [vmem:[%s192_s16 + $0x8] sm:$0xff]   ;;  %s413_s21 = sshll.u32 %s547_s9, 4 }
  0x10   : > { %420 = vmatpush3.bf16.msra.mxu0 %v457_v1  ;;  %v460_v4 = vld [vmem:[%s192_s16] sm:$0xff]   ;;  %s201_s24 = scalar_lea.vmem %s541_s2, %s413_s21 }
  0x11   : > { %421 = vmatprep.subr.bf16.mxu0 %v486_v0  ;;  %v461_v5 = vld [vmem:[%s186_s20] sm:$0xff]  }
  0x14   : > { %422 = vmatpush3.bf16.msra.mxu0 %v458_v2 }
  0x15   : > { %423 = vmatprep.subr.bf16.mxu0 %v486_v0 }
  0x18   : > { %424 = vmatpush3.bf16.msra.mxu0 %v459_v3 }
  0x19   : > { %425 = vmatprep.subr.bf16.mxu0 %v486_v0 }
  0x1c   : > { %426 = vmatpush3.bf16.msra.mxu0 %v460_v4 }
  0x1f   : > { %428 = vmatmul.mubr.msk.bf16.vlgmr.msra.gmra.mxu0 %vm243_vm1, %v461_v5 }
  0xdf   : > { %v281_v6 = vpop.f32.mrf.mxu0 }
  0xe0   : > { %v288_v7 = vmul.f32 0.125, %v281_v6 }
  0xe1   : > { %v429_v8 = vpop.f32.mrf.mxu0 }
  0xe2   : > { %291 = vst.msk [vmem:[%s201_s24] sm:$0xff] %vm290_vm2, %v288_v7 }
  0xe3   : > { %v284_v9 = vpop.f32.mrf.mxu0 }
  0xe4   : > { %v289_v10 = vmul.f32 0.125, %v284_v9 }
  0xe5   : > { %v430_v11 = vpop.f32.mrf.mxu0 }
  0xe6   : > { %292 = vst.msk [vmem:[%s201_s24 + $0x8] sm:$0xff] %vm290_vm2, %v289_v10 }
  0xe7 PF: > { %s12_s11 = sadd.s32 1, %s484_s11   ;;  %s542_s9 = smov %s480_s10 }
  0xe8   : > { %p9_p5 = scmp.ge.s32.totalorder %s12_s11, 4   ;;  %s543_s10 = smov %s545_s12 }
  0xea   :  { %11 = sbr.rel (!%p9_p5) target bundleno = 2 (0x2), region = 61 }

// kernel: raft_forward.56
= control target key start
LH: loop header
LB: loop body
LE: loop exit
PB: predicated region body
PF: predicated region fallthrough
CT: control target
= control target key end

     0   :  { %s454_s12 = smov 0   ;;  %s502_s0 = inlined_call_operand.vmem [shape: bf16[32,128], index: 0, kind: input, shape index: {}]   ;;  %s503_s1 = inlined_call_operand.vmem [shape: bf16[128,128], index: 1, kind: input, shape index: {}]   ;;  %s504_s2 = inlined_call_operand.vmem [shape: f32[1,128], index: 2, kind: input, shape index: {}]   ;;  %s505_s3 = inlined_call_operand.vmem [shape: f32[32,128], index: 3, kind: output, shape index: {}]  }
   0x1 LB: > { %s355_s13 = sadd.s32 4294967295, %s430_s12   ;;  %p359_p0 = scmp.ge.s32.totalorder %s430_s12, 1  ;;  %s430_s12 = sphi %s454_s12, %s13_s12  }
   0x2   : > { %p138_p1 = scmp.lt.s32.totalorder %s430_s12, 3 }
   0x4   : > { %p139_p2 = pnand %p359_p0, %p138_p1 }
   0x5   : > { %s360_s18 = sshll.u32 (!%p139_p2), %s355_s13, 1 }
   0x6   : > { %142 = sbr.rel (%p139_p2) target bundleno = 246 (0xf6), region = 32  ;;  %p163_p3 = scmp.lt.s32.totalorder (!%p139_p2), %s360_s18, 3 }
   0xb   : > { %v415_v0 = vld [vmem:[%s503_s1 + $0x38] sm:$0xff]   ;;  %v432_v1 = vmov 0.0   ;;  %v416_v2 = vld [vmem:[%s503_s1 + $0x30] sm:$0xff]   ;;  %vm433_vm0 = vmmov 0   ;;  %s507_s18 = smov (!%p163_p3, %s360_s18), 3  ;;  %v417_v3 = vld [vmem:[%s503_s1 + $0x28] sm:$0xff]  }
   0xc   : > { %385 = vmatprep.subr.bf16.mxu0 %v432_v1  ;;  %401 = vmatprep.mubr.msk.bf16.mxu0 %vm433_vm0, %v432_v1  ;;  %s361_s21 = sshll.u32 %s507_s18, 2  ;;  %v418_v4 = vld [vmem:[%s503_s1 + $0x20] sm:$0xff]   ;;  %v419_v5 = vld [vmem:[%s503_s1 + $0x18] sm:$0xff]   ;;  %v420_v6 = vld [vmem:[%s503_s1 + $0x10] sm:$0xff]   ;;  %s363_s10 = sshll.u32 %s507_s18, 3 }
   0xd   : > { %386 = vmatpush3.bf16.msra.mxu0 %v415_v0  ;;  %s166_s24 = scalar_lea.vmem %s502_s0, %s361_s21  ;;  %v421_v7 = vld [vmem:[%s503_s1 + $0x8] sm:$0xff]   ;;  %v422_v8 = vld [vmem:[%s503_s1] sm:$0xff]   ;;  %s172_s14 = scalar_lea.vmem %s505_s3, %s363_s10 }
   0xe   : > { %387 = vmatprep.subr.bf16.mxu0 %v432_v1  ;;  %v423_v9 = vld [vmem:[%s166_s24] sm:$0xff]  }
   0xf   : > { %v364_v10 = vld [vmem:[%s504_s2] ss:$0 sm:$0xff] }
  0x11   : > { %388 = vmatpush3.bf16.msra.mxu0 %v416_v2 }
  0x12   : > { %389 = vmatprep.subr.bf16.mxu0 %v432_v1 }
  0x15   : > { %390 = vmatpush3.bf16.msra.mxu0 %v417_v3 }
  0x16   : > { %391 = vmatprep.subr.bf16.mxu0 %v432_v1 }
  0x19   : > { %392 = vmatpush3.bf16.msra.mxu0 %v418_v4 }
  0x1a   : > { %393 = vmatprep.subr.bf16.mxu0 %v432_v1 }
  0x1d   : > { %394 = vmatpush3.bf16.msra.mxu0 %v419_v5 }
  0x1e   : > { %395 = vmatprep.subr.bf16.mxu0 %v432_v1 }
  0x21   : > { %396 = vmatpush3.bf16.msra.mxu0 %v420_v6 }
  0x22   : > { %397 = vmatprep.subr.bf16.mxu0 %v432_v1 }
  0x25   : > { %398 = vmatpush3.bf16.msra.mxu0 %v421_v7 }
  0x26   : > { %399 = vmatprep.subr.bf16.mxu0 %v432_v1 }
  0x29   : > { %400 = vmatpush3.bf16.msra.mxu0 %v422_v8 }
  0x2c   : > { %402 = vmatmul.mubr.bf16.vlgmr.msra.gmra.mxu0 %v423_v9 }
  0xec   : > { %v288_v11 = vpop.f32.mrf.mxu0 }
  0xed   : > { %v289_v12 = vadd.f32 %v364_v10, %v288_v11 }
  0xee   : > { %v403_v13 = vpop.f32.mrf.mxu0 }
  0xef   : > { %v295_v14 = vmax.f32 %v289_v12, 0.0 }
  0xf0   : > { %v291_v15 = vpop.f32.mrf.mxu0 }
  0xf1   : > { %297 = vst [vmem:[%s172_s14] sm:$0xff] %v295_v14  ;;  %v292_v16 = vadd.f32 %v364_v10, %v291_v15 }
  0xf2   : > { %v404_v17 = vpop.f32.mrf.mxu0 }
  0xf3   : > { %v296_v18 = vmax.f32 %v292_v16, 0.0 }
  0xf5   : > { %298 = vst [vmem:[%s172_s14 + $0x8] sm:$0xff] %v296_v18 }
  0xf6 PF: > { %s13_s12 = sadd.s32 1, %s430_s12  }
  0xf7   : > { %p10_p4 = scmp.ge.s32.totalorder %s13_s12, 4  }
  0xf9   :  { %12 = sbr.rel (!%p10_p4) target bundleno = 1 (0x1), region = 62 }

// kernel: raft_forward.57
= control target key start
LH: loop header
LB: loop body
LE: loop exit
PB: predicated region body
PF: predicated region fallthrough
CT: control target
= control target key end

     0   :  { %s938_s12 = smov 0   ;;  %s1091_s0 = inlined_call_operand.vmem [shape: bf16[32,640], index: 0, kind: input, shape index: {}]   ;;  %s1092_s1 = inlined_call_operand.vmem [shape: bf16[640,128], index: 1, kind: input, shape index: {}]   ;;  %s1093_s2 = inlined_call_operand.vmem [shape: f32[1,128], index: 2, kind: input, shape index: {}]   ;;  %s1094_s3 = inlined_call_operand.vmem [shape: f32[32,128], index: 3, kind: output, shape index: {}]  }
   0x1 LB: > { %s720_s13 = sadd.s32 4294967295, %s914_s12   ;;  %p724_p0 = scmp.ge.s32.totalorder %s914_s12, 1  ;;  %s914_s12 = sphi %s938_s12, %s13_s12  }
   0x2   : > { %p139_p1 = scmp.lt.s32.totalorder %s914_s12, 3 }
   0x4   : > { %p140_p2 = pnand %p724_p0, %p139_p1 }
   0x5   : > { %s725_s17 = sshll.u32 (!%p140_p2), %s720_s13, 1 }
   0x6   : > { %143 = sbr.rel (%p140_p2) target bundleno = 278 (0x116), region = 32  ;;  %p165_p3 = scmp.lt.s32.totalorder (!%p140_p2), %s725_s17, 3 }
   0xb   : > { %v861_v0 = vld [vmem:[%s1092_s1 + $0x78] sm:$0xff]   ;;  %v865_v4 = vld [vmem:[%s1092_s1 + $0x70] sm:$0xff]   ;;  %v869_v8 = vld [vmem:[%s1092_s1 + $0x68] sm:$0xff]   ;;  %s1096_s17 = smov (!%p165_p3, %s725_s17), 3  ;;  %v916_v33 = vmov 0.0   ;;  %vm917_vm0 = vmmov 0  }
   0xc   : > { %v862_v1 = vld [vmem:[%s1092_s1 + $0x38] sm:$0xff]   ;;  %777 = vmatprep.subr.bf16.mxu0 %v861_v0  ;;  %v866_v5 = vld [vmem:[%s1092_s1 + $0x30] sm:$0xff]   ;;  %v870_v9 = vld [vmem:[%s1092_s1 + $0x28] sm:$0xff]   ;;  %s850_s14 = smul.u32 20, %s1096_s17 }
   0xd   : > { %v863_v2 = vld [vmem:[%s1092_s1 + $0xf8] sm:$0xff]   ;;  %778 = vmatpush3.bf16.msra.mxu0 %v862_v1  ;;  %v867_v6 = vld [vmem:[%s1092_s1 + $0xf0] sm:$0xff]   ;;  %v871_v10 = vld [vmem:[%s1092_s1 + $0xe8] sm:$0xff]  }
   0xe   : > { %v864_v3 = vld [vmem:[%s1092_s1 + $0xb8] sm:$0xff]   ;;  %799 = vmatprep.subr.bf16.mxu1 %v863_v2  ;;  %779 = vmatprep.subr.bf16.mxu0 %v865_v4  ;;  %v868_v7 = vld [vmem:[%s1092_s1 + $0xb0] sm:$0xff]   ;;  %v872_v11 = vld [vmem:[%s1092_s1 + $0xa8] sm:$0xff]   ;;  %s1041_s13 = scalar_lea.vmem %s1091_s0, %s850_s14 }
   0xf   : > { %800 = vmatpush3.bf16.msra.mxu1 %v864_v3  ;;  %v873_v12 = vld [vmem:[%s1092_s1 + $0x60] sm:$0xff]   ;;  %v877_v16 = vld [vmem:[%s1092_s1 + $0x58] sm:$0xff]   ;;  %v881_v20 = vld [vmem:[%s1092_s1 + $0x50] sm:$0xff]  }
  0x10   : > { %801 = vmatprep.subr.bf16.mxu1 %v867_v6  ;;  %v874_v13 = vld [vmem:[%s1092_s1 + $0x20] sm:$0xff]   ;;  %v878_v17 = vld [vmem:[%s1092_s1 + $0x18] sm:$0xff]   ;;  %v882_v21 = vld [vmem:[%s1092_s1 + $0x10] sm:$0xff]  }
  0x11   : > { %780 = vmatpush3.bf16.msra.mxu0 %v866_v5  ;;  %v875_v14 = vld [vmem:[%s1092_s1 + $0xe0] sm:$0xff]   ;;  %v879_v18 = vld [vmem:[%s1092_s1 + $0xd8] sm:$0xff]   ;;  %v883_v22 = vld [vmem:[%s1092_s1 + $0xd0] sm:$0xff]  }
  0x12   : > { %781 = vmatprep.subr.bf16.mxu0 %v869_v8  ;;  %v876_v15 = vld [vmem:[%s1092_s1 + $0xa0] sm:$0xff]   ;;  %v880_v19 = vld [vmem:[%s1092_s1 + $0x98] sm:$0xff]   ;;  %v884_v23 = vld [vmem:[%s1092_s1 + $0x90] sm:$0xff]  }
  0x13   : > { %802 = vmatpush3.bf16.msra.mxu1 %v868_v7  ;;  %v885_v24 = vld [vmem:[%s1092_s1 + $0x48] sm:$0xff]   ;;  %v889_v28 = vld [vmem:[%s1092_s1 + $0x40] sm:$0xff]   ;;  %v899_v37 = vld [vmem:[%s1092_s1 + $0x138] sm:$0xff]  }
  0x14   : > { %803 = vmatprep.subr.bf16.mxu1 %v871_v10  ;;  %v886_v25 = vld [vmem:[%s1092_s1 + $0x8] sm:$0xff]   ;;  %v890_v29 = vld [vmem:[%s1092_s1] sm:$0xff]   ;;  %v900_v38 = vld [vmem:[%s1092_s1 + $0x130] sm:$0xff]  }
  0x15   : > { %782 = vmatpush3.bf16.msra.mxu0 %v870_v9  ;;  %v887_v26 = vld [vmem:[%s1092_s1 + $0xc8] sm:$0xff]   ;;  %v891_v30 = vld [vmem:[%s1092_s1 + $0xc0] sm:$0xff]   ;;  %v903_v41 = vld [vmem:[%s1092_s1 + $0x118] sm:$0xff]  }
  0x16   : > { %783 = vmatprep.subr.bf16.mxu0 %v873_v12  ;;  %v888_v27 = vld [vmem:[%s1092_s1 + $0x88] sm:$0xff]   ;;  %v892_v31 = vld [vmem:[%s1041_s13] ss:$20 sps:$4 sm:$0xff]   ;;  %v894_v32 = vld [vmem:[%s1041_s13 + $0x4] ss:$20 sps:$4 sm:$0xff]  }
  0x17   : > { %804 = vmatpush3.bf16.msra.mxu1 %v872_v11  ;;  %v895_v34 = vld [vmem:[%s1092_s1 + $0x80] sm:$0xff]   ;;  %569 = vmatprep.mubr.bf16.mxu0 %v894_v32  ;;  %v896_v35 = vld [vmem:[%s1041_s13 + $0x8] ss:$20 sps:$4 sm:$0xff]   ;;  %v904_v42 = vld [vmem:[%s1092_s1 + $0x110] sm:$0xff]  }
  0x18   : > { %805 = vmatprep.subr.bf16.mxu1 %v875_v14  ;;  %v898_v36 = vld [vmem:[%s1041_s13 + $0xc] ss:$20 sps:$4 sm:$0xff]   ;;  %v907_v45 = vld [vmem:[%s1041_s13 + $0x10] ss:$20 sps:$4 sm:$0xff]   ;;  %s728_s13 = sshll.u32 %s1096_s17, 3 }
  0x19   : > { %784 = vmatpush3.bf16.msra.mxu0 %v874_v13  ;;  %610 = vmatprep.mubr.bf16.mxu1 %v898_v36  ;;  %v901_v39 = vld [vmem:[%s1092_s1 + $0x128] sm:$0xff]   ;;  %v902_v40 = vld [vmem:[%s1092_s1 + $0x120] sm:$0xff]   ;;  %s175_s28 = scalar_lea.vmem %s1094_s3, %s728_s13 }
  0x1a   : > { %785 = vmatprep.subr.bf16.mxu0 %v877_v16  ;;  %v905_v43 = vld [vmem:[%s1092_s1 + $0x108] sm:$0xff]   ;;  %v906_v44 = vld [vmem:[%s1092_s1 + $0x100] sm:$0xff]  }
  0x1b   : > { %806 = vmatpush3.bf16.msra.mxu1 %v876_v15  ;;  %v729_v52 = vld [vmem:[%s1093_s2] ss:$0 sm:$0xff] }
  0x1c   : > { %807 = vmatprep.subr.bf16.mxu1 %v879_v18 }
  0x1d   : > { %786 = vmatpush3.bf16.msra.mxu0 %v878_v17 }
  0x1e   : > { %787 = vmatprep.subr.bf16.mxu0 %v881_v20 }
  0x1f   : > { %808 = vmatpush3.bf16.msra.mxu1 %v880_v19 }
  0x20   : > { %809 = vmatprep.subr.bf16.mxu1 %v883_v22 }
  0x21   : > { %788 = vmatpush3.bf16.msra.mxu0 %v882_v21 }
  0x22   : > { %789 = vmatprep.subr.bf16.mxu0 %v885_v24 }
  0x23   : > { %810 = vmatpush3.bf16.msra.mxu1 %v884_v23 }
  0x24   : > { %811 = vmatprep.subr.bf16.mxu1 %v887_v26 }
  0x25   : > { %790 = vmatpush3.bf16.msra.mxu0 %v886_v25 }
  0x26   : > { %791 = vmatprep.subr.bf16.mxu0 %v889_v28 }
  0x27   : > { %812 = vmatpush3.bf16.msra.mxu1 %v888_v27 }
  0x28   : > { %813 = vmatprep.subr.bf16.mxu1 %v891_v30 }
  0x29   : > { %792 = vmatpush3.bf16.msra.mxu0 %v890_v29 }
  0x2a   : > { %830 = vmatprep.subr.bf16.mxu0 %v916_v33 }
  0x2b   : > { %814 = vmatpush3.bf16.msra.mxu1 %v895_v34 }
  0x2c   : > { %570 = vmatmul.mubr.bf16.vlgmr.msra.gmra.mxu0 %v892_v31 }
  0x2d   : > { %846 = vmatprep.mubr.msk.bf16.mxu0 %vm917_vm0, %v916_v33  ;;  %831 = vmatpush3.bf16.msra.mxu0 %v899_v37 }
  0x2e   : > { %611 = vmatmul.mubr.bf16.vlgmr.msra.gmra.mxu1 %v896_v35  ;;  %832 = vmatprep.subr.bf16.mxu0 %v916_v33 }
  0x31   : > { %833 = vmatpush3.bf16.msra.mxu0 %v900_v38 }
  0x32   : > { %834 = vmatprep.subr.bf16.mxu0 %v916_v33 }
  0x35   : > { %835 = vmatpush3.bf16.msra.mxu0 %v901_v39 }
  0x36   : > { %836 = vmatprep.subr.bf16.mxu0 %v916_v33 }
  0x39   : > { %837 = vmatpush3.bf16.msra.mxu0 %v902_v40 }
  0x3a   : > { %838 = vmatprep.subr.bf16.mxu0 %v916_v33 }
  0x3d   : > { %839 = vmatpush3.bf16.msra.mxu0 %v903_v41 }
  0x3e   : > { %840 = vmatprep.subr.bf16.mxu0 %v916_v33 }
  0x41   : > { %841 = vmatpush3.bf16.msra.mxu0 %v904_v42 }
  0x42   : > { %842 = vmatprep.subr.bf16.mxu0 %v916_v33 }
  0x45   : > { %843 = vmatpush3.bf16.msra.mxu0 %v905_v43 }
  0x46   : > { %844 = vmatprep.subr.bf16.mxu0 %v916_v33 }
  0x49   : > { %845 = vmatpush3.bf16.msra.mxu0 %v906_v44 }
  0x4c   : > { %847 = vmatmul.mubr.bf16.vlgmr.msra.gmra.mxu0 %v907_v45 }
  0xec   : > { %v793_v46 = vpop.f32.mrf.mxu0 }
  0xee   : > { %v794_v47 = vpop.f32.mrf.mxu0  ;;  %v815_v48 = vpop.f32.mrf.mxu1 }
  0xef   : > { %v795_v51 = vadd.f32 %v794_v47, %v793_v46 }
  0xf0   : > { %v796_v49 = vpop.f32.mrf.mxu0  ;;  %v816_v50 = vpop.f32.mrf.mxu1 }
  0xf1   : > { %v572_v55 = vadd.f32 %v795_v51, %v729_v52  ;;  %v817_v56 = vadd.f32 %v816_v50, %v815_v48 }
  0xf2   : > { %v797_v53 = vpop.f32.mrf.mxu0  ;;  %v818_v54 = vpop.f32.mrf.mxu1 }
  0xf3   : > { %v798_v57 = vadd.f32 %v797_v53, %v796_v49  ;;  %v613_v61 = vadd.f32 %v817_v56, %v572_v55 }
  0xf4   : > { %v819_v58 = vpop.f32.mrf.mxu1 }
  0xf5   : > { %v575_v59 = vadd.f32 %v798_v57, %v729_v52  ;;  %v820_v60 = vadd.f32 %v819_v58, %v818_v54 }
  0xf7   : > { %v616_v2 = vadd.f32 %v820_v60, %v575_v59 }
 0x10c   : > { %v653_v62 = vpop.f32.mrf.mxu0 }
 0x10d   : > { %v654_v63 = vadd.f32 %v653_v62, %v613_v61 }
 0x10e   : > { %v848_v0 = vpop.f32.mrf.mxu0 }
 0x10f   : > { %v660_v1 = vmax.f32 %v654_v63, 0.0 }
 0x110   : > { %v656_v3 = vpop.f32.mrf.mxu0 }
 0x111   : > { %662 = vst [vmem:[%s175_s28] sm:$0xff] %v660_v1  ;;  %v657_v4 = vadd.f32 %v656_v3, %v616_v2 }
 0x112   : > { %v849_v5 = vpop.f32.mrf.mxu0 }
 0x113   : > { %v661_v6 = vmax.f32 %v657_v4, 0.0 }
 0x115   : > { %663 = vst [vmem:[%s175_s28 + $0x8] sm:$0xff] %v661_v6 }
 0x116 PF: > { %s13_s12 = sadd.s32 1, %s914_s12  }
 0x117   : > { %p10_p4 = scmp.ge.s32.totalorder %s13_s12, 4  }
 0x119   :  { %12 = sbr.rel (!%p10_p4) target bundleno = 1 (0x1), region = 62 }

// kernel: raft_forward.59
= control target key start
LH: loop header
LB: loop body
LE: loop exit
PB: predicated region body
PF: predicated region fallthrough
CT: control target
= control target key end

     0   :  { %s698_s12 = smov 0   ;;  %s794_s0 = inlined_call_operand.vmem [shape: bf16[32,384], index: 0, kind: input, shape index: {}]   ;;  %s795_s1 = inlined_call_operand.vmem [shape: bf16[384,128], index: 1, kind: input, shape index: {}]   ;;  %s796_s2 = inlined_call_operand.vmem [shape: f32[1,128], index: 2, kind: input, shape index: {}]   ;;  %s797_s3 = inlined_call_operand.vmem [shape: f32[32,128], index: 3, kind: output, shape index: {}]  }
   0x1 LB: > { %s539_s13 = sadd.s32 4294967295, %s674_s12   ;;  %p543_p0 = scmp.ge.s32.totalorder %s674_s12, 1  ;;  %s674_s12 = sphi %s698_s12, %s13_s12  }
   0x2   : > { %p139_p1 = scmp.lt.s32.totalorder %s674_s12, 3 }
   0x4   : > { %p140_p2 = pnand %p543_p0, %p139_p1 }
   0x5   : > { %s544_s30 = sshll.u32 (!%p140_p2), %s539_s13, 1 }
   0x6   : > { %143 = sbr.rel (%p140_p2) target bundleno = 252 (0xfc), region = 32  ;;  %p165_p3 = scmp.lt.s32.totalorder (!%p140_p2), %s544_s30, 3 }
   0xb   : > { %v640_v0 = vld [vmem:[%s795_s1 + $0x78] sm:$0xff]   ;;  %v676_v1 = vmov 0.0   ;;  %v643_v4 = vld [vmem:[%s795_s1 + $0x70] sm:$0xff]   ;;  %vm677_vm0 = vmmov 0   ;;  %v646_v7 = vld [vmem:[%s795_s1 + $0x68] sm:$0xff]   ;;  %s799_s30 = smov (!%p165_p3, %s544_s30), 3 }
   0xc   : > { %609 = vmatprep.subr.bf16.mxu1 %v676_v1  ;;  %v641_v2 = vld [vmem:[%s795_s1 + $0x38] sm:$0xff]   ;;  %578 = vmatprep.subr.bf16.mxu0 %v640_v0  ;;  %v644_v5 = vld [vmem:[%s795_s1 + $0x30] sm:$0xff]   ;;  %v647_v8 = vld [vmem:[%s795_s1 + $0x28] sm:$0xff]   ;;  %s629_s23 = smul.u32 12, %s799_s30  ;;  %s547_s18 = sshll.u32 %s799_s30, 3 }
   0xd   : > { %v642_v3 = vld [vmem:[%s795_s1 + $0xb8] sm:$0xff]   ;;  %579 = vmatpush3.bf16.msra.mxu0 %v641_v2  ;;  %625 = vmatprep.mubr.msk.bf16.mxu1 %vm677_vm0, %v676_v1  ;;  %v645_v6 = vld [vmem:[%s795_s1 + $0xb0] sm:$0xff]   ;;  %v648_v9 = vld [vmem:[%s795_s1 + $0xa8] sm:$0xff]   ;;  %s175_s21 = scalar_lea.vmem %s797_s3, %s547_s18 }
   0xe   : > { %610 = vmatpush3.bf16.msra.mxu1 %v642_v3  ;;  %580 = vmatprep.subr.bf16.mxu0 %v643_v4  ;;  %v649_v10 = vld [vmem:[%s795_s1 + $0x60] sm:$0xff]   ;;  %v652_v13 = vld [vmem:[%s795_s1 + $0x58] sm:$0xff]   ;;  %v655_v16 = vld [vmem:[%s795_s1 + $0x50] sm:$0xff]   ;;  %s169_s6 = scalar_lea.vmem %s794_s0, %s629_s23 }
   0xf   : > { %611 = vmatprep.subr.bf16.mxu1 %v676_v1  ;;  %v650_v11 = vld [vmem:[%s795_s1 + $0x20] sm:$0xff]   ;;  %v653_v14 = vld [vmem:[%s795_s1 + $0x18] sm:$0xff]   ;;  %v656_v17 = vld [vmem:[%s795_s1 + $0x10] sm:$0xff]  }
  0x10   : > { %v651_v12 = vld [vmem:[%s795_s1 + $0xa0] sm:$0xff]   ;;  %v654_v15 = vld [vmem:[%s795_s1 + $0x98] sm:$0xff]   ;;  %v657_v18 = vld [vmem:[%s795_s1 + $0x90] sm:$0xff]  }
  0x11   : > { %581 = vmatpush3.bf16.msra.mxu0 %v644_v5  ;;  %v658_v19 = vld [vmem:[%s795_s1 + $0x48] sm:$0xff]   ;;  %v661_v22 = vld [vmem:[%s795_s1 + $0x40] sm:$0xff]  }
  0x12   : > { %612 = vmatpush3.bf16.msra.mxu1 %v645_v6  ;;  %582 = vmatprep.subr.bf16.mxu0 %v646_v7  ;;  %v659_v20 = vld [vmem:[%s795_s1 + $0x8] sm:$0xff]   ;;  %v666_v23 = vld [vmem:[%s169_s6 + $0x4] ss:$12 sps:$4 sm:$0xff]   ;;  %v548_v30 = vld [vmem:[%s796_s2] ss:$0 sm:$0xff] }
  0x13   : > { %613 = vmatprep.subr.bf16.mxu1 %v676_v1  ;;  %v660_v21 = vld [vmem:[%s795_s1 + $0x88] sm:$0xff]   ;;  %v662_v24 = vld [vmem:[%s795_s1] sm:$0xff]   ;;  %429 = vmatprep.mubr.bf16.mxu0 %v666_v23 }
  0x14   : > { %v663_v25 = vld [vmem:[%s795_s1 + $0x80] sm:$0xff]   ;;  %v667_v27 = vld [vmem:[%s169_s6 + $0x8] ss:$12 sps:$4 sm:$0xff]  }
  0x15   : > { %583 = vmatpush3.bf16.msra.mxu0 %v647_v8  ;;  %v664_v26 = vld [vmem:[%s169_s6] ss:$12 sps:$4 sm:$0xff]  }
  0x16   : > { %614 = vmatpush3.bf16.msra.mxu1 %v648_v9  ;;  %584 = vmatprep.subr.bf16.mxu0 %v649_v10 }
  0x17   : > { %615 = vmatprep.subr.bf16.mxu1 %v676_v1 }
  0x19   : > { %585 = vmatpush3.bf16.msra.mxu0 %v650_v11 }
  0x1a   : > { %616 = vmatpush3.bf16.msra.mxu1 %v651_v12  ;;  %586 = vmatprep.subr.bf16.mxu0 %v652_v13 }
  0x1b   : > { %617 = vmatprep.subr.bf16.mxu1 %v676_v1 }
  0x1d   : > { %587 = vmatpush3.bf16.msra.mxu0 %v653_v14 }
  0x1e   : > { %618 = vmatpush3.bf16.msra.mxu1 %v654_v15  ;;  %588 = vmatprep.subr.bf16.mxu0 %v655_v16 }
  0x1f   : > { %619 = vmatprep.subr.bf16.mxu1 %v676_v1 }
  0x21   : > { %589 = vmatpush3.bf16.msra.mxu0 %v656_v17 }
  0x22   : > { %620 = vmatpush3.bf16.msra.mxu1 %v657_v18  ;;  %590 = vmatprep.subr.bf16.mxu0 %v658_v19 }
  0x23   : > { %621 = vmatprep.subr.bf16.mxu1 %v676_v1 }
  0x25   : > { %591 = vmatpush3.bf16.msra.mxu0 %v659_v20 }
  0x26   : > { %622 = vmatpush3.bf16.msra.mxu1 %v660_v21  ;;  %592 = vmatprep.subr.bf16.mxu0 %v661_v22 }
  0x27   : > { %623 = vmatprep.subr.bf16.mxu1 %v676_v1 }
  0x29   : > { %593 = vmatpush3.bf16.msra.mxu0 %v662_v24 }
  0x2a   : > { %624 = vmatpush3.bf16.msra.mxu1 %v663_v25 }
  0x2c   : > { %430 = vmatmul.mubr.bf16.vlgmr.msra.gmra.mxu0 %v664_v26 }
  0x2d   : > { %626 = vmatmul.mubr.bf16.vlgmr.msra.gmra.mxu1 %v667_v27 }
  0xec   : > { %v594_v28 = vpop.f32.mrf.mxu0 }
  0xed   : > { %v472_v29 = vpop.f32.mrf.mxu1 }
  0xee   : > { %v595_v31 = vpop.f32.mrf.mxu0 }
  0xef   : > { %v596_v32 = vadd.f32 %v595_v31, %v594_v28  ;;  %v627_v33 = vpop.f32.mrf.mxu1 }
  0xf0   : > { %v597_v34 = vpop.f32.mrf.mxu0 }
  0xf1   : > { %v432_v35 = vadd.f32 %v596_v32, %v548_v30  ;;  %v475_v36 = vpop.f32.mrf.mxu1 }
  0xf2   : > { %v598_v37 = vpop.f32.mrf.mxu0 }
  0xf3   : > { %v473_v38 = vadd.f32 %v472_v29, %v432_v35  ;;  %v599_v39 = vadd.f32 %v598_v37, %v597_v34  ;;  %v628_v40 = vpop.f32.mrf.mxu1 }
  0xf5   : > { %v479_v41 = vmax.f32 %v473_v38, 0.0  ;;  %v435_v42 = vadd.f32 %v599_v39, %v548_v30 }
  0xf7   : > { %481 = vst [vmem:[%s175_s21] sm:$0xff] %v479_v41  ;;  %v476_v43 = vadd.f32 %v475_v36, %v435_v42 }
  0xf9   : > { %v480_v44 = vmax.f32 %v476_v43, 0.0 }
  0xfb   : > { %482 = vst [vmem:[%s175_s21 + $0x8] sm:$0xff] %v480_v44 }
  0xfc PF: > { %s13_s12 = sadd.s32 1, %s674_s12  }
  0xfd   : > { %p10_p4 = scmp.ge.s32.totalorder %s13_s12, 4  }
  0xff   :  { %12 = sbr.rel (!%p10_p4) target bundleno = 1 (0x1), region = 62 }

// kernel: raft_forward.61
= control target key start
LH: loop header
LB: loop body
LE: loop exit
PB: predicated region body
PF: predicated region fallthrough
CT: control target
= control target key end

     0   :  { %s795_s12 = smov 0   ;;  %s917_s0 = inlined_call_operand.vmem [shape: bf16[32,512], index: 0, kind: input, shape index: {}]   ;;  %s918_s1 = inlined_call_operand.vmem [shape: bf16[512,128], index: 1, kind: input, shape index: {}]   ;;  %s919_s2 = inlined_call_operand.vmem [shape: f32[1,128], index: 2, kind: input, shape index: {}]   ;;  %s920_s3 = inlined_call_operand.vmem [shape: f32[32,128], index: 3, kind: output, shape index: {}]  }
   0x1 LB: > { %s617_s13 = sadd.s32 4294967295, %s773_s12   ;;  %p621_p0 = scmp.ge.s32.totalorder %s773_s12, 1  ;;  %s773_s12 = sphi %s795_s12, %s13_s12  }
   0x2   : > { %p139_p1 = scmp.lt.s32.totalorder %s773_s12, 3 }
   0x4   : > { %p140_p2 = pnand %p621_p0, %p139_p1 }
   0x5   : > { %s622_s21 = sshll.u32 (!%p140_p2), %s617_s13, 1 }
   0x6   : > { %143 = sbr.rel (%p140_p2) target bundleno = 283 (0x11b), region = 32  ;;  %p165_p3 = scmp.lt.s32.totalorder (!%p140_p2), %s622_s21, 3 }
   0xb   : > { %v721_v0 = vld [vmem:[%s918_s1 + $0x78] sm:$0xff]   ;;  %v725_v4 = vld [vmem:[%s918_s1 + $0x70] sm:$0xff]   ;;  %v729_v8 = vld [vmem:[%s918_s1 + $0x68] sm:$0xff]   ;;  %s922_s21 = smov (!%p165_p3, %s622_s21), 3 }
   0xc   : > { %v722_v1 = vld [vmem:[%s918_s1 + $0xf8] sm:$0xff]   ;;  %669 = vmatprep.subr.bf16.mxu0 %v721_v0  ;;  %v726_v5 = vld [vmem:[%s918_s1 + $0xf0] sm:$0xff]   ;;  %v730_v9 = vld [vmem:[%s918_s1 + $0xe8] sm:$0xff]   ;;  %s668_s18 = sshll.u32 %s922_s21, 4  ;;  %s626_s7 = sshll.u32 %s922_s21, 3 }
   0xd   : > { %v723_v2 = vld [vmem:[%s918_s1 + $0x38] sm:$0xff]   ;;  %691 = vmatprep.subr.bf16.mxu1 %v722_v1  ;;  %v727_v6 = vld [vmem:[%s918_s1 + $0x30] sm:$0xff]   ;;  %v731_v10 = vld [vmem:[%s918_s1 + $0x28] sm:$0xff]   ;;  %s169_s28 = scalar_lea.vmem %s917_s0, %s668_s18  ;;  %s175_s10 = scalar_lea.vmem %s920_s3, %s626_s7 }
   0xe   : > { %v724_v3 = vld [vmem:[%s918_s1 + $0xb8] sm:$0xff]   ;;  %670 = vmatpush3.bf16.msra.mxu0 %v723_v2  ;;  %v728_v7 = vld [vmem:[%s918_s1 + $0xb0] sm:$0xff]   ;;  %v732_v11 = vld [vmem:[%s918_s1 + $0xa8] sm:$0xff]  }
   0xf   : > { %692 = vmatpush3.bf16.msra.mxu1 %v724_v3  ;;  %671 = vmatprep.subr.bf16.mxu0 %v725_v4  ;;  %v733_v12 = vld [vmem:[%s918_s1 + $0x60] sm:$0xff]   ;;  %v737_v16 = vld [vmem:[%s918_s1 + $0x58] sm:$0xff]   ;;  %v741_v20 = vld [vmem:[%s918_s1 + $0x50] sm:$0xff]  }
  0x10   : > { %693 = vmatprep.subr.bf16.mxu1 %v726_v5  ;;  %v734_v13 = vld [vmem:[%s918_s1 + $0xe0] sm:$0xff]   ;;  %v738_v17 = vld [vmem:[%s918_s1 + $0xd8] sm:$0xff]   ;;  %v742_v21 = vld [vmem:[%s918_s1 + $0xd0] sm:$0xff]  }
  0x11   : > { %v735_v14 = vld [vmem:[%s918_s1 + $0x20] sm:$0xff]   ;;  %v739_v18 = vld [vmem:[%s918_s1 + $0x18] sm:$0xff]   ;;  %v743_v22 = vld [vmem:[%s918_s1 + $0x10] sm:$0xff]  }
  0x12   : > { %672 = vmatpush3.bf16.msra.mxu0 %v727_v6  ;;  %v736_v15 = vld [vmem:[%s918_s1 + $0xa0] sm:$0xff]   ;;  %v740_v19 = vld [vmem:[%s918_s1 + $0x98] sm:$0xff]   ;;  %v744_v23 = vld [vmem:[%s918_s1 + $0x90] sm:$0xff]  }
  0x13   : > { %694 = vmatpush3.bf16.msra.mxu1 %v728_v7  ;;  %673 = vmatprep.subr.bf16.mxu0 %v729_v8  ;;  %v745_v24 = vld [vmem:[%s918_s1 + $0x48] sm:$0xff]   ;;  %v749_v28 = vld [vmem:[%s918_s1 + $0x40] sm:$0xff]  }
  0x14   : > { %695 = vmatprep.subr.bf16.mxu1 %v730_v9  ;;  %v746_v25 = vld [vmem:[%s918_s1 + $0xc8] sm:$0xff]   ;;  %v750_v29 = vld [vmem:[%s918_s1 + $0xc0] sm:$0xff]  }
  0x15   : > { %v747_v26 = vld [vmem:[%s918_s1 + $0x8] sm:$0xff]   ;;  %v751_v30 = vld [vmem:[%s918_s1] sm:$0xff]  }
  0x16   : > { %674 = vmatpush3.bf16.msra.mxu0 %v731_v10  ;;  %v748_v27 = vld [vmem:[%s918_s1 + $0x88] sm:$0xff]   ;;  %v752_v31 = vld [vmem:[%s918_s1 + $0x80] sm:$0xff]  }
  0x17   : > { %696 = vmatpush3.bf16.msra.mxu1 %v732_v11  ;;  %675 = vmatprep.subr.bf16.mxu0 %v733_v12  ;;  %v753_v32 = vld [vmem:[%s169_s28] ss:$16 sps:$4 sm:$0xff]   ;;  %v755_v33 = vld [vmem:[%s169_s28 + $0x4] ss:$16 sps:$4 sm:$0xff]   ;;  %v756_v34 = vld [vmem:[%s169_s28 + $0x8] ss:$16 sps:$4 sm:$0xff]  }
  0x18   : > { %697 = vmatprep.subr.bf16.mxu1 %v734_v13  ;;  %v758_v35 = vld [vmem:[%s169_s28 + $0xc] ss:$16 sps:$4 sm:$0xff]   ;;  %497 = vmatprep.mubr.bf16.mxu0 %v755_v33  ;;  %v627_v38 = vld [vmem:[%s919_s2] ss:$0 sm:$0xff] }
  0x19   : > { %538 = vmatprep.mubr.bf16.mxu1 %v758_v35 }
  0x1a   : > { %676 = vmatpush3.bf16.msra.mxu0 %v735_v14 }
  0x1b   : > { %698 = vmatpush3.bf16.msra.mxu1 %v736_v15  ;;  %677 = vmatprep.subr.bf16.mxu0 %v737_v16 }
  0x1c   : > { %699 = vmatprep.subr.bf16.mxu1 %v738_v17 }
  0x1e   : > { %678 = vmatpush3.bf16.msra.mxu0 %v739_v18 }
  0x1f   : > { %700 = vmatpush3.bf16.msra.mxu1 %v740_v19  ;;  %679 = vmatprep.subr.bf16.mxu0 %v741_v20 }
  0x20   : > { %701 = vmatprep.subr.bf16.mxu1 %v742_v21 }
  0x22   : > { %680 = vmatpush3.bf16.msra.mxu0 %v743_v22 }
  0x23   : > { %702 = vmatpush3.bf16.msra.mxu1 %v744_v23  ;;  %681 = vmatprep.subr.bf16.mxu0 %v745_v24 }
  0x24   : > { %703 = vmatprep.subr.bf16.mxu1 %v746_v25 }
  0x26   : > { %682 = vmatpush3.bf16.msra.mxu0 %v747_v26 }
  0x27   : > { %704 = vmatpush3.bf16.msra.mxu1 %v748_v27  ;;  %683 = vmatprep.subr.bf16.mxu0 %v749_v28 }
  0x28   : > { %705 = vmatprep.subr.bf16.mxu1 %v750_v29 }
  0x2a   : > { %684 = vmatpush3.bf16.msra.mxu0 %v751_v30 }
  0x2b   : > { %706 = vmatpush3.bf16.msra.mxu1 %v752_v31 }
  0x2d   : > { %498 = vmatmul.mubr.bf16.vlgmr.msra.gmra.mxu0 %v753_v32 }
  0x2e   : > { %539 = vmatmul.mubr.bf16.vlgmr.msra.gmra.mxu1 %v756_v34 }
  0xed   : > { %v685_v36 = vpop.f32.mrf.mxu0 }
  0xee   : > { %v707_v37 = vpop.f32.mrf.mxu1 }
  0xef   : > { %v686_v39 = vpop.f32.mrf.mxu0 }
  0xf0   : > { %v687_v40 = vadd.f32 %v686_v39, %v685_v36  ;;  %v708_v41 = vpop.f32.mrf.mxu1 }
  0xf1   : > { %v688_v42 = vpop.f32.mrf.mxu0  ;;  %v709_v44 = vadd.f32 %v708_v41, %v707_v37 }
  0xf2   : > { %v500_v43 = vadd.f32 %v687_v40, %v627_v38  ;;  %v710_v45 = vpop.f32.mrf.mxu1 }
  0xf3   : > { %v689_v46 = vpop.f32.mrf.mxu0 }
  0xf4   : > { %v541_v47 = vadd.f32 %v709_v44, %v500_v43  ;;  %v690_v48 = vadd.f32 %v689_v46, %v688_v42  ;;  %v711_v49 = vpop.f32.mrf.mxu1 }
  0xf5   : > { %v712_v52 = vadd.f32 %v711_v49, %v710_v45 }
  0xf6   : > { %v664_v50 = vmul.f32 -1.442695, %v541_v47  ;;  %v503_v51 = vadd.f32 %v690_v48, %v627_v38 }
  0xf8   : > { %759 = vpow2.f32 %v664_v50  ;;  %v544_v53 = vadd.f32 %v712_v52, %v503_v51 }
  0xfa   : > { %v665_v54 = vmul.f32 -1.442695, %v544_v53 }
  0xfc   : > { %761 = vpow2.f32 %v665_v54 }
 0x105   : > { %v760_v55 = vpop.eup %759 }
 0x106   : > { %v553_v56 = vadd.f32 1.0, %v760_v55 }
 0x108   : > { %763 = vrcp.f32 %v553_v56 }
 0x109   : > { %v762_v57 = vpop.eup %761 }
 0x10a   : > { %v554_v58 = vadd.f32 1.0, %v762_v57 }
 0x10c   : > { %765 = vrcp.f32 %v554_v58 }
 0x115   : > { %v764_v59 = vpop.eup %763 }
 0x116   : > { %559 = vst [vmem:[%s175_s10] sm:$0xff] %v764_v59 }
 0x119   : > { %v766_v60 = vpop.eup %765 }
 0x11a   : > { %560 = vst [vmem:[%s175_s10 + $0x8] sm:$0xff] %v766_v60 }
 0x11b PF: > { %s13_s12 = sadd.s32 1, %s773_s12  }
 0x11c   : > { %p10_p4 = scmp.ge.s32.totalorder %s13_s12, 4  }
 0x11e   :  { %12 = sbr.rel (!%p10_p4) target bundleno = 1 (0x1), region = 62 }

// kernel: raft_forward.63
= control target key start
LH: loop header
LB: loop body
LE: loop exit
PB: predicated region body
PF: predicated region fallthrough
CT: control target
= control target key end

     0   :  { %s58_s0 = inlined_call_operand.vmem [shape: f32[8,128], index: 0, kind: input, shape index: {}]   ;;  %s59_s1 = inlined_call_operand.vmem [shape: f32[8,128], index: 1, kind: input, shape index: {}]   ;;  %s60_s2 = inlined_call_operand.vmem [shape: f32[8,128], index: 2, kind: input, shape index: {}]   ;;  %s61_s3 = inlined_call_operand.vmem [shape: f32[8,128], index: 3, kind: output, shape index: {}]  }
   0x1   :  { %v14_v0 = vld [vmem:[%s58_s0] sm:$0xff] }
   0x2   :  { %v16_v1 = vld [vmem:[%s60_s2] sm:$0xff]  ;;  %v15_v3 = vsub.f32 1.0, %v14_v0 }
   0x3   :  { %v18_v2 = vld [vmem:[%s59_s1] sm:$0xff] }
   0x4   :  { %v19_v4 = vmul.f32 %v18_v2, %v14_v0  ;;  %v17_v5 = vmul.f32 %v16_v1, %v15_v3 }
   0x6   :  { %v20_v6 = vadd.f32 %v19_v4, %v17_v5 }
   0x8   :  { %21 = vst [vmem:[%s61_s3] sm:$0xff] %v20_v6 }

// kernel: raft_forward.62
= control target key start
LH: loop header
LB: loop body
LE: loop exit
PB: predicated region body
PF: predicated region fallthrough
CT: control target
= control target key end

     0   :  { %s779_s12 = smov 0   ;;  %s901_s0 = inlined_call_operand.vmem [shape: bf16[32,512], index: 0, kind: input, shape index: {}]   ;;  %s902_s1 = inlined_call_operand.vmem [shape: bf16[512,128], index: 1, kind: input, shape index: {}]   ;;  %s903_s2 = inlined_call_operand.vmem [shape: f32[1,128], index: 2, kind: input, shape index: {}]   ;;  %s904_s3 = inlined_call_operand.vmem [shape: f32[32,128], index: 3, kind: output, shape index: {}]  }
   0x1 LB: > { %s607_s13 = sadd.s32 4294967295, %s757_s12   ;;  %p611_p0 = scmp.ge.s32.totalorder %s757_s12, 1  ;;  %s757_s12 = sphi %s779_s12, %s13_s12  }
   0x2   : > { %p139_p1 = scmp.lt.s32.totalorder %s757_s12, 3 }
   0x4   : > { %p140_p2 = pnand %p611_p0, %p139_p1 }
   0x5   : > { %s612_s21 = sshll.u32 (!%p140_p2), %s607_s13, 1 }
   0x6   : > { %143 = sbr.rel (%p140_p2) target bundleno = 265 (0x109), region = 32  ;;  %p165_p3 = scmp.lt.s32.totalorder (!%p140_p2), %s612_s21, 3 }
   0xb   : > { %v709_v0 = vld [vmem:[%s902_s1 + $0x78] sm:$0xff]   ;;  %v713_v4 = vld [vmem:[%s902_s1 + $0x70] sm:$0xff]   ;;  %v717_v8 = vld [vmem:[%s902_s1 + $0x68] sm:$0xff]   ;;  %s906_s21 = smov (!%p165_p3, %s612_s21), 3 }
   0xc   : > { %v710_v1 = vld [vmem:[%s902_s1 + $0xf8] sm:$0xff]   ;;  %657 = vmatprep.subr.bf16.mxu0 %v709_v0  ;;  %v714_v5 = vld [vmem:[%s902_s1 + $0xf0] sm:$0xff]   ;;  %v718_v9 = vld [vmem:[%s902_s1 + $0xe8] sm:$0xff]   ;;  %s656_s18 = sshll.u32 %s906_s21, 4  ;;  %s616_s7 = sshll.u32 %s906_s21, 3 }
   0xd   : > { %v711_v2 = vld [vmem:[%s902_s1 + $0x38] sm:$0xff]   ;;  %679 = vmatprep.subr.bf16.mxu1 %v710_v1  ;;  %v715_v6 = vld [vmem:[%s902_s1 + $0x30] sm:$0xff]   ;;  %v719_v10 = vld [vmem:[%s902_s1 + $0x28] sm:$0xff]   ;;  %s169_s28 = scalar_lea.vmem %s901_s0, %s656_s18  ;;  %s175_s10 = scalar_lea.vmem %s904_s3, %s616_s7 }
   0xe   : > { %v712_v3 = vld [vmem:[%s902_s1 + $0xb8] sm:$0xff]   ;;  %658 = vmatpush3.bf16.msra.mxu0 %v711_v2  ;;  %v716_v7 = vld [vmem:[%s902_s1 + $0xb0] sm:$0xff]   ;;  %v720_v11 = vld [vmem:[%s902_s1 + $0xa8] sm:$0xff]  }
   0xf   : > { %680 = vmatpush3.bf16.msra.mxu1 %v712_v3  ;;  %659 = vmatprep.subr.bf16.mxu0 %v713_v4  ;;  %v721_v12 = vld [vmem:[%s902_s1 + $0x60] sm:$0xff]   ;;  %v725_v16 = vld [vmem:[%s902_s1 + $0x58] sm:$0xff]   ;;  %v729_v20 = vld [vmem:[%s902_s1 + $0x50] sm:$0xff]  }
  0x10   : > { %681 = vmatprep.subr.bf16.mxu1 %v714_v5  ;;  %v722_v13 = vld [vmem:[%s902_s1 + $0xe0] sm:$0xff]   ;;  %v726_v17 = vld [vmem:[%s902_s1 + $0xd8] sm:$0xff]   ;;  %v730_v21 = vld [vmem:[%s902_s1 + $0xd0] sm:$0xff]  }
  0x11   : > { %v723_v14 = vld [vmem:[%s902_s1 + $0x20] sm:$0xff]   ;;  %v727_v18 = vld [vmem:[%s902_s1 + $0x18] sm:$0xff]   ;;  %v731_v22 = vld [vmem:[%s902_s1 + $0x10] sm:$0xff]  }
  0x12   : > { %660 = vmatpush3.bf16.msra.mxu0 %v715_v6  ;;  %v724_v15 = vld [vmem:[%s902_s1 + $0xa0] sm:$0xff]   ;;  %v728_v19 = vld [vmem:[%s902_s1 + $0x98] sm:$0xff]   ;;  %v732_v23 = vld [vmem:[%s902_s1 + $0x90] sm:$0xff]  }
  0x13   : > { %682 = vmatpush3.bf16.msra.mxu1 %v716_v7  ;;  %661 = vmatprep.subr.bf16.mxu0 %v717_v8  ;;  %v733_v24 = vld [vmem:[%s902_s1 + $0x48] sm:$0xff]   ;;  %v737_v28 = vld [vmem:[%s902_s1 + $0x40] sm:$0xff]  }
  0x14   : > { %683 = vmatprep.subr.bf16.mxu1 %v718_v9  ;;  %v734_v25 = vld [vmem:[%s902_s1 + $0xc8] sm:$0xff]   ;;  %v738_v29 = vld [vmem:[%s902_s1 + $0xc0] sm:$0xff]  }
  0x15   : > { %v735_v26 = vld [vmem:[%s902_s1 + $0x8] sm:$0xff]   ;;  %v739_v30 = vld [vmem:[%s902_s1] sm:$0xff]  }
  0x16   : > { %662 = vmatpush3.bf16.msra.mxu0 %v719_v10  ;;  %v736_v27 = vld [vmem:[%s902_s1 + $0x88] sm:$0xff]   ;;  %v740_v31 = vld [vmem:[%s902_s1 + $0x80] sm:$0xff]  }
  0x17   : > { %684 = vmatpush3.bf16.msra.mxu1 %v720_v11  ;;  %663 = vmatprep.subr.bf16.mxu0 %v721_v12  ;;  %v741_v32 = vld [vmem:[%s169_s28] ss:$16 sps:$4 sm:$0xff]   ;;  %v743_v33 = vld [vmem:[%s169_s28 + $0x4] ss:$16 sps:$4 sm:$0xff]   ;;  %v744_v34 = vld [vmem:[%s169_s28 + $0x8] ss:$16 sps:$4 sm:$0xff]  }
  0x18   : > { %685 = vmatprep.subr.bf16.mxu1 %v722_v13  ;;  %v746_v35 = vld [vmem:[%s169_s28 + $0xc] ss:$16 sps:$4 sm:$0xff]   ;;  %497 = vmatprep.mubr.bf16.mxu0 %v743_v33  ;;  %v617_v38 = vld [vmem:[%s903_s2] ss:$0 sm:$0xff] }
  0x19   : > { %538 = vmatprep.mubr.bf16.mxu1 %v746_v35 }
  0x1a   : > { %664 = vmatpush3.bf16.msra.mxu0 %v723_v14 }
  0x1b   : > { %686 = vmatpush3.bf16.msra.mxu1 %v724_v15  ;;  %665 = vmatprep.subr.bf16.mxu0 %v725_v16 }
  0x1c   : > { %687 = vmatprep.subr.bf16.mxu1 %v726_v17 }
  0x1e   : > { %666 = vmatpush3.bf16.msra.mxu0 %v727_v18 }
  0x1f   : > { %688 = vmatpush3.bf16.msra.mxu1 %v728_v19  ;;  %667 = vmatprep.subr.bf16.mxu0 %v729_v20 }
  0x20   : > { %689 = vmatprep.subr.bf16.mxu1 %v730_v21 }
  0x22   : > { %668 = vmatpush3.bf16.msra.mxu0 %v731_v22 }
  0x23   : > { %690 = vmatpush3.bf16.msra.mxu1 %v732_v23  ;;  %669 = vmatprep.subr.bf16.mxu0 %v733_v24 }
  0x24   : > { %691 = vmatprep.subr.bf16.mxu1 %v734_v25 }
  0x26   : > { %670 = vmatpush3.bf16.msra.mxu0 %v735_v26 }
  0x27   : > { %692 = vmatpush3.bf16.msra.mxu1 %v736_v27  ;;  %671 = vmatprep.subr.bf16.mxu0 %v737_v28 }
  0x28   : > { %693 = vmatprep.subr.bf16.mxu1 %v738_v29 }
  0x2a   : > { %672 = vmatpush3.bf16.msra.mxu0 %v739_v30 }
  0x2b   : > { %694 = vmatpush3.bf16.msra.mxu1 %v740_v31 }
  0x2d   : > { %498 = vmatmul.mubr.bf16.vlgmr.msra.gmra.mxu0 %v741_v32 }
  0x2e   : > { %539 = vmatmul.mubr.bf16.vlgmr.msra.gmra.mxu1 %v744_v34 }
  0xed   : > { %v673_v36 = vpop.f32.mrf.mxu0 }
  0xee   : > { %v695_v37 = vpop.f32.mrf.mxu1 }
  0xef   : > { %v674_v39 = vpop.f32.mrf.mxu0 }
  0xf0   : > { %v675_v40 = vadd.f32 %v674_v39, %v673_v36  ;;  %v696_v41 = vpop.f32.mrf.mxu1 }
  0xf1   : > { %v676_v42 = vpop.f32.mrf.mxu0  ;;  %v697_v44 = vadd.f32 %v696_v41, %v695_v37 }
  0xf2   : > { %v500_v43 = vadd.f32 %v675_v40, %v617_v38  ;;  %v698_v45 = vpop.f32.mrf.mxu1 }
  0xf3   : > { %v677_v46 = vpop.f32.mrf.mxu0 }
  0xf4   : > { %v541_v47 = vadd.f32 %v697_v44, %v500_v43  ;;  %v678_v48 = vadd.f32 %v677_v46, %v676_v42  ;;  %v699_v49 = vpop.f32.mrf.mxu1 }
  0xf5   : > { %v700_v51 = vadd.f32 %v699_v49, %v698_v45 }
  0xf6   : > { %747 = vtanh.f32 %v541_v47  ;;  %v503_v50 = vadd.f32 %v678_v48, %v617_v38 }
  0xf8   : > { %v544_v52 = vadd.f32 %v700_v51, %v503_v50 }
  0xfa   : > { %749 = vtanh.f32 %v544_v52 }
 0x103   : > { %v748_v53 = vpop.eup %747 }
 0x104   : > { %549 = vst [vmem:[%s175_s10] sm:$0xff] %v748_v53 }
 0x107   : > { %v750_v54 = vpop.eup %749 }
 0x108   : > { %550 = vst [vmem:[%s175_s10 + $0x8] sm:$0xff] %v750_v54 }
 0x109 PF: > { %s13_s12 = sadd.s32 1, %s757_s12  }
 0x10a   : > { %p10_p4 = scmp.ge.s32.totalorder %s13_s12, 4  }
 0x10c   :  { %12 = sbr.rel (!%p10_p4) target bundleno = 1 (0x1), region = 62 }

// kernel: raft_forward.68
= control target key start
LH: loop header
LB: loop body
LE: loop exit
PB: predicated region body
PF: predicated region fallthrough
CT: control target
= control target key end

     0   :  { %s936_s12 = smov 0   ;;  %s1089_s0 = inlined_call_operand.vmem [shape: bf16[32,640], index: 0, kind: input, shape index: {}]   ;;  %s1090_s1 = inlined_call_operand.vmem [shape: bf16[640,128], index: 1, kind: input, shape index: {}]   ;;  %s1091_s2 = inlined_call_operand.vmem [shape: f32[1,128], index: 2, kind: input, shape index: {}]   ;;  %s1092_s3 = inlined_call_operand.vmem [shape: f32[32,128], index: 3, kind: output, shape index: {}]  }
   0x1 LB: > { %s718_s13 = sadd.s32 4294967295, %s912_s12   ;;  %p722_p0 = scmp.ge.s32.totalorder %s912_s12, 1  ;;  %s912_s12 = sphi %s936_s12, %s13_s12  }
   0x2   : > { %p139_p1 = scmp.lt.s32.totalorder %s912_s12, 3 }
   0x4   : > { %p140_p2 = pnand %p722_p0, %p139_p1 }
   0x5   : > { %s723_s17 = sshll.u32 (!%p140_p2), %s718_s13, 1 }
   0x6   : > { %143 = sbr.rel (%p140_p2) target bundleno = 276 (0x114), region = 32  ;;  %p165_p3 = scmp.lt.s32.totalorder (!%p140_p2), %s723_s17, 3 }
   0xb   : > { %v859_v0 = vld [vmem:[%s1090_s1 + $0x78] sm:$0xff]   ;;  %v863_v4 = vld [vmem:[%s1090_s1 + $0x70] sm:$0xff]   ;;  %v867_v8 = vld [vmem:[%s1090_s1 + $0x68] sm:$0xff]   ;;  %s1094_s17 = smov (!%p165_p3, %s723_s17), 3  ;;  %v914_v33 = vmov 0.0   ;;  %vm915_vm0 = vmmov 0  }
   0xc   : > { %v860_v1 = vld [vmem:[%s1090_s1 + $0x38] sm:$0xff]   ;;  %775 = vmatprep.subr.bf16.mxu0 %v859_v0  ;;  %v864_v5 = vld [vmem:[%s1090_s1 + $0x30] sm:$0xff]   ;;  %v868_v9 = vld [vmem:[%s1090_s1 + $0x28] sm:$0xff]   ;;  %s848_s14 = smul.u32 20, %s1094_s17 }
   0xd   : > { %v861_v2 = vld [vmem:[%s1090_s1 + $0xf8] sm:$0xff]   ;;  %776 = vmatpush3.bf16.msra.mxu0 %v860_v1  ;;  %v865_v6 = vld [vmem:[%s1090_s1 + $0xf0] sm:$0xff]   ;;  %v869_v10 = vld [vmem:[%s1090_s1 + $0xe8] sm:$0xff]  }
   0xe   : > { %v862_v3 = vld [vmem:[%s1090_s1 + $0xb8] sm:$0xff]   ;;  %797 = vmatprep.subr.bf16.mxu1 %v861_v2  ;;  %777 = vmatprep.subr.bf16.mxu0 %v863_v4  ;;  %v866_v7 = vld [vmem:[%s1090_s1 + $0xb0] sm:$0xff]   ;;  %v870_v11 = vld [vmem:[%s1090_s1 + $0xa8] sm:$0xff]   ;;  %s1039_s13 = scalar_lea.vmem %s1089_s0, %s848_s14 }
   0xf   : > { %798 = vmatpush3.bf16.msra.mxu1 %v862_v3  ;;  %v871_v12 = vld [vmem:[%s1090_s1 + $0x60] sm:$0xff]   ;;  %v875_v16 = vld [vmem:[%s1090_s1 + $0x58] sm:$0xff]   ;;  %v879_v20 = vld [vmem:[%s1090_s1 + $0x50] sm:$0xff]  }
  0x10   : > { %799 = vmatprep.subr.bf16.mxu1 %v865_v6  ;;  %v872_v13 = vld [vmem:[%s1090_s1 + $0x20] sm:$0xff]   ;;  %v876_v17 = vld [vmem:[%s1090_s1 + $0x18] sm:$0xff]   ;;  %v880_v21 = vld [vmem:[%s1090_s1 + $0x10] sm:$0xff]  }
  0x11   : > { %778 = vmatpush3.bf16.msra.mxu0 %v864_v5  ;;  %v873_v14 = vld [vmem:[%s1090_s1 + $0xe0] sm:$0xff]   ;;  %v877_v18 = vld [vmem:[%s1090_s1 + $0xd8] sm:$0xff]   ;;  %v881_v22 = vld [vmem:[%s1090_s1 + $0xd0] sm:$0xff]  }
  0x12   : > { %779 = vmatprep.subr.bf16.mxu0 %v867_v8  ;;  %v874_v15 = vld [vmem:[%s1090_s1 + $0xa0] sm:$0xff]   ;;  %v878_v19 = vld [vmem:[%s1090_s1 + $0x98] sm:$0xff]   ;;  %v882_v23 = vld [vmem:[%s1090_s1 + $0x90] sm:$0xff]  }
  0x13   : > { %800 = vmatpush3.bf16.msra.mxu1 %v866_v7  ;;  %v883_v24 = vld [vmem:[%s1090_s1 + $0x48] sm:$0xff]   ;;  %v887_v28 = vld [vmem:[%s1090_s1 + $0x40] sm:$0xff]   ;;  %v897_v37 = vld [vmem:[%s1090_s1 + $0x138] sm:$0xff]  }
  0x14   : > { %801 = vmatprep.subr.bf16.mxu1 %v869_v10  ;;  %v884_v25 = vld [vmem:[%s1090_s1 + $0x8] sm:$0xff]   ;;  %v888_v29 = vld [vmem:[%s1090_s1] sm:$0xff]   ;;  %v898_v38 = vld [vmem:[%s1090_s1 + $0x130] sm:$0xff]  }
  0x15   : > { %780 = vmatpush3.bf16.msra.mxu0 %v868_v9  ;;  %v885_v26 = vld [vmem:[%s1090_s1 + $0xc8] sm:$0xff]   ;;  %v889_v30 = vld [vmem:[%s1090_s1 + $0xc0] sm:$0xff]   ;;  %v901_v41 = vld [vmem:[%s1090_s1 + $0x118] sm:$0xff]  }
  0x16   : > { %781 = vmatprep.subr.bf16.mxu0 %v871_v12  ;;  %v886_v27 = vld [vmem:[%s1090_s1 + $0x88] sm:$0xff]   ;;  %v890_v31 = vld [vmem:[%s1039_s13] ss:$20 sps:$4 sm:$0xff]   ;;  %v892_v32 = vld [vmem:[%s1039_s13 + $0x4] ss:$20 sps:$4 sm:$0xff]  }
  0x17   : > { %802 = vmatpush3.bf16.msra.mxu1 %v870_v11  ;;  %v893_v34 = vld [vmem:[%s1090_s1 + $0x80] sm:$0xff]   ;;  %569 = vmatprep.mubr.bf16.mxu0 %v892_v32  ;;  %v894_v35 = vld [vmem:[%s1039_s13 + $0x8] ss:$20 sps:$4 sm:$0xff]   ;;  %v902_v42 = vld [vmem:[%s1090_s1 + $0x110] sm:$0xff]  }
  0x18   : > { %803 = vmatprep.subr.bf16.mxu1 %v873_v14  ;;  %v896_v36 = vld [vmem:[%s1039_s13 + $0xc] ss:$20 sps:$4 sm:$0xff]   ;;  %v905_v45 = vld [vmem:[%s1039_s13 + $0x10] ss:$20 sps:$4 sm:$0xff]   ;;  %s726_s13 = sshll.u32 %s1094_s17, 3 }
  0x19   : > { %782 = vmatpush3.bf16.msra.mxu0 %v872_v13  ;;  %610 = vmatprep.mubr.bf16.mxu1 %v896_v36  ;;  %v899_v39 = vld [vmem:[%s1090_s1 + $0x128] sm:$0xff]   ;;  %v900_v40 = vld [vmem:[%s1090_s1 + $0x120] sm:$0xff]   ;;  %s175_s28 = scalar_lea.vmem %s1092_s3, %s726_s13 }
  0x1a   : > { %783 = vmatprep.subr.bf16.mxu0 %v875_v16  ;;  %v903_v43 = vld [vmem:[%s1090_s1 + $0x108] sm:$0xff]   ;;  %v904_v44 = vld [vmem:[%s1090_s1 + $0x100] sm:$0xff]  }
  0x1b   : > { %804 = vmatpush3.bf16.msra.mxu1 %v874_v15  ;;  %v727_v52 = vld [vmem:[%s1091_s2] ss:$0 sm:$0xff] }
  0x1c   : > { %805 = vmatprep.subr.bf16.mxu1 %v877_v18 }
  0x1d   : > { %784 = vmatpush3.bf16.msra.mxu0 %v876_v17 }
  0x1e   : > { %785 = vmatprep.subr.bf16.mxu0 %v879_v20 }
  0x1f   : > { %806 = vmatpush3.bf16.msra.mxu1 %v878_v19 }
  0x20   : > { %807 = vmatprep.subr.bf16.mxu1 %v881_v22 }
  0x21   : > { %786 = vmatpush3.bf16.msra.mxu0 %v880_v21 }
  0x22   : > { %787 = vmatprep.subr.bf16.mxu0 %v883_v24 }
  0x23   : > { %808 = vmatpush3.bf16.msra.mxu1 %v882_v23 }
  0x24   : > { %809 = vmatprep.subr.bf16.mxu1 %v885_v26 }
  0x25   : > { %788 = vmatpush3.bf16.msra.mxu0 %v884_v25 }
  0x26   : > { %789 = vmatprep.subr.bf16.mxu0 %v887_v28 }
  0x27   : > { %810 = vmatpush3.bf16.msra.mxu1 %v886_v27 }
  0x28   : > { %811 = vmatprep.subr.bf16.mxu1 %v889_v30 }
  0x29   : > { %790 = vmatpush3.bf16.msra.mxu0 %v888_v29 }
  0x2a   : > { %828 = vmatprep.subr.bf16.mxu0 %v914_v33 }
  0x2b   : > { %812 = vmatpush3.bf16.msra.mxu1 %v893_v34 }
  0x2c   : > { %570 = vmatmul.mubr.bf16.vlgmr.msra.gmra.mxu0 %v890_v31 }
  0x2d   : > { %844 = vmatprep.mubr.msk.bf16.mxu0 %vm915_vm0, %v914_v33  ;;  %829 = vmatpush3.bf16.msra.mxu0 %v897_v37 }
  0x2e   : > { %611 = vmatmul.mubr.bf16.vlgmr.msra.gmra.mxu1 %v894_v35  ;;  %830 = vmatprep.subr.bf16.mxu0 %v914_v33 }
  0x31   : > { %831 = vmatpush3.bf16.msra.mxu0 %v898_v38 }
  0x32   : > { %832 = vmatprep.subr.bf16.mxu0 %v914_v33 }
  0x35   : > { %833 = vmatpush3.bf16.msra.mxu0 %v899_v39 }
  0x36   : > { %834 = vmatprep.subr.bf16.mxu0 %v914_v33 }
  0x39   : > { %835 = vmatpush3.bf16.msra.mxu0 %v900_v40 }
  0x3a   : > { %836 = vmatprep.subr.bf16.mxu0 %v914_v33 }
  0x3d   : > { %837 = vmatpush3.bf16.msra.mxu0 %v901_v41 }
  0x3e   : > { %838 = vmatprep.subr.bf16.mxu0 %v914_v33 }
  0x41   : > { %839 = vmatpush3.bf16.msra.mxu0 %v902_v42 }
  0x42   : > { %840 = vmatprep.subr.bf16.mxu0 %v914_v33 }
  0x45   : > { %841 = vmatpush3.bf16.msra.mxu0 %v903_v43 }
  0x46   : > { %842 = vmatprep.subr.bf16.mxu0 %v914_v33 }
  0x49   : > { %843 = vmatpush3.bf16.msra.mxu0 %v904_v44 }
  0x4c   : > { %845 = vmatmul.mubr.bf16.vlgmr.msra.gmra.mxu0 %v905_v45 }
  0xec   : > { %v791_v46 = vpop.f32.mrf.mxu0 }
  0xee   : > { %v792_v47 = vpop.f32.mrf.mxu0  ;;  %v813_v48 = vpop.f32.mrf.mxu1 }
  0xef   : > { %v793_v51 = vadd.f32 %v792_v47, %v791_v46 }
  0xf0   : > { %v794_v49 = vpop.f32.mrf.mxu0  ;;  %v814_v50 = vpop.f32.mrf.mxu1 }
  0xf1   : > { %v572_v55 = vadd.f32 %v793_v51, %v727_v52  ;;  %v815_v56 = vadd.f32 %v814_v50, %v813_v48 }
  0xf2   : > { %v795_v53 = vpop.f32.mrf.mxu0  ;;  %v816_v54 = vpop.f32.mrf.mxu1 }
  0xf3   : > { %v796_v57 = vadd.f32 %v795_v53, %v794_v49  ;;  %v613_v61 = vadd.f32 %v815_v56, %v572_v55 }
  0xf4   : > { %v817_v58 = vpop.f32.mrf.mxu1 }
  0xf5   : > { %v575_v59 = vadd.f32 %v796_v57, %v727_v52  ;;  %v818_v60 = vadd.f32 %v817_v58, %v816_v54 }
  0xf7   : > { %v616_v1 = vadd.f32 %v818_v60, %v575_v59 }
 0x10c   : > { %v653_v62 = vpop.f32.mrf.mxu0 }
 0x10d   : > { %v654_v63 = vadd.f32 %v653_v62, %v613_v61 }
 0x10e   : > { %v846_v0 = vpop.f32.mrf.mxu0 }
 0x10f   : > { %660 = vst [vmem:[%s175_s28] sm:$0xff] %v654_v63 }
 0x110   : > { %v656_v2 = vpop.f32.mrf.mxu0 }
 0x111   : > { %v657_v3 = vadd.f32 %v656_v2, %v616_v1 }
 0x112   : > { %v847_v4 = vpop.f32.mrf.mxu0 }
 0x113   : > { %661 = vst [vmem:[%s175_s28 + $0x8] sm:$0xff] %v657_v3 }
 0x114 PF: > { %s13_s12 = sadd.s32 1, %s912_s12  }
 0x115   : > { %p10_p4 = scmp.ge.s32.totalorder %s13_s12, 4  }
 0x117   :  { %12 = sbr.rel (!%p10_p4) target bundleno = 1 (0x1), region = 62 }

// kernel: raft_forward.84
= control target key start
LH: loop header
LB: loop body
LE: loop exit
PB: predicated region body
PF: predicated region fallthrough
CT: control target
= control target key end

     0   :  { %s844_s12 = smov 0   ;;  %s1003_s0 = inlined_call_operand.vmem [shape: bf16[32,128], index: 0, kind: input, shape index: {}]   ;;  %s1004_s1 = inlined_call_operand.vmem [shape: bf16[128,640], index: 1, kind: input, shape index: {}]   ;;  %s1005_s2 = inlined_call_operand.vmem [shape: f32[1,640], index: 2, kind: input, shape index: {}]   ;;  %s1006_s3 = inlined_call_operand.vmem [shape: f32[32,640], index: 3, kind: output, shape index: {}]  }
   0x1 LB: > { %s663_s13 = sadd.s32 4294967295, %s819_s12   ;;  %p667_p0 = scmp.ge.s32.totalorder %s819_s12, 1  ;;  %s819_s12 = sphi %s844_s12, %s13_s12  }
   0x2   : > { %p138_p1 = scmp.lt.s32.totalorder %s819_s12, 3 }
   0x4   : > { %p139_p2 = pnand %p667_p0, %p138_p1 }
   0x5   : > { %s668_s16 = sshll.u32 (!%p139_p2), %s663_s13, 1 }
   0x6   : > { %142 = sbr.rel (%p139_p2) target bundleno = 277 (0x115), region = 32  ;;  %p164_p3 = scmp.lt.s32.totalorder (!%p139_p2), %s668_s16, 3 }
   0xb   : > { %v756_v0 = vld [vmem:[%s1004_s1 + $0x11c] ss:$20 sps:$4 sm:$0xff]   ;;  %v758_v1 = vld [vmem:[%s1004_s1 + $0x118] ss:$20 sps:$4 sm:$0xff]   ;;  %v821_v2 = vmov 0   ;;  %s1008_s16 = smov (!%p164_p3, %s668_s16), 3  ;;  %v229_v43 = vlaneseq }
   0xc   : > { %500 = vmatprep.mubr.bf16.mxu0 %v821_v2  ;;  %543 = vmatprep.mubr.bf16.mxu1 %v821_v2  ;;  %v759_v3 = vld [vmem:[%s1004_s1 + $0xf4] ss:$20 sps:$4 sm:$0xff]   ;;  %v761_v4 = vld [vmem:[%s1004_s1 + $0xf0] ss:$20 sps:$4 sm:$0xff]   ;;  %v762_v5 = vld [vmem:[%s1004_s1 + $0xcc] ss:$20 sps:$4 sm:$0xff]  }
   0xd   : > { %468 = vmatprep.subr.bf16.mxu0 %v756_v0  ;;  %v764_v6 = vld [vmem:[%s1004_s1 + $0xc8] ss:$20 sps:$4 sm:$0xff]   ;;  %v765_v7 = vld [vmem:[%s1004_s1 + $0xa4] ss:$20 sps:$4 sm:$0xff]   ;;  %s669_s4 = sshll.u32 %s1008_s16, 2  ;;  %v822_v32 = vmov 0.0  }
   0xe   : > { %469 = vmatpush1.bf16.msra.mxu0 %v758_v1  ;;  %v776_v8 = vld [vmem:[%s1004_s1 + $0x124] ss:$20 sps:$4 sm:$0xff]   ;;  %v779_v9 = vld [vmem:[%s1004_s1 + $0x120] ss:$20 sps:$4 sm:$0xff]   ;;  %v768_v11 = vld [vmem:[%s1004_s1 + $0x7c] ss:$20 sps:$4 sm:$0xff]   ;;  %s894_s17 = scalar_lea.vmem %s1003_s0, %s669_s4 }
   0xf   : > { %470 = vmatprep.subr.bf16.mxu0 %v759_v3  ;;  %v767_v10 = vld [vmem:[%s1004_s1 + $0xa0] ss:$20 sps:$4 sm:$0xff]   ;;  %511 = vmatprep.subr.bf16.mxu1 %v776_v8  ;;  %v782_v12 = vld [vmem:[%s1004_s1 + $0xfc] ss:$20 sps:$4 sm:$0xff]   ;;  %v785_v13 = vld [vmem:[%s1004_s1 + $0xf8] ss:$20 sps:$4 sm:$0xff]  }
  0x10   : > { %512 = vmatpush1.bf16.msra.mxu1 %v779_v9  ;;  %v770_v14 = vld [vmem:[%s1004_s1 + $0x78] ss:$20 sps:$4 sm:$0xff]   ;;  %v771_v15 = vld [vmem:[%s1004_s1 + $0x54] ss:$20 sps:$4 sm:$0xff]   ;;  %v789_v17 = vld [vmem:[%s1004_s1 + $0xd0] ss:$20 sps:$4 sm:$0xff]  }
  0x11   : > { %513 = vmatprep.subr.bf16.mxu1 %v782_v12  ;;  %v787_v16 = vld [vmem:[%s1004_s1 + $0xd4] ss:$20 sps:$4 sm:$0xff]   ;;  %v791_v18 = vld [vmem:[%s1004_s1 + $0xac] ss:$20 sps:$4 sm:$0xff]   ;;  %v773_v19 = vld [vmem:[%s1004_s1 + $0x50] ss:$20 sps:$4 sm:$0xff]  }
  0x12   : > { %471 = vmatpush1.bf16.msra.mxu0 %v761_v4  ;;  %v774_v20 = vld [vmem:[%s1004_s1 + $0x2c] ss:$20 sps:$4 sm:$0xff]   ;;  %v793_v21 = vld [vmem:[%s1004_s1 + $0xa8] ss:$20 sps:$4 sm:$0xff]   ;;  %v795_v22 = vld [vmem:[%s1004_s1 + $0x84] ss:$20 sps:$4 sm:$0xff]  }
  0x13   : > { %472 = vmatprep.subr.bf16.mxu0 %v762_v5  ;;  %v778_v23 = vld [vmem:[%s1004_s1 + $0x28] ss:$20 sps:$4 sm:$0xff]   ;;  %v780_v24 = vld [vmem:[%s1004_s1 + $0x4] ss:$20 sps:$4 sm:$0xff]   ;;  %v797_v25 = vld [vmem:[%s1004_s1 + $0x80] ss:$20 sps:$4 sm:$0xff]  }
  0x14   : > { %514 = vmatpush1.bf16.msra.mxu1 %v785_v13  ;;  %v799_v26 = vld [vmem:[%s1004_s1 + $0x5c] ss:$20 sps:$4 sm:$0xff]   ;;  %v784_v27 = vld [vmem:[%s1004_s1] ss:$20 sps:$4 sm:$0xff]   ;;  %v801_v28 = vld [vmem:[%s1004_s1 + $0x58] ss:$20 sps:$4 sm:$0xff]  }
  0x15   : > { %515 = vmatprep.subr.bf16.mxu1 %v787_v16  ;;  %v803_v29 = vld [vmem:[%s1004_s1 + $0x34] ss:$20 sps:$4 sm:$0xff]   ;;  %v786_v30 = vld [vmem:[%s894_s17] sm:$0xff]   ;;  %vm823_vm0 = vmmov 0   ;;  %v798_v37 = vld [vmem:[%s1004_s1 + $0xd8] ss:$20 sps:$4 sm:$0xff]  }
  0x16   : > { %473 = vmatpush1.bf16.msra.mxu0 %v764_v6  ;;  %v790_v31 = vld [vmem:[%s1004_s1 + $0x128] ss:$20 sps:$4 sm:$0xff]   ;;  %v805_v33 = vld [vmem:[%s1004_s1 + $0x30] ss:$20 sps:$4 sm:$0xff]   ;;  %v807_v34 = vld [vmem:[%s1004_s1 + $0xc] ss:$20 sps:$4 sm:$0xff]  }
  0x17   : > { %474 = vmatprep.subr.bf16.mxu0 %v765_v7  ;;  %v794_v35 = vld [vmem:[%s1004_s1 + $0x100] ss:$20 sps:$4 sm:$0xff]   ;;  %v809_v36 = vld [vmem:[%s1004_s1 + $0x8] ss:$20 sps:$4 sm:$0xff]   ;;  %v802_v38 = vld [vmem:[%s1004_s1 + $0xb0] ss:$20 sps:$4 sm:$0xff]  }
  0x18   : > { %516 = vmatpush1.bf16.msra.mxu1 %v789_v17  ;;  %v806_v39 = vld [vmem:[%s1004_s1 + $0x88] ss:$20 sps:$4 sm:$0xff]   ;;  %v810_v40 = vld [vmem:[%s1004_s1 + $0x60] ss:$20 sps:$4 sm:$0xff]   ;;  %v811_v41 = vld [vmem:[%s1004_s1 + $0x38] ss:$20 sps:$4 sm:$0xff]  }
  0x19   : > { %517 = vmatprep.subr.bf16.mxu1 %v791_v18  ;;  %v812_v42 = vld [vmem:[%s1004_s1 + $0x10] ss:$20 sps:$4 sm:$0xff]   ;;  %v230_v44 = vshrl.u32 %v229_v43, 7  ;;  %s744_s27 = smul.u32 40, %s1008_s16 }
  0x1a   : > { %475 = vmatpush1.bf16.msra.mxu0 %v767_v10  ;;  %v227_v46 = vld [vmem:[%s1005_s2] sm:$0x1f] }
  0x1b   : > { %476 = vmatprep.subr.bf16.mxu0 %v768_v11  ;;  %v231_v45 = vsub.s32 0, %v230_v44  ;;  %v235_v47 = vsub.s32 1, %v230_v44  ;;  %s988_s30 = scalar_lea.vmem %s1006_s3, %s744_s27  ;;  %v239_v53 = vsub.s32 2, %v230_v44  ;;  %v243_v56 = vsub.s32 3, %v230_v44 }
  0x1c   : > { %518 = vmatpush1.bf16.msra.mxu1 %v793_v21  ;;  %v247_v6 = vsub.s32 4, %v230_v44 }
  0x1d   : > { %519 = vmatprep.subr.bf16.mxu1 %v795_v22  ;;  %v232_v48 = vrot.slane %v227_v46, %v231_v45  ;;  %v236_v49 = vrot.slane %v227_v46, %v235_v47  ;;  %v240_v59 = vrot.slane %v227_v46, %v239_v53  ;;  %v244_v61 = vrot.slane %v227_v46, %v243_v56 }
  0x1e   : > { %477 = vmatpush1.bf16.msra.mxu0 %v770_v14  ;;  %v248_v7 = vrot.slane %v227_v46, %v247_v6 }
  0x1f   : > { %478 = vmatprep.subr.bf16.mxu0 %v771_v15 }
  0x20   : > { %520 = vmatpush1.bf16.msra.mxu1 %v797_v25 }
  0x21   : > { %521 = vmatprep.subr.bf16.mxu1 %v799_v26 }
  0x22   : > { %479 = vmatpush1.bf16.msra.mxu0 %v773_v19 }
  0x23   : > { %480 = vmatprep.subr.bf16.mxu0 %v774_v20 }
  0x24   : > { %522 = vmatpush1.bf16.msra.mxu1 %v801_v28 }
  0x25   : > { %523 = vmatprep.subr.bf16.mxu1 %v803_v29 }
  0x26   : > { %481 = vmatpush1.bf16.msra.mxu0 %v778_v23 }
  0x27   : > { %482 = vmatprep.subr.bf16.mxu0 %v780_v24 }
  0x28   : > { %524 = vmatpush1.bf16.msra.mxu1 %v805_v33 }
  0x29   : > { %525 = vmatprep.subr.bf16.mxu1 %v807_v34 }
  0x2a   : > { %483 = vmatpush1.bf16.msra.mxu0 %v784_v27 }
  0x2b   : > { %724 = vmatprep.subr.bf16.mxu0 %v822_v32 }
  0x2c   : > { %526 = vmatpush1.bf16.msra.mxu1 %v809_v36 }
  0x2d   : > { %501 = vmatmul.mubr.bf16.vlgmr.msra.gmra.mxu0 %v786_v30 }
  0x2e   : > { %725 = vmatpush3.bf16.msra.mxu0 %v790_v31  ;;  %740 = vmatprep.mubr.msk.bf16.mxu0 %vm823_vm0, %v822_v32 }
  0x2f   : > { %726 = vmatprep.subr.bf16.mxu0 %v822_v32  ;;  %544 = vmatmul.mubr.bf16.vlgmr.msra.gmra.mxu1 %v786_v30 }
  0x32   : > { %727 = vmatpush3.bf16.msra.mxu0 %v794_v35 }
  0x33   : > { %728 = vmatprep.subr.bf16.mxu0 %v822_v32 }
  0x36   : > { %729 = vmatpush3.bf16.msra.mxu0 %v798_v37 }
  0x37   : > { %730 = vmatprep.subr.bf16.mxu0 %v822_v32 }
  0x3a   : > { %731 = vmatpush3.bf16.msra.mxu0 %v802_v38 }
  0x3b   : > { %732 = vmatprep.subr.bf16.mxu0 %v822_v32 }
  0x3e   : > { %733 = vmatpush3.bf16.msra.mxu0 %v806_v39 }
  0x3f   : > { %734 = vmatprep.subr.bf16.mxu0 %v822_v32 }
  0x42   : > { %735 = vmatpush3.bf16.msra.mxu0 %v810_v40 }
  0x43   : > { %736 = vmatprep.subr.bf16.mxu0 %v822_v32 }
  0x46   : > { %737 = vmatpush3.bf16.msra.mxu0 %v811_v41 }
  0x47   : > { %738 = vmatprep.subr.bf16.mxu0 %v822_v32 }
  0x4a   : > { %739 = vmatpush3.bf16.msra.mxu0 %v812_v42 }
  0x4d   : > { %741 = vmatmul.mubr.bf16.vlgmr.msra.gmra.mxu0 %v786_v30 }
  0xed   : > { %v502_v50 = vpop.f32.mrf.mxu0 }
  0xee   : > { %v503_v51 = vadd.f32 %v502_v50, %v232_v48 }
  0xef   : > { %v504_v52 = vpop.f32.mrf.mxu0  ;;  %v545_v62 = vpop.f32.mrf.mxu1 }
  0xf0   : > { %595 = vst [vmem:[%s988_s30] sm:$0xff] %v503_v51  ;;  %v505_v54 = vadd.f32 %v504_v52, %v236_v49  ;;  %v546_v63 = vadd.f32 %v545_v62, %v240_v59 }
  0xf1   : > { %v506_v55 = vpop.f32.mrf.mxu0  ;;  %v547_v0 = vpop.f32.mrf.mxu1 }
  0xf2   : > { %596 = vst [vmem:[%s988_s30 + $0x8] sm:$0xff] %v505_v54  ;;  %v507_v57 = vadd.f32 %v506_v55, %v232_v48  ;;  %597 = vst [vmem:[%s988_s30 + $0x10] sm:$0xff] %v546_v63  ;;  %v548_v1 = vadd.f32 %v547_v0, %v244_v61 }
  0xf3   : > { %v508_v58 = vpop.f32.mrf.mxu0  ;;  %v549_v2 = vpop.f32.mrf.mxu1 }
  0xf4   : > { %600 = vst [vmem:[%s988_s30 + $0x28] sm:$0xff] %v507_v57  ;;  %v509_v60 = vadd.f32 %v508_v58, %v236_v49  ;;  %598 = vst [vmem:[%s988_s30 + $0x18] sm:$0xff] %v548_v1  ;;  %v550_v3 = vadd.f32 %v549_v2, %v240_v59 }
  0xf5   : > { %v551_v4 = vpop.f32.mrf.mxu1 }
  0xf6   : > { %601 = vst [vmem:[%s988_s30 + $0x30] sm:$0xff] %v509_v60  ;;  %602 = vst [vmem:[%s988_s30 + $0x38] sm:$0xff] %v550_v3  ;;  %v552_v5 = vadd.f32 %v551_v4, %v244_v61 }
  0xf8   : > { %603 = vst [vmem:[%s988_s30 + $0x40] sm:$0xff] %v552_v5 }
 0x10d   : > { %v588_v8 = vpop.f32.mrf.mxu0 }
 0x10e   : > { %v589_v9 = vadd.f32 %v588_v8, %v248_v7 }
 0x10f   : > { %v742_v10 = vpop.f32.mrf.mxu0 }
 0x110   : > { %599 = vst [vmem:[%s988_s30 + $0x20] sm:$0xff] %v589_v9 }
 0x111   : > { %v591_v11 = vpop.f32.mrf.mxu0 }
 0x112   : > { %v592_v12 = vadd.f32 %v591_v11, %v248_v7 }
 0x113   : > { %v743_v13 = vpop.f32.mrf.mxu0 }
 0x114   : > { %604 = vst [vmem:[%s988_s30 + $0x48] sm:$0xff] %v592_v12 }
 0x115 PF: > { %s13_s12 = sadd.s32 1, %s819_s12  }
 0x116   : > { %p10_p4 = scmp.ge.s32.totalorder %s13_s12, 4  }
 0x118   :  { %12 = sbr.rel (!%p10_p4) target bundleno = 1 (0x1), region = 62 }

// kernel: raft_forward.85
= control target key start
LH: loop header
LB: loop body
LE: loop exit
PB: predicated region body
PF: predicated region fallthrough
CT: control target
= control target key end

     0   :  { %s845_s9 = smov 0   ;;  %s1167_s0 = inlined_call_operand.vmem [shape: f32[2,9,1024], index: 0, kind: input, shape index: {}]   ;;  %s1168_s1 = inlined_call_operand.vmem [shape: f32[2,2,9,1024], index: 1, kind: input, shape index: {}]   ;;  %s1169_s2 = inlined_call_operand.vmem [shape: f32[2,2,1024], index: 2, kind: output, shape index: {}]  }
   0x1 LB: > { %s748_s10 = sadd.s32 4294967295, %s827_s9   ;;  %p752_p0 = scmp.ge.s32.totalorder %s827_s9, 1  ;;  %s827_s9 = sphi %s845_s9, %s12_s9  }
   0x2   : > { %p122_p1 = scmp.lt.s32.totalorder %s827_s9, 3 }
   0x4   : > { %p123_p2 = pnand %p752_p0, %p122_p1 }
   0x5   : > { %p149_p3 = scmp.lt.s32.totalorder (!%p123_p2), %s748_s10, 1 }
   0x6   : > { %126 = sbr.rel (%p123_p2) target bundleno = 146 (0x92), region = 28 }
   0xb   : > { %s1171_s10 = smov (!%p149_p3, %s748_s10), 1  ;;  %vm180_vm0 = vcmask 1040384   ;;  %vm662_vm1 = vcmask 1041409   ;;  %vm664_vm2 = vcmask 1043459   ;;  %vm666_vm3 = vcmask 1045509  }
   0xc   : > { %s761_s11 = sshll.u32 %s1171_s10, 7  ;;  %s762_s15 = sshll.u32 %s1171_s10, 8  ;;  %vm668_vm4 = vcmask 1047559  }
   0xd   : > { %s153_s14 = scalar_lea.vmem %s1167_s0, %s761_s11  ;;  %s991_s18 = scalar_lea.vmem %s1168_s1, %s762_s15 }
   0xe   : > { %v859_v0 = vld [vmem:[%s153_s14] sm:$0xff]  ;;  %v861_v1 = vld [vmem:[%s153_s14 + $0x8] sm:$0xff]  ;;  %v863_v2 = vld [vmem:[%s153_s14 + $0x10] sm:$0xff]  ;;  %s763_s19 = sshll.u32 %s1171_s10, 4 }
   0xf   : > { %v865_v3 = vld [vmem:[%s153_s14 + $0x18] sm:$0xff]  ;;  %v867_v4 = vld [vmem:[%s153_s14 + $0x40] sm:$0x1]  ;;  %v869_v5 = vld [vmem:[%s153_s14 + $0x48] sm:$0x1]  ;;  %s163_s22 = scalar_lea.vmem %s1169_s2, %s763_s19 }
  0x10   : > { %v871_v6 = vld [vmem:[%s153_s14 + $0x50] sm:$0x1]  ;;  %v873_v7 = vld [vmem:[%s153_s14 + $0x58] sm:$0x1]  ;;  %v875_v8 = vld [vmem:[%s153_s14 + $0x20] sm:$0xff]  ;;  %v181_v13 = vsel %vm180_vm0, %v867_v4, -inf }
  0x11   : > { %v877_v9 = vld [vmem:[%s153_s14 + $0x60] sm:$0x1]  ;;  %v879_v10 = vld [vmem:[%s153_s14 + $0x68] sm:$0x1]  ;;  %v881_v11 = vld [vmem:[%s153_s14 + $0x70] sm:$0x1]  ;;  %v182_v20 = vmax.f32 %v859_v0, %v181_v13 }
  0x12   : > { %v883_v12 = vld [vmem:[%s153_s14 + $0x78] sm:$0x1]  ;;  %v189_v14 = vsel %vm180_vm0, %v869_v5, -inf  ;;  %v197_v15 = vsel %vm180_vm0, %v871_v6, -inf  ;;  %v205_v16 = vsel %vm180_vm0, %v873_v7, -inf  ;;  %v893_v17 = vld [vmem:[%s153_s14 + $0x28] sm:$0xff] }
  0x13   : > { %v895_v18 = vld [vmem:[%s153_s14 + $0x30] sm:$0xff]  ;;  %v897_v19 = vld [vmem:[%s153_s14 + $0x38] sm:$0xff]  ;;  %v190_v21 = vmax.f32 %v861_v1, %v189_v14  ;;  %v198_v22 = vmax.f32 %v863_v2, %v197_v15  ;;  %v206_v23 = vmax.f32 %v865_v3, %v205_v16  ;;  %v213_v24 = vsel %vm180_vm0, %v877_v9, -inf }
  0x14   : > { %v221_v25 = vsel %vm180_vm0, %v879_v10, -inf  ;;  %v229_v26 = vsel %vm180_vm0, %v881_v11, -inf  ;;  %v237_v27 = vsel %vm180_vm0, %v883_v12, -inf  ;;  %v183_v28 = vrot.slane %v182_v20, 4 }
  0x15   : > { %v191_v29 = vrot.slane %v190_v21, 4  ;;  %v199_v30 = vrot.slane %v198_v22, 4  ;;  %v207_v31 = vrot.slane %v206_v23, 4  ;;  %v214_v32 = vmax.f32 %v875_v8, %v213_v24 }
  0x16   : > { %v222_v33 = vmax.f32 %v893_v17, %v221_v25  ;;  %v230_v34 = vmax.f32 %v895_v18, %v229_v26  ;;  %v238_v35 = vmax.f32 %v897_v19, %v237_v27  ;;  %v184_v36 = vmax.f32 %v182_v20, %v183_v28 }
  0x17   : > { %v192_v37 = vmax.f32 %v190_v21, %v191_v29  ;;  %v200_v38 = vmax.f32 %v198_v22, %v199_v30  ;;  %v208_v39 = vmax.f32 %v206_v23, %v207_v31  ;;  %v215_v40 = vrot.slane %v214_v32, 4 }
  0x18   : > { %v223_v41 = vrot.slane %v222_v33, 4  ;;  %v231_v42 = vrot.slane %v230_v34, 4  ;;  %v239_v43 = vrot.slane %v238_v35, 4  ;;  %v185_v44 = vrot.slane %v184_v36, 2 }
  0x19   : > { %v193_v45 = vrot.slane %v192_v37, 2  ;;  %v201_v46 = vrot.slane %v200_v38, 2  ;;  %v209_v47 = vrot.slane %v208_v39, 2  ;;  %v216_v48 = vmax.f32 %v214_v32, %v215_v40 }
  0x1a   : > { %v224_v49 = vmax.f32 %v222_v33, %v223_v41  ;;  %v232_v50 = vmax.f32 %v230_v34, %v231_v42  ;;  %v240_v51 = vmax.f32 %v238_v35, %v239_v43  ;;  %v186_v52 = vmax.f32 %v184_v36, %v185_v44 }
  0x1b   : > { %v194_v53 = vmax.f32 %v192_v37, %v193_v45  ;;  %v202_v54 = vmax.f32 %v200_v38, %v201_v46  ;;  %v210_v55 = vmax.f32 %v208_v39, %v209_v47  ;;  %v217_v56 = vrot.slane %v216_v48, 2 }
  0x1c   : > { %v225_v57 = vrot.slane %v224_v49, 2  ;;  %v233_v58 = vrot.slane %v232_v50, 2  ;;  %v187_v59 = vrot.slane %v186_v52, 1  ;;  %v241_v21 = vrot.slane %v240_v51, 2 }
  0x1d   : > { %v195_v60 = vrot.slane %v194_v53, 1  ;;  %v203_v61 = vrot.slane %v202_v54, 1  ;;  %v211_v62 = vrot.slane %v210_v55, 1  ;;  %v218_v63 = vmax.f32 %v216_v48, %v217_v56 }
  0x1e   : > { %v226_v13 = vmax.f32 %v224_v49, %v225_v57  ;;  %v234_v14 = vmax.f32 %v232_v50, %v233_v58  ;;  %v188_v15 = vmax.f32 %v186_v52, %v187_v59  ;;  %v242_v31 = vmax.f32 %v240_v51, %v241_v21 }
  0x1f   : > { %v196_v16 = vmax.f32 %v194_v53, %v195_v60  ;;  %v204_v20 = vmax.f32 %v202_v54, %v203_v61  ;;  %v212_v22 = vmax.f32 %v210_v55, %v211_v62  ;;  %v219_v23 = vrot.slane %v218_v63, 1 }
  0x20   : > { %v227_v24 = vrot.slane %v226_v13, 1  ;;  %v235_v25 = vrot.slane %v234_v14, 1  ;;  %v245_v28 = vsub.f32 %v859_v0, %v188_v15  ;;  %v243_v38 = vrot.slane %v242_v31, 1 }
  0x21   : > { %v220_v26 = vmax.f32 %v218_v63, %v219_v23  ;;  %v246_v29 = vsub.f32 %v861_v1, %v196_v16  ;;  %v247_v32 = vsub.f32 %v863_v2, %v204_v20  ;;  %v248_v33 = vsub.f32 %v865_v3, %v212_v22 }
  0x22   : > { %v228_v27 = vmax.f32 %v226_v13, %v227_v24  ;;  %v236_v30 = vmax.f32 %v234_v14, %v235_v25  ;;  %v261_v36 = vmul.f32 1.442695, %v245_v28  ;;  %v253_v0 = vsub.f32 %v867_v4, %v188_v15 }
  0x23   : > { %v249_v34 = vsub.f32 %v875_v8, %v220_v26  ;;  %v263_v37 = vmul.f32 1.442695, %v246_v29  ;;  %v265_v40 = vmul.f32 1.442695, %v247_v32  ;;  %v267_v41 = vmul.f32 1.442695, %v248_v33 }
  0x24   : > { %v250_v35 = vsub.f32 %v893_v17, %v228_v27  ;;  %v251_v39 = vsub.f32 %v895_v18, %v236_v30  ;;  %v254_v1 = vsub.f32 %v869_v5, %v196_v16  ;;  %773 = vpow2.f32 %v261_v36 }
  0x25   : > { %v269_v42 = vmul.f32 1.442695, %v249_v34  ;;  %v255_v2 = vsub.f32 %v871_v6, %v204_v20  ;;  %775 = vpow2.f32 %v263_v37  ;;  %v244_v8 = vmax.f32 %v242_v31, %v243_v38 }
  0x26   : > { %v271_v3 = vmul.f32 1.442695, %v250_v35  ;;  %v256_v17 = vsub.f32 %v873_v7, %v212_v22  ;;  %777 = vpow2.f32 %v265_v40  ;;  %v273_v43 = vmul.f32 1.442695, %v251_v39 }
  0x27   : > { %v257_v44 = vsub.f32 %v877_v9, %v220_v26  ;;  %779 = vpow2.f32 %v267_v41  ;;  %v277_v18 = vmul.f32 1.442695, %v253_v0  ;;  %v258_v4 = vsub.f32 %v879_v10, %v228_v27 }
  0x28   : > { %781 = vpow2.f32 %v269_v42  ;;  %v279_v45 = vmul.f32 1.442695, %v254_v1  ;;  %v259_v5 = vsub.f32 %v881_v11, %v236_v30  ;;  %v281_v46 = vmul.f32 1.442695, %v255_v2 }
  0x29   : > { %783 = vpow2.f32 %v271_v3  ;;  %v260_v6 = vsub.f32 %v883_v12, %v244_v8  ;;  %v283_v47 = vmul.f32 1.442695, %v256_v17  ;;  %v252_v7 = vsub.f32 %v897_v19, %v244_v8 }
  0x2a   : > { %785 = vpow2.f32 %v273_v43  ;;  %v285_v48 = vmul.f32 1.442695, %v257_v44  ;;  %v287_v9 = vmul.f32 1.442695, %v258_v4  ;;  %v289_v49 = vmul.f32 1.442695, %v259_v5 }
  0x2b   : > { %787 = vpow2.f32 %v277_v18  ;;  %v291_v10 = vmul.f32 1.442695, %v260_v6  ;;  %v275_v50 = vmul.f32 1.442695, %v252_v7 }
  0x2c   : > { %789 = vpow2.f32 %v279_v45 }
  0x2d   : > { %791 = vpow2.f32 %v281_v46 }
  0x2e   : > { %793 = vpow2.f32 %v283_v47 }
  0x2f   : > { %795 = vpow2.f32 %v285_v48 }
  0x30   : > { %797 = vpow2.f32 %v287_v9 }
  0x31   : > { %v931_v11 = vpop.eup %773  ;;  %799 = vpow2.f32 %v289_v49 }
  0x32   : > { %v933_v51 = vpop.eup %775  ;;  %801 = vpow2.f32 %v291_v10 }
  0x33   : > { %v935_v12 = vpop.eup %777  ;;  %803 = vpow2.f32 %v275_v50 }
  0x34   : > { %v937_v19 = vpop.eup %779 }
  0x35   : > { %v939_v52 = vpop.eup %781 }
  0x36   : > { %v941_v53 = vpop.eup %783 }
  0x37   : > { %v943_v54 = vpop.eup %785 }
  0x38   : > { %v945_v55 = vpop.eup %787 }
  0x39   : > { %v947_v56 = vpop.eup %789  ;;  %v293_v57 = vsel %vm180_vm0, %v945_v55, 0.0 }
  0x3a   : > { %v951_v58 = vpop.eup %791  ;;  %v294_v59 = vadd.f32 %v931_v11, %v293_v57  ;;  %v301_v60 = vsel %vm180_vm0, %v947_v56, 0.0 }
  0x3b   : > { %v956_v61 = vpop.eup %793  ;;  %v302_v62 = vadd.f32 %v933_v51, %v301_v60  ;;  %v309_v63 = vsel %vm180_vm0, %v951_v58, 0.0 }
  0x3c   : > { %v961_v13 = vpop.eup %795  ;;  %v295_v14 = vrot.slane %v294_v59, 4  ;;  %v310_v15 = vadd.f32 %v935_v12, %v309_v63  ;;  %v317_v16 = vsel %vm180_vm0, %v956_v61, 0.0 }
  0x3d   : > { %v966_v20 = vpop.eup %797  ;;  %v303_v21 = vrot.slane %v302_v62, 4  ;;  %v318_v22 = vadd.f32 %v937_v19, %v317_v16  ;;  %v325_v23 = vsel %vm180_vm0, %v961_v13, 0.0 }
  0x3e   : > { %v971_v24 = vpop.eup %799  ;;  %v296_v25 = vadd.f32 %v295_v14, %v294_v59  ;;  %v311_v26 = vrot.slane %v310_v15, 4  ;;  %v326_v27 = vadd.f32 %v939_v52, %v325_v23  ;;  %v333_v28 = vsel %vm180_vm0, %v966_v20, 0.0 }
  0x3f   : > { %v976_v29 = vpop.eup %801  ;;  %v304_v30 = vadd.f32 %v303_v21, %v302_v62  ;;  %v319_v31 = vrot.slane %v318_v22, 4  ;;  %v334_v32 = vadd.f32 %v941_v53, %v333_v28  ;;  %v341_v33 = vsel %vm180_vm0, %v971_v24, 0.0 }
  0x40   : > { %v981_v34 = vpop.eup %803  ;;  %v297_v35 = vrot.slane %v296_v25, 2  ;;  %v312_v36 = vadd.f32 %v311_v26, %v310_v15  ;;  %v327_v37 = vrot.slane %v326_v27, 4  ;;  %v342_v38 = vadd.f32 %v943_v54, %v341_v33 }
  0x41   : > { %v305_v39 = vrot.slane %v304_v30, 2  ;;  %v320_v40 = vadd.f32 %v319_v31, %v318_v22  ;;  %v335_v0 = vrot.slane %v334_v32, 4  ;;  %v349_v41 = vsel %vm180_vm0, %v976_v29, 0.0 }
  0x42   : > { %v298_v1 = vadd.f32 %v297_v35, %v296_v25  ;;  %v313_v42 = vrot.slane %v312_v36, 2  ;;  %v328_v2 = vadd.f32 %v327_v37, %v326_v27  ;;  %v343_v3 = vrot.slane %v342_v38, 4 }
  0x43   : > { %v306_v8 = vadd.f32 %v305_v39, %v304_v30  ;;  %v321_v17 = vrot.slane %v320_v40, 2  ;;  %v336_v43 = vadd.f32 %v335_v0, %v334_v32  ;;  %v350_v44 = vadd.f32 %v981_v34, %v349_v41  ;;  %v389_v39 = vld [vmem:[%s991_s18 + $0x40] sm:$0x1] }
  0x44   : > { %v299_v18 = vrot.slane %v298_v1, 1  ;;  %v314_v4 = vadd.f32 %v313_v42, %v312_v36  ;;  %v329_v45 = vrot.slane %v328_v2, 2  ;;  %v344_v5 = vadd.f32 %v343_v3, %v342_v38  ;;  %v381_v38 = vld [vmem:[%s991_s18] sm:$0xff]  ;;  %v390_v42 = vld [vmem:[%s991_s18 + $0x48] sm:$0x1] }
  0x45   : > { %v307_v46 = vrot.slane %v306_v8, 1  ;;  %v322_v6 = vadd.f32 %v321_v17, %v320_v40  ;;  %v337_v47 = vrot.slane %v336_v43, 2  ;;  %v351_v7 = vrot.slane %v350_v44, 4  ;;  %v383_v17 = vld [vmem:[%s991_s18 + $0x10] sm:$0xff] }
  0x46   : > { %v300_v48 = vadd.f32 %v299_v18, %v298_v1  ;;  %v315_v9 = vrot.slane %v314_v4, 1  ;;  %v330_v49 = vadd.f32 %v329_v45, %v328_v2  ;;  %v345_v10 = vrot.slane %v344_v5, 2  ;;  %v382_v1 = vld [vmem:[%s991_s18 + $0x8] sm:$0xff]  ;;  %v385_v45 = vld [vmem:[%s991_s18 + $0x20] sm:$0xff] }
  0x47   : > { %v308_v50 = vadd.f32 %v307_v46, %v306_v8  ;;  %v323_v57 = vrot.slane %v322_v6, 1  ;;  %v338_v59 = vadd.f32 %v337_v47, %v336_v43  ;;  %v352_v60 = vadd.f32 %v351_v7, %v350_v44  ;;  %v391_v43 = vld [vmem:[%s991_s18 + $0x50] sm:$0x1]  ;;  %v393_v7 = vld [vmem:[%s991_s18 + $0x60] sm:$0x1] }
  0x48   : > { %v316_v62 = vadd.f32 %v315_v9, %v314_v4  ;;  %v331_v63 = vrot.slane %v330_v49, 1  ;;  %v346_v14 = vadd.f32 %v345_v10, %v344_v5  ;;  %805 = vrcp.f32 %v300_v48  ;;  %v384_v4 = vld [vmem:[%s991_s18 + $0x18] sm:$0xff] }
  0x49   : > { %v324_v15 = vadd.f32 %v323_v57, %v322_v6  ;;  %v339_v16 = vrot.slane %v338_v59, 1  ;;  %v353_v21 = vrot.slane %v352_v60, 2  ;;  %807 = vrcp.f32 %v308_v50  ;;  %v394_v57 = vld [vmem:[%s991_s18 + $0x68] sm:$0x1] }
  0x4a   : > { %v332_v22 = vadd.f32 %v331_v63, %v330_v49  ;;  %v347_v23 = vrot.slane %v346_v14, 1  ;;  %809 = vrcp.f32 %v316_v62  ;;  %v829_v31 = vmov 1983009808  }
  0x4b   : > { %v340_v25 = vadd.f32 %v339_v16, %v338_v59  ;;  %v354_v26 = vadd.f32 %v353_v21, %v352_v60  ;;  %811 = vrcp.f32 %v324_v15  ;;  %v592_v32 = vunpack.c.l.s4 %v829_v31  ;;  %v400_v15 = vld [vmem:[%s991_s18 + $0x98] sm:$0xff]  ;;  %v405_v31 = vld [vmem:[%s991_s18 + $0xc0] sm:$0x1] }
  0x4c   : > { %v348_v27 = vadd.f32 %v347_v23, %v346_v14  ;;  %813 = vrcp.f32 %v332_v22  ;;  %v594_v33 = vlaneseq }
  0x4d   : > { %v355_v28 = vrot.slane %v354_v26, 1  ;;  %815 = vrcp.f32 %v340_v25  ;;  %v593_v35 = vunpack.c.0.s8 %v592_v32  ;;  %v388_v25 = vld [vmem:[%s991_s18 + $0x38] sm:$0xff]  ;;  %v406_v32 = vld [vmem:[%s991_s18 + $0xc8] sm:$0x1] }
  0x4e   : > { %817 = vrcp.f32 %v348_v27  ;;  %v595_v36 = vshrl.u32 %v594_v33, 7  ;;  %v402_v27 = vld [vmem:[%s991_s18 + $0xa8] sm:$0xff]  ;;  %v407_v33 = vld [vmem:[%s991_s18 + $0xd0] sm:$0x1] }
  0x4f   : > { %v356_v30 = vadd.f32 %v355_v28, %v354_v26  ;;  %v396_v26 = vld [vmem:[%s991_s18 + $0x78] sm:$0x1]  ;;  %v403_v28 = vld [vmem:[%s991_s18 + $0xb0] sm:$0xff] }
  0x50   : > { %v1007_v44 = vsub.s32 %v593_v35, %v595_v36 }
  0x51   : > { %819 = vrcp.f32 %v356_v30 }
  0x55   : > { %v806_v37 = vpop.eup %805 }
  0x56   : > { %v808_v40 = vpop.eup %807  ;;  %v365_v0 = vmul.f32 %v806_v37, %v931_v11  ;;  %v997_v41 = vmul.f32 %v806_v37, %v945_v55 }
  0x57   : > { %v810_v2 = vpop.eup %809  ;;  %v366_v3 = vmul.f32 %v808_v40, %v933_v51  ;;  %v1003_v8 = vmul.f32 %v808_v40, %v947_v56  ;;  %v392_v51 = vld [vmem:[%s991_s18 + $0x58] sm:$0x1]  ;;  %v409_v40 = vld [vmem:[%s991_s18 + $0xe0] sm:$0x1] }
  0x58   : > { %v812_v18 = vpop.eup %811  ;;  %v367_v11 = vmul.f32 %v810_v2, %v935_v12  ;;  %v1011_v55 = vmul.f32 %v810_v2, %v951_v58  ;;  %v1016_v56 = vmul.f32 %v381_v38, %v365_v0  ;;  %v1019_v5 = vmul.f32 %v389_v39, %v997_v41  ;;  %v386_v12 = vld [vmem:[%s991_s18 + $0x28] sm:$0xff]  ;;  %v387_v58 = vld [vmem:[%s991_s18 + $0x30] sm:$0xff]  ;;  %v404_v38 = vld [vmem:[%s991_s18 + $0xb8] sm:$0xff] }
  0x59   : > { %v814_v46 = vpop.eup %813  ;;  %v368_v6 = vmul.f32 %v812_v18, %v937_v19  ;;  %v376_v47 = vmul.f32 %v812_v18, %v956_v61  ;;  %v1026_v48 = vmul.f32 %v382_v1, %v366_v3  ;;  %v422_v9 = vmul.f32 %v390_v42, %v1003_v8  ;;  %v397_v19 = vld [vmem:[%s991_s18 + $0x80] sm:$0xff]  ;;  %v398_v61 = vld [vmem:[%s991_s18 + $0x88] sm:$0xff]  ;;  %v408_v39 = vld [vmem:[%s991_s18 + $0xd8] sm:$0x1] }
  0x5a   : > { %v816_v49 = vpop.eup %815  ;;  %v369_v10 = vmul.f32 %v814_v46, %v939_v52  ;;  %v377_v50 = vmul.f32 %v814_v46, %v961_v13  ;;  %v415_v59 = vmul.f32 %v383_v17, %v367_v11  ;;  %v423_v60 = vmul.f32 %v391_v43, %v1011_v55  ;;  %v395_v52 = vld [vmem:[%s991_s18 + $0x70] sm:$0x1] }
  0x5b   : > { %v818_v62 = vpop.eup %817  ;;  %v370_v63 = vmul.f32 %v816_v49, %v941_v53  ;;  %v378_v14 = vmul.f32 %v816_v49, %v966_v20  ;;  %v399_v13 = vld [vmem:[%s991_s18 + $0x90] sm:$0xff]  ;;  %v416_v16 = vmul.f32 %v384_v4, %v368_v6  ;;  %v424_v21 = vmul.f32 %v392_v51, %v376_v47  ;;  %v401_v53 = vld [vmem:[%s991_s18 + $0xa0] sm:$0xff]  ;;  %v410_v4 = vld [vmem:[%s991_s18 + $0xe8] sm:$0x1] }
  0x5c   : > { %v371_v22 = vmul.f32 %v818_v62, %v943_v54  ;;  %v379_v23 = vmul.f32 %v818_v62, %v971_v24  ;;  %v417_v20 = vmul.f32 %v385_v45, %v369_v10  ;;  %v425_v30 = vmul.f32 %v393_v7, %v377_v50  ;;  %v411_v45 = vld [vmem:[%s991_s18 + $0xf0] sm:$0x1] }
  0x5d   : > { %v418_v35 = vmul.f32 %v386_v12, %v370_v63  ;;  %v426_v54 = vmul.f32 %v394_v57, %v378_v14  ;;  %v1050_v36 = vmul.f32 %v397_v19, %v365_v0  ;;  %v1052_v24 = vmul.f32 %v398_v61, %v366_v3  ;;  %v412_v0 = vld [vmem:[%s991_s18 + $0xf8] sm:$0x1] }
  0x5e   : > { %v820_v37 = vpop.eup %819  ;;  %v419_v1 = vmul.f32 %v387_v58, %v371_v22  ;;  %v427_v42 = vmul.f32 %v395_v52, %v379_v23  ;;  %v1057_v2 = vmul.f32 %v399_v13, %v367_v11  ;;  %v1059_v17 = vmul.f32 %v400_v15, %v368_v6 }
  0x5f   : > { %v372_v43 = vmul.f32 %v820_v37, %v981_v34  ;;  %v380_v18 = vmul.f32 %v820_v37, %v976_v29  ;;  %v1066_v51 = vmul.f32 %v401_v53, %v369_v10  ;;  %v1068_v3 = vmul.f32 %v402_v27, %v370_v63 }
  0x60   : > { %v1070_v46 = vmul.f32 %v403_v28, %v371_v22  ;;  %v1073_v12 = vmul.f32 %v405_v31, %v997_v41  ;;  %v1076_v11 = vmul.f32 %v406_v32, %v1003_v8  ;;  %v1079_v6 = vmul.f32 %v407_v33, %v1011_v55 }
  0x61   : > { %v420_v34 = vmul.f32 %v388_v25, %v372_v43  ;;  %v428_v29 = vmul.f32 %v396_v26, %v380_v18  ;;  %v1081_v58 = vmul.f32 %v404_v38, %v372_v43  ;;  %v1083_v7 = vmul.f32 %v408_v39, %v376_v47 }
  0x62   : > { %v1085_v49 = vmul.f32 %v409_v40, %v377_v50  ;;  %v1087_v10 = vmul.f32 %v410_v4, %v378_v14  ;;  %v1089_v57 = vmul.f32 %v411_v45, %v379_v23  ;;  %v1091_v41 = vmul.f32 %v412_v0, %v380_v18 }
  0x63   : > { %v445_v8 = vsel %vm180_vm0, %v1019_v5, 0.0  ;;  %v453_v55 = vsel %vm180_vm0, %v422_v9, 0.0  ;;  %v461_v19 = vsel %vm180_vm0, %v423_v60, 0.0  ;;  %v469_v61 = vsel %vm180_vm0, %v424_v21, 0.0 }
  0x64   : > { %v446_v47 = vadd.f32 %v445_v8, %v1016_v56  ;;  %v454_v50 = vadd.f32 %v453_v55, %v1026_v48  ;;  %v462_v62 = vadd.f32 %v461_v19, %v415_v59  ;;  %v470_v63 = vadd.f32 %v469_v61, %v416_v16 }
  0x65   : > { %v477_v14 = vsel %vm180_vm0, %v425_v30, 0.0  ;;  %v485_v52 = vsel %vm180_vm0, %v426_v54, 0.0  ;;  %v493_v13 = vsel %vm180_vm0, %v427_v42, 0.0  ;;  %v501_v5 = vsel %vm180_vm0, %v428_v29, 0.0 }
  0x66   : > { %v447_v15 = vrot.slane %v446_v47, 4  ;;  %v455_v9 = vrot.slane %v454_v50, 4  ;;  %v463_v22 = vrot.slane %v462_v62, 4  ;;  %v471_v60 = vrot.slane %v470_v63, 4 }
  0x67   : > { %v478_v23 = vadd.f32 %v477_v14, %v417_v20  ;;  %v486_v21 = vadd.f32 %v485_v52, %v418_v35  ;;  %v494_v25 = vadd.f32 %v493_v13, %v419_v1  ;;  %v502_v56 = vadd.f32 %v501_v5, %v420_v34 }
  0x68   : > { %v448_v26 = vadd.f32 %v447_v15, %v446_v47  ;;  %v456_v48 = vadd.f32 %v455_v9, %v454_v50  ;;  %v464_v59 = vadd.f32 %v463_v22, %v462_v62  ;;  %v472_v16 = vadd.f32 %v471_v60, %v470_v63 }
  0x69   : > { %v479_v53 = vrot.slane %v478_v23, 4  ;;  %v487_v27 = vrot.slane %v486_v21, 4  ;;  %v495_v28 = vrot.slane %v494_v25, 4  ;;  %v503_v30 = vrot.slane %v502_v56, 4 }
  0x6a   : > { %v449_v31 = vrot.slane %v448_v26, 2  ;;  %v457_v32 = vrot.slane %v456_v48, 2  ;;  %v465_v33 = vrot.slane %v464_v59, 2  ;;  %v473_v54 = vrot.slane %v472_v16, 2 }
  0x6b   : > { %v480_v37 = vadd.f32 %v479_v53, %v478_v23  ;;  %v488_v38 = vadd.f32 %v487_v27, %v486_v21  ;;  %v496_v39 = vadd.f32 %v495_v28, %v494_v25  ;;  %v504_v40 = vadd.f32 %v503_v30, %v502_v56 }
  0x6c   : > { %v450_v20 = vadd.f32 %v449_v31, %v448_v26  ;;  %v458_v35 = vadd.f32 %v457_v32, %v456_v48  ;;  %v466_v1 = vadd.f32 %v465_v33, %v464_v59  ;;  %v474_v42 = vadd.f32 %v473_v54, %v472_v16 }
  0x6d   : > { %v481_v43 = vrot.slane %v480_v37, 2  ;;  %v489_v18 = vrot.slane %v488_v38, 2  ;;  %v497_v4 = vrot.slane %v496_v39, 2  ;;  %v505_v45 = vrot.slane %v504_v40, 2 }
  0x6e   : > { %v451_v0 = vrot.slane %v450_v20, 1  ;;  %v459_v34 = vrot.slane %v458_v35, 1  ;;  %v467_v29 = vrot.slane %v466_v1, 1  ;;  %v475_v8 = vrot.slane %v474_v42, 1 }
  0x6f   : > { %v482_v55 = vadd.f32 %v481_v43, %v480_v37  ;;  %v490_v19 = vadd.f32 %v489_v18, %v488_v38  ;;  %v498_v61 = vadd.f32 %v497_v4, %v496_v39  ;;  %v506_v47 = vadd.f32 %v505_v45, %v504_v40 }
  0x70   : > { %v1104_v50 = vadd.f32 %v451_v0, %v450_v20  ;;  %v1106_v62 = vadd.f32 %v459_v34, %v458_v35  ;;  %v1108_v63 = vadd.f32 %v467_v29, %v466_v1  ;;  %v1110_v14 = vadd.f32 %v475_v8, %v474_v42 }
  0x71   : > { %v483_v52 = vrot.slane %v482_v55, 1  ;;  %v491_v13 = vrot.slane %v490_v19, 1  ;;  %v499_v5 = vrot.slane %v498_v61, 1  ;;  %v507_v15 = vrot.slane %v506_v47, 1 }
  0x72   : > { %v509_v9 = vsel %vm180_vm0, %v1073_v12, 0.0  ;;  %v517_v22 = vsel %vm180_vm0, %v1076_v11, 0.0  ;;  %v525_v60 = vsel %vm180_vm0, %v1079_v6, 0.0  ;;  %v533_v23 = vsel %vm180_vm0, %v1083_v7, 0.0 }
  0x73   : > { %v1120_v21 = vadd.f32 %v483_v52, %v482_v55  ;;  %v1122_v25 = vadd.f32 %v491_v13, %v490_v19  ;;  %v1124_v56 = vadd.f32 %v499_v5, %v498_v61  ;;  %v1126_v26 = vadd.f32 %v507_v15, %v506_v47 }
  0x74   : > { %v510_v48 = vadd.f32 %v509_v9, %v1050_v36  ;;  %v518_v12 = vadd.f32 %v517_v22, %v1052_v24  ;;  %v526_v11 = vadd.f32 %v525_v60, %v1057_v2  ;;  %v534_v59 = vadd.f32 %v533_v23, %v1059_v17 }
  0x75   : > { %v541_v6 = vsel %vm180_vm0, %v1085_v49, 0.0  ;;  %v549_v7 = vsel %vm180_vm0, %v1087_v10, 0.0  ;;  %v557_v16 = vsel %vm180_vm0, %v1089_v57, 0.0  ;;  %v565_v53 = vsel %vm180_vm0, %v1091_v41, 0.0 }
  0x76   : > { %v511_v27 = vrot.slane %v510_v48, 4  ;;  %v519_v36 = vrot.slane %v518_v12, 4  ;;  %v527_v28 = vrot.slane %v526_v11, 4  ;;  %v535_v24 = vrot.slane %v534_v59, 4 }
  0x77   : > { %v542_v2 = vadd.f32 %v541_v6, %v1066_v51  ;;  %v550_v17 = vadd.f32 %v549_v7, %v1068_v3  ;;  %v558_v30 = vadd.f32 %v557_v16, %v1070_v46  ;;  %v566_v49 = vadd.f32 %v565_v53, %v1081_v58 }
  0x78   : > { %v512_v31 = vadd.f32 %v511_v27, %v510_v48  ;;  %v520_v10 = vadd.f32 %v519_v36, %v518_v12  ;;  %v528_v32 = vadd.f32 %v527_v28, %v526_v11  ;;  %v536_v33 = vadd.f32 %v535_v24, %v534_v59 }
  0x79   : > { %v543_v57 = vrot.slane %v542_v2, 4  ;;  %v551_v54 = vrot.slane %v550_v17, 4  ;;  %v559_v37 = vrot.slane %v558_v30, 4  ;;  %v567_v41 = vrot.slane %v566_v49, 4 }
  0x7a   : > { %v513_v38 = vrot.slane %v512_v31, 2  ;;  %v521_v39 = vrot.slane %v520_v10, 2  ;;  %v529_v40 = vrot.slane %v528_v32, 2  ;;  %v537_v20 = vrot.slane %v536_v33, 2 }
  0x7b   : > { %v544_v35 = vadd.f32 %v543_v57, %v542_v2  ;;  %v552_v51 = vadd.f32 %v551_v54, %v550_v17  ;;  %v560_v1 = vadd.f32 %v559_v37, %v558_v30  ;;  %v568_v3 = vadd.f32 %v567_v41, %v566_v49 }
  0x7c   : > { %v514_v42 = vadd.f32 %v513_v38, %v512_v31  ;;  %v522_v46 = vadd.f32 %v521_v39, %v520_v10  ;;  %v530_v43 = vadd.f32 %v529_v40, %v528_v32  ;;  %v538_v58 = vadd.f32 %v537_v20, %v536_v33 }
  0x7d   : > { %v545_v18 = vrot.slane %v544_v35, 2  ;;  %v553_v4 = vrot.slane %v552_v51, 2  ;;  %v561_v45 = vrot.slane %v560_v1, 2  ;;  %v569_v0 = vrot.slane %v568_v3, 2 }
  0x7e   : > { %v515_v34 = vrot.slane %v514_v42, 1  ;;  %v523_v29 = vrot.slane %v522_v46, 1  ;;  %v531_v8 = vrot.slane %v530_v43, 1  ;;  %v539_v55 = vrot.slane %v538_v58, 1 }
  0x7f   : > { %v546_v19 = vadd.f32 %v545_v18, %v544_v35  ;;  %v554_v61 = vadd.f32 %v553_v4, %v552_v51  ;;  %v562_v47 = vadd.f32 %v561_v45, %v560_v1  ;;  %v570_v52 = vadd.f32 %v569_v0, %v568_v3 }
  0x80   : > { %v516_v13 = vadd.f32 %v515_v34, %v514_v42  ;;  %v524_v5 = vadd.f32 %v523_v29, %v522_v46  ;;  %v532_v15 = vadd.f32 %v531_v8, %v530_v43  ;;  %v540_v9 = vadd.f32 %v539_v55, %v538_v58 }
  0x81   : > { %v547_v22 = vrot.slane %v546_v19, 1  ;;  %v555_v60 = vrot.slane %v554_v61, 1  ;;  %v563_v23 = vrot.slane %v562_v47, 1  ;;  %v571_v48 = vrot.slane %v570_v52, 1 }
  0x82   : > { %v589_v12 = vcombine.low %v1104_v50, %v1106_v62  ;;  %v590_v11 = vcombine.low %v1108_v63, %v1110_v14  ;;  %v606_v59 = vcombine.low %v1120_v21, %v1122_v25  ;;  %v607_v6 = vcombine.low %v1124_v56, %v1126_v26 }
  0x83   : > { %v548_v7 = vadd.f32 %v547_v22, %v546_v19  ;;  %v556_v16 = vadd.f32 %v555_v60, %v554_v61  ;;  %v564_v53 = vadd.f32 %v563_v23, %v562_v47  ;;  %v572_v27 = vadd.f32 %v571_v48, %v570_v52 }
  0x84   : > { %v597_v36 = vrot.slane %v589_v12, %v1007_v44  ;;  %v604_v28 = vrot.slane %v590_v11, %v1007_v44  ;;  %v614_v50 = vrot.slane %v606_v59, %v1007_v44  ;;  %v621_v62 = vrot.slane %v607_v6, %v1007_v44 }
  0x85   : > { %v623_v63 = vcombine.low %v516_v13, %v524_v5  ;;  %v624_v14 = vcombine.low %v532_v15, %v540_v9  ;;  %v640_v24 = vcombine.low %v548_v7, %v556_v16  ;;  %v641_v21 = vcombine.low %v564_v53, %v572_v27 }
  0x86   : > { %v605_v17 = vcombine.low %v597_v36, %v604_v28  ;;  %v622_v30 = vcombine.low %v614_v50, %v621_v62 }
  0x87   : > { %v631_v25 = vrot.slane %v623_v63, %v1007_v44  ;;  %v638_v56 = vrot.slane %v624_v14, %v1007_v44  ;;  %v648_v26 = vrot.slane %v640_v24, %v1007_v44  ;;  %v655_v2 = vrot.slane %v641_v21, %v1007_v44 }
  0x89   : > { %v639_v49 = vcombine.low %v631_v25, %v638_v56  ;;  %v656_v31 = vcombine.low %v648_v26, %v655_v2 }
  0x8b   : > { %v661_v10 = vrot.slane %v639_v49, 7  ;;  %v672_v32 = vrot.slane %v656_v31, 7 }
  0x8d   : > { %v663_v33 = vsel %vm662_vm1, %v661_v10, %v605_v17  ;;  %v673_v57 = vsel %vm662_vm1, %v672_v32, %v622_v30 }
  0x8e   : > { %v665_v54 = vsel %vm664_vm2, %v661_v10, %v663_v33  ;;  %v674_v37 = vsel %vm664_vm2, %v672_v32, %v673_v57 }
  0x8f   : > { %v667_v44 = vsel %vm666_vm3, %v661_v10, %v665_v54  ;;  %v675_v41 = vsel %vm666_vm3, %v672_v32, %v674_v37 }
  0x90   : > { %v669_v38 = vsel %vm668_vm4, %v661_v10, %v667_v44  ;;  %v676_v39 = vsel %vm668_vm4, %v672_v32, %v675_v41 }
  0x91   : > { %679 = vst [vmem:[%s163_s22] sm:$0xff] %v669_v38  ;;  %680 = vst [vmem:[%s163_s22 + $0x8] sm:$0xff] %v676_v39 }
  0x92 PF: > { %s12_s9 = sadd.s32 1, %s827_s9  }
  0x93   : > { %p9_p4 = scmp.ge.s32.totalorder %s12_s9, 4  }
  0x95   :  { %11 = sbr.rel (!%p9_p4) target bundleno = 1 (0x1), region = 61 }

</bundles_post_ra>
